<compile_context>
chip_gen: v7x
topology: tpu7x:2x2x1
jax: 0.10.0
libtpu: 0.0.40
codegen_flags: <defaults>
</compile_context>

<pallas_src>
import math
import numpy as np
import jax
import jax.numpy as jnp
from jax import lax
from jax.experimental import pallas as pl
from jax.experimental.pallas import tpu as pltpu

N_HID = 50          # implicit layer width (out_features of fc1)
TOL = 1e-4          # TanhNewtonImplicitLayer tol
MAX_ITER = 40       # TanhNewtonImplicitLayer max_iter


def _deq_kernel(inp_ref, w1t_ref, b1_ref, w_ref, wt_ref, w2_ref, b2_ref,
                out_ref, z_ref, A_ref, At_ref, done_ref):
    B = inp_ref.shape[0]
    n = w_ref.shape[0]

    inp = inp_ref[...]            # [B, 2]
    w1t = w1t_ref[...]            # [2, n]   (fc1 weight, transposed)
    b1 = b1_ref[...]              # [1, n]
    W = w_ref[...]                # [n, n]   implicit-layer weight (torch layout)
    Wt = wt_ref[...]              # [n, n]   its transpose (z @ W.T)

    # fc1:  x = inp @ W1^T + b1  (K=2, done with broadcasts instead of a tiny matmul)
    x = inp[:, 0:1] * w1t[0:1, :] + inp[:, 1:2] * w1t[1:2, :] + b1   # [B, n]

    eye = (lax.broadcasted_iota(jnp.int32, (n, n), 0)
           == lax.broadcasted_iota(jnp.int32, (n, n), 1)).astype(jnp.float32)
    lane_iota = lax.broadcasted_iota(jnp.int32, (1, n), 1)
    # contract on dim 1 of both operands: dot_general(eye, v) == v.T  ([n, B])
    tdims = (((1,), (1,)), ((), ()))

    z_ref[...] = jnp.tanh(x)
    done_ref[0] = 0

    def newton_iter(_, carry):
        @pl.when(done_ref[0] == 0)
        def _():
            z = z_ref[...]                                            # [B, n]
            t = jnp.tanh(jnp.dot(z, Wt, preferred_element_type=jnp.float32) + x)
            g = z - t                                                 # residual
            err2 = jnp.sum(jnp.sum(g * g, axis=1, keepdims=True),
                           axis=0, keepdims=True)                     # (1,1) ||g||^2
            converged = err2[0, 0] < TOL * TOL                        # scalar (global norm,
                                                                      # matches torch.norm)

            @pl.when(converged)
            def _():
                done_ref[0] = 1        # == PyTorch `break`; z is frozen from here on

            @pl.when(jnp.logical_not(converged))
            def _():
                d = 1.0 - t * t                                       # sech^2(zl), [B, n]
                dT = lax.dot_general(eye, d, tdims,
                                     preferred_element_type=jnp.float32)   # [n, B]
                # J = I - diag(sech^2) @ W, stored twice so both the pivot row and
                # the pivot column are leading-axis reads inside the GJ loop:
                #   A [row, batch, col],  At [col, batch, row]
                A_ref[...] = eye[:, None, :] - dT[:, :, None] * W[:, None, :]
                At_ref[...] = eye[:, None, :] - d[None, :, :] * Wt[:, None, :]

                # Batched Gauss-Jordan solve of J * delta = g.
                # TODO(synk): torch.linalg.solve uses pivoted LU; no partial pivoting
                # here. J = I - diag(sech^2) W is well conditioned, so results agree
                # to float tolerance (a zero pivot would produce inf/NaN).
                def gj_step(k, rhs):
                    rowk = A_ref[k]                                   # [B, n] row k of J
                    colk = At_ref[k]                                  # [B, n] col k of J
                    onehot = (lane_iota == k).astype(jnp.float32)     # [1, n]
                    pivot = jnp.sum(rowk * onehot, axis=1, keepdims=True)   # [B, 1]
                    inv_p = 1.0 / pivot
                    rowk_n = rowk * inv_p                             # normalized row k
                    rk_n = jnp.sum(rhs * onehot, axis=1, keepdims=True) * inv_p
                    # f has the column-k entries for i != k and (pivot - 1) at i == k,
                    # which folds the row-k normalization into one uniform rank-1 update
                    # (no masked merges / partial stores).
                    f = colk - onehot                                 # [B, n]
                    # [n, B] copies for the leading-axis broadcasts, via an exact
                    # identity matmul (MXU is idle in this loop).
                    fT = lax.dot_general(eye, f, tdims,
                                         preferred_element_type=jnp.float32)       # [n, B]
                    rowk_nT = lax.dot_general(eye, rowk_n, tdims,
                                              preferred_element_type=jnp.float32)  # [n, B]
                    A_ref[...] = A_ref[...] - fT[:, :, None] * rowk_n[None, :, :]
                    At_ref[...] = At_ref[...] - rowk_nT[:, :, None] * f[None, :, :]
                    return rhs - f * rk_n

                delta = lax.fori_loop(0, n, gj_step, g)               # J^{-1} g
                z_ref[...] = z - delta
        return carry

    lax.fori_loop(0, MAX_ITER, newton_iter, 0)

    # final z = tanh(W z + x)
    z = jnp.tanh(jnp.dot(z_ref[...], Wt, preferred_element_type=jnp.float32) + x)

    # fc2:  out = z @ W2^T + b2   (N=1, done as a lane reduction)
    out_ref[...] = jnp.sum(z * w2_ref[...], axis=1, keepdims=True) + b2_ref[...]


def deq_forward(x, T, params):
    B = x.shape[0]
    n = params["w"].shape[0]
    inp = jnp.concatenate([x[:, None], T[:, None]], axis=1).astype(jnp.float32)
    vmem = pl.BlockSpec(memory_space=pltpu.MemorySpace.VMEM)
    # TODO(synk): if the batch ever grows beyond toy scale, add a ("parallel",)
    # grid over batch tiles (keeps the per-block Jacobian scratch inside v7x's
    # 64 MiB VMEM and uses both TensorCores); note that would make the
    # convergence norm per-tile instead of global.
    return pl.pallas_call(
        _deq_kernel,
        out_shape=jax.ShapeDtypeStruct((B, 1), jnp.float32),
        in_specs=[vmem] * 7,
        out_specs=vmem,
        scratch_shapes=[
            pltpu.VMEM((B, n), jnp.float32),      # z   (fixed-point iterate)
            pltpu.VMEM((n, B, n), jnp.float32),   # J   [row, batch, col]
            pltpu.VMEM((n, B, n), jnp.float32),   # J^T [col, batch, row] mirror
            pltpu.SMEM((1,), jnp.int32),          # converged flag (early exit)
        ],
    )(
        inp,
        params["w1"].T,                 # [2, n]
        params["b1"][None, :],          # [1, n]
        params["w"],                    # [n, n]
        params["w"].T,                  # [n, n]
        params["w2"],                   # [1, n]
        params["b2"].reshape(1, 1),     # [1, 1]
    )


def reference_forward(x, T, params):
    """Pure-JAX mirror of the PyTorch forward (for validation)."""
    inp = jnp.concatenate([x[:, None], T[:, None]], axis=1).astype(jnp.float32)
    xx = inp @ params["w1"].T + params["b1"]
    W = params["w"]
    z = jnp.tanh(xx)
    for _ in range(MAX_ITER):
        zl = z @ W.T + xx
        g = z - jnp.tanh(zl)
        if float(jnp.linalg.norm(g)) < TOL:
            break
        d = 1.0 / jnp.cosh(zl) ** 2
        J = jnp.eye(W.shape[0], dtype=jnp.float32)[None] - d[:, :, None] * W[None]
        z = z - jnp.linalg.solve(J, g[:, :, None])[:, :, 0]
    z = jnp.tanh(z @ W.T + xx)
    return z @ params["w2"].T + params["b2"]


def init_params(key):
    """Deterministic init mimicking nn.Linear's U(-1/sqrt(fan_in), 1/sqrt(fan_in))."""
    k1, k2, k3, k4, k5 = jax.random.split(key, 5)

    def u(k, shape, fan_in):
        b = 1.0 / math.sqrt(fan_in)
        return jax.random.uniform(k, shape, jnp.float32, -b, b)

    return dict(
        w1=u(k1, (N_HID, 2), 2),        # fc1.weight
        b1=u(k2, (N_HID,), 2),          # fc1.bias
        w=u(k3, (N_HID, N_HID), N_HID), # implicit_layer.linear.weight (no bias)
        w2=u(k4, (1, N_HID), N_HID),    # fc2.weight
        b2=u(k5, (1,), N_HID),          # fc2.bias
    )


if __name__ == "__main__":
    key = jax.random.PRNGKey(0)
    pkey, xkey, tkey = jax.random.split(key, 3)
    params = init_params(pkey)

    B = 8
    x = jax.random.normal(xkey, (B,), jnp.float32)
    T = jax.random.normal(tkey, (B,), jnp.float32)

    out = deq_forward(x, T, params)
    out = jax.block_until_ready(out)
    assert out.shape == (B, 1)

    ref = reference_forward(x, T, params)
    np.testing.assert_allclose(np.asarray(out), np.asarray(ref),
                               atol=2e-3, rtol=2e-3)
    print("KERNEL_OK")
</pallas_src>

<mosaic_0001>
module attributes {stable_mosaic.version = 11 : i64} {
  func.func @_deq_kernel(%arg0: memref<8x2xf32, #tpu.memory_space<vmem>>, %arg1: memref<2x50xf32, #tpu.memory_space<vmem>>, %arg2: memref<1x50xf32, #tpu.memory_space<vmem>>, %arg3: memref<50x50xf32, #tpu.memory_space<vmem>>, %arg4: memref<50x50xf32, #tpu.memory_space<vmem>>, %arg5: memref<1x50xf32, #tpu.memory_space<vmem>>, %arg6: memref<1x1xf32, #tpu.memory_space<vmem>>, %arg7: memref<8x1xf32, #tpu.memory_space<vmem>>, %arg8: memref<8x50xf32, #tpu.memory_space<vmem>>, %arg9: memref<50x8x50xf32, #tpu.memory_space<vmem>>, %arg10: memref<50x8x50xf32, #tpu.memory_space<vmem>>, %arg11: memref<1xi32, #tpu.memory_space<smem>>) attributes {dimension_semantics = [], scalar_prefetch = 0 : i64, scratch_operands = 4 : i64, tpu.core_type = #tpu.core_type<tc>} {
    %c0 = arith.constant 0 : index
    %c0_0 = arith.constant 0 : index
    %0 = vector.load %arg0[%c0, %c0_0] : memref<8x2xf32, #tpu.memory_space<vmem>>, vector<8x2xf32>
    %c0_1 = arith.constant 0 : index
    %c0_2 = arith.constant 0 : index
    %1 = vector.load %arg1[%c0_1, %c0_2] : memref<2x50xf32, #tpu.memory_space<vmem>>, vector<2x50xf32>
    %c0_3 = arith.constant 0 : index
    %c0_4 = arith.constant 0 : index
    %2 = vector.load %arg2[%c0_3, %c0_4] : memref<1x50xf32, #tpu.memory_space<vmem>>, vector<1x50xf32>
    %c0_5 = arith.constant 0 : index
    %c0_6 = arith.constant 0 : index
    %3 = vector.load %arg3[%c0_5, %c0_6] : memref<50x50xf32, #tpu.memory_space<vmem>>, vector<50x50xf32>
    %c0_7 = arith.constant 0 : index
    %c0_8 = arith.constant 0 : index
    %4 = vector.load %arg4[%c0_7, %c0_8] : memref<50x50xf32, #tpu.memory_space<vmem>>, vector<50x50xf32>
    %5 = vector.extract_strided_slice %0 {offsets = [0, 0], sizes = [8, 1], strides = [1, 1]} : vector<8x2xf32> to vector<8x1xf32>
    %6 = vector.extract_strided_slice %1 {offsets = [0, 0], sizes = [1, 50], strides = [1, 1]} : vector<2x50xf32> to vector<1x50xf32>
    %7 = vector.broadcast %5 : vector<8x1xf32> to vector<8x50xf32>
    %8 = vector.broadcast %6 : vector<1x50xf32> to vector<8x50xf32>
    %9 = arith.mulf %7, %8 : vector<8x50xf32>
    %10 = vector.extract_strided_slice %0 {offsets = [0, 1], sizes = [8, 1], strides = [1, 1]} : vector<8x2xf32> to vector<8x1xf32>
    %11 = vector.extract_strided_slice %1 {offsets = [1, 0], sizes = [1, 50], strides = [1, 1]} : vector<2x50xf32> to vector<1x50xf32>
    %12 = vector.broadcast %10 : vector<8x1xf32> to vector<8x50xf32>
    %13 = vector.broadcast %11 : vector<1x50xf32> to vector<8x50xf32>
    %14 = arith.mulf %12, %13 : vector<8x50xf32>
    %15 = arith.addf %9, %14 : vector<8x50xf32>
    %16 = vector.broadcast %2 : vector<1x50xf32> to vector<8x50xf32>
    %17 = arith.addf %15, %16 : vector<8x50xf32>
    %18 = tpu.iota {dimensions = array<i32: 0>} : vector<50x50xi32>
    %19 = tpu.iota {dimensions = array<i32: 1>} : vector<50x50xi32>
    %20 = arith.cmpi eq, %18, %19 : vector<50x50xi32>
    %21 = arith.extui %20 : vector<50x50xi1> to vector<50x50xi32>
    %22 = arith.sitofp %21 : vector<50x50xi32> to vector<50x50xf32>
    %23 = tpu.iota {dimensions = array<i32: 1>} : vector<1x50xi32>
    %24 = math.tanh %17 : vector<8x50xf32>
    %c0_9 = arith.constant 0 : index
    %c0_10 = arith.constant 0 : index
    %25 = vector.load %arg8[%c0_9, %c0_10] : memref<8x50xf32, #tpu.memory_space<vmem>>, vector<8x50xf32>
    tpu.vector_store %arg8[%c0_9, %c0_10], %24 {strides = array<i32>} : memref<8x50xf32, #tpu.memory_space<vmem>>, vector<8x50xf32>,
    %c0_i32 = arith.constant 0 : i32
    %c0_11 = arith.constant 0 : index
    %26 = memref.load %arg11[%c0_11] : memref<1xi32, #tpu.memory_space<smem>>
    memref.store %c0_i32, %arg11[%c0_11] : memref<1xi32, #tpu.memory_space<smem>>
    %c0_i32_12 = arith.constant 0 : i32
    %c40_i32 = arith.constant 40 : i32
    %27 = arith.addi %c0_i32_12, %c40_i32 : i32
    %c1_i32 = arith.constant 1 : i32
    scf.for %arg12 = %c0_i32_12 to %27 step %c1_i32  : i32 {
      %c0_22 = arith.constant 0 : index
      %41 = memref.load %arg11[%c0_22] : memref<1xi32, #tpu.memory_space<smem>>
      %c0_i32_23 = arith.constant 0 : i32
      %42 = arith.cmpi eq, %41, %c0_i32_23 : i32
      %43 = arith.extui %42 : i1 to i32
      %c0_i32_24 = arith.constant 0 : i32
      %44 = arith.cmpi ne, %43, %c0_i32_24 : i32
      scf.if %44 {
        %c0_25 = arith.constant 0 : index
        %c0_26 = arith.constant 0 : index
        %45 = vector.load %arg8[%c0_25, %c0_26] : memref<8x50xf32, #tpu.memory_space<vmem>>, vector<8x50xf32>
        %cst_27 = arith.constant dense<0.000000e+00> : vector<8x50xf32>
        %46 = tpu.matmul %45, %4, %cst_27 {dimension_numbers = #tpu.dot_dimension_numbers<[1], [0], [0], [1], [0, 0, 1, 1], [], []>} : vector<8x50xf32>, vector<50x50xf32>, vector<8x50xf32> -> vector<8x50xf32>
        %47 = arith.addf %46, %17 : vector<8x50xf32>
        %48 = math.tanh %47 : vector<8x50xf32>
        %49 = arith.subf %45, %48 : vector<8x50xf32>
        %50 = arith.mulf %49, %49 : vector<8x50xf32>
        %cst_28 = arith.constant dense<0.000000e+00> : vector<8xf32>
        %51 = vector.multi_reduction <add>, %50, %cst_28 [1] : vector<8x50xf32> to vector<8xf32>
        %52 = vector.shape_cast %51 : vector<8xf32> to vector<8x1xf32>
        %cst_29 = arith.constant dense<0.000000e+00> : vector<1xf32>
        %53 = vector.multi_reduction <add>, %52, %cst_29 [0] : vector<8x1xf32> to vector<1xf32>
        %54 = vector.shape_cast %53 : vector<1xf32> to vector<1x1xf32>
        %55 = vector.extract %54[0, 0] : f32 from vector<1x1xf32>
        %cst_30 = arith.constant 9.99999993E-9 : f32
        %56 = arith.cmpf olt, %55, %cst_30 : f32
        %57 = arith.extui %56 : i1 to i32
        %c0_i32_31 = arith.constant 0 : i32
        %58 = arith.cmpi ne, %57, %c0_i32_31 : i32
        scf.if %58 {
          %c1_i32_33 = arith.constant 1 : i32
          %c0_34 = arith.constant 0 : index
          %62 = memref.load %arg11[%c0_34] : memref<1xi32, #tpu.memory_space<smem>>
          memref.store %c1_i32_33, %arg11[%c0_34] : memref<1xi32, #tpu.memory_space<smem>>
        } else {
        }
        %true = arith.constant true
        %59 = arith.xori %56, %true : i1
        %60 = arith.extui %59 : i1 to i32
        %c0_i32_32 = arith.constant 0 : i32
        %61 = arith.cmpi ne, %60, %c0_i32_32 : i32
        scf.if %61 {
          %62 = arith.mulf %48, %48 : vector<8x50xf32>
          %cst_33 = arith.constant 1.000000e+00 : f32
          %63 = vector.broadcast %cst_33 : f32 to vector<8x50xf32>
          %64 = arith.subf %63, %62 : vector<8x50xf32>
          %cst_34 = arith.constant dense<0.000000e+00> : vector<50x8xf32>
          %65 = tpu.matmul %22, %64, %cst_34 {dimension_numbers = #tpu.dot_dimension_numbers<[1], [1], [0], [0], [0, 0, 1, 0], [], []>} : vector<50x50xf32>, vector<8x50xf32>, vector<50x8xf32> -> vector<50x8xf32>
          %66 = vector.shape_cast %22 : vector<50x50xf32> to vector<50x1x50xf32>
          %67 = vector.shape_cast %65 : vector<50x8xf32> to vector<50x8x1xf32>
          %68 = vector.shape_cast %3 : vector<50x50xf32> to vector<50x1x50xf32>
          %69 = vector.broadcast %67 : vector<50x8x1xf32> to vector<50x8x50xf32>
          %70 = vector.broadcast %68 : vector<50x1x50xf32> to vector<50x8x50xf32>
          %71 = arith.mulf %69, %70 : vector<50x8x50xf32>
          %72 = vector.broadcast %66 : vector<50x1x50xf32> to vector<50x8x50xf32>
          %73 = arith.subf %72, %71 : vector<50x8x50xf32>
          %c0_35 = arith.constant 0 : index
          %c0_36 = arith.constant 0 : index
          %c0_37 = arith.constant 0 : index
          %74 = vector.load %arg9[%c0_35, %c0_36, %c0_37] : memref<50x8x50xf32, #tpu.memory_space<vmem>>, vector<50x8x50xf32>
          tpu.vector_store %arg9[%c0_35, %c0_36, %c0_37], %73 {strides = array<i32>} : memref<50x8x50xf32, #tpu.memory_space<vmem>>, vector<50x8x50xf32>,
          %75 = vector.shape_cast %22 : vector<50x50xf32> to vector<50x1x50xf32>
          %76 = vector.shape_cast %64 : vector<8x50xf32> to vector<1x8x50xf32>
          %77 = vector.shape_cast %4 : vector<50x50xf32> to vector<50x1x50xf32>
          %78 = vector.broadcast %76 : vector<1x8x50xf32> to vector<50x8x50xf32>
          %79 = vector.broadcast %77 : vector<50x1x50xf32> to vector<50x8x50xf32>
          %80 = arith.mulf %78, %79 : vector<50x8x50xf32>
          %81 = vector.broadcast %75 : vector<50x1x50xf32> to vector<50x8x50xf32>
          %82 = arith.subf %81, %80 : vector<50x8x50xf32>
          %c0_38 = arith.constant 0 : index
          %c0_39 = arith.constant 0 : index
          %c0_40 = arith.constant 0 : index
          %83 = vector.load %arg10[%c0_38, %c0_39, %c0_40] : memref<50x8x50xf32, #tpu.memory_space<vmem>>, vector<50x8x50xf32>
          tpu.vector_store %arg10[%c0_38, %c0_39, %c0_40], %82 {strides = array<i32>} : memref<50x8x50xf32, #tpu.memory_space<vmem>>, vector<50x8x50xf32>,
          %c0_i32_41 = arith.constant 0 : i32
          %c50_i32 = arith.constant 50 : i32
          %84 = arith.addi %c0_i32_41, %c50_i32 : i32
          %c1_i32_42 = arith.constant 1 : i32
          %85 = scf.for %arg13 = %c0_i32_41 to %84 step %c1_i32_42 iter_args(%arg14 = %49) -> (vector<8x50xf32>)  : i32 {
            %88 = arith.index_cast %arg13 : i32 to index
            %c0_46 = arith.constant 0 : index
            %c0_47 = arith.constant 0 : index
            %89 = vector.load %arg9[%88, %c0_46, %c0_47] : memref<50x8x50xf32, #tpu.memory_space<vmem>>, vector<1x8x50xf32>
            %90 = vector.shape_cast %89 : vector<1x8x50xf32> to vector<8x50xf32>
            %91 = arith.index_cast %arg13 : i32 to index
            %c0_48 = arith.constant 0 : index
            %c0_49 = arith.constant 0 : index
            %92 = vector.load %arg10[%91, %c0_48, %c0_49] : memref<50x8x50xf32, #tpu.memory_space<vmem>>, vector<1x8x50xf32>
            %93 = vector.shape_cast %92 : vector<1x8x50xf32> to vector<8x50xf32>
            %94 = vector.broadcast %arg13 : i32 to vector<1x50xi32>
            %95 = arith.cmpi eq, %23, %94 : vector<1x50xi32>
            %96 = arith.extui %95 : vector<1x50xi1> to vector<1x50xi32>
            %97 = arith.sitofp %96 : vector<1x50xi32> to vector<1x50xf32>
            %98 = vector.broadcast %97 : vector<1x50xf32> to vector<8x50xf32>
            %99 = arith.mulf %90, %98 : vector<8x50xf32>
            %cst_50 = arith.constant dense<0.000000e+00> : vector<8xf32>
            %100 = vector.multi_reduction <add>, %99, %cst_50 [1] : vector<8x50xf32> to vector<8xf32>
            %101 = vector.shape_cast %100 : vector<8xf32> to vector<8x1xf32>
            %cst_51 = arith.constant 1.000000e+00 : f32
            %102 = vector.broadcast %cst_51 : f32 to vector<8x1xf32>
            %103 = arith.divf %102, %101 : vector<8x1xf32>
            %104 = vector.broadcast %103 : vector<8x1xf32> to vector<8x50xf32>
            %105 = arith.mulf %90, %104 : vector<8x50xf32>
            %106 = vector.broadcast %97 : vector<1x50xf32> to vector<8x50xf32>
            %107 = arith.mulf %arg14, %106 : vector<8x50xf32>
            %cst_52 = arith.constant dense<0.000000e+00> : vector<8xf32>
            %108 = vector.multi_reduction <add>, %107, %cst_52 [1] : vector<8x50xf32> to vector<8xf32>
            %109 = vector.shape_cast %108 : vector<8xf32> to vector<8x1xf32>
            %110 = arith.mulf %109, %103 : vector<8x1xf32>
            %111 = vector.broadcast %97 : vector<1x50xf32> to vector<8x50xf32>
            %112 = arith.subf %93, %111 : vector<8x50xf32>
            %cst_53 = arith.constant dense<0.000000e+00> : vector<50x8xf32>
            %113 = tpu.matmul %22, %112, %cst_53 {dimension_numbers = #tpu.dot_dimension_numbers<[1], [1], [0], [0], [0, 0, 1, 0], [], []>} : vector<50x50xf32>, vector<8x50xf32>, vector<50x8xf32> -> vector<50x8xf32>
            %cst_54 = arith.constant dense<0.000000e+00> : vector<50x8xf32>
            %114 = tpu.matmul %22, %105, %cst_54 {dimension_numbers = #tpu.dot_dimension_numbers<[1], [1], [0], [0], [0, 0, 1, 0], [], []>} : vector<50x50xf32>, vector<8x50xf32>, vector<50x8xf32> -> vector<50x8xf32>
            %c0_55 = arith.constant 0 : index
            %c0_56 = arith.constant 0 : index
            %c0_57 = arith.constant 0 : index
            %115 = vector.load %arg9[%c0_55, %c0_56, %c0_57] : memref<50x8x50xf32, #tpu.memory_space<vmem>>, vector<50x8x50xf32>
            %116 = vector.shape_cast %113 : vector<50x8xf32> to vector<50x8x1xf32>
            %117 = vector.shape_cast %105 : vector<8x50xf32> to vector<1x8x50xf32>
            %118 = vector.broadcast %116 : vector<50x8x1xf32> to vector<50x8x50xf32>
            %119 = vector.broadcast %117 : vector<1x8x50xf32> to vector<50x8x50xf32>
            %120 = arith.mulf %118, %119 : vector<50x8x50xf32>
            %121 = arith.subf %115, %120 : vector<50x8x50xf32>
            %c0_58 = arith.constant 0 : index
            %c0_59 = arith.constant 0 : index
            %c0_60 = arith.constant 0 : index
            %122 = vector.load %arg9[%c0_58, %c0_59, %c0_60] : memref<50x8x50xf32, #tpu.memory_space<vmem>>, vector<50x8x50xf32>
            tpu.vector_store %arg9[%c0_58, %c0_59, %c0_60], %121 {strides = array<i32>} : memref<50x8x50xf32, #tpu.memory_space<vmem>>, vector<50x8x50xf32>,
            %c0_61 = arith.constant 0 : index
            %c0_62 = arith.constant 0 : index
            %c0_63 = arith.constant 0 : index
            %123 = vector.load %arg10[%c0_61, %c0_62, %c0_63] : memref<50x8x50xf32, #tpu.memory_space<vmem>>, vector<50x8x50xf32>
            %124 = vector.shape_cast %114 : vector<50x8xf32> to vector<50x8x1xf32>
            %125 = vector.shape_cast %112 : vector<8x50xf32> to vector<1x8x50xf32>
            %126 = vector.broadcast %124 : vector<50x8x1xf32> to vector<50x8x50xf32>
            %127 = vector.broadcast %125 : vector<1x8x50xf32> to vector<50x8x50xf32>
            %128 = arith.mulf %126, %127 : vector<50x8x50xf32>
            %129 = arith.subf %123, %128 : vector<50x8x50xf32>
            %c0_64 = arith.constant 0 : index
            %c0_65 = arith.constant 0 : index
            %c0_66 = arith.constant 0 : index
            %130 = vector.load %arg10[%c0_64, %c0_65, %c0_66] : memref<50x8x50xf32, #tpu.memory_space<vmem>>, vector<50x8x50xf32>
            tpu.vector_store %arg10[%c0_64, %c0_65, %c0_66], %129 {strides = array<i32>} : memref<50x8x50xf32, #tpu.memory_space<vmem>>, vector<50x8x50xf32>,
            %131 = vector.broadcast %110 : vector<8x1xf32> to vector<8x50xf32>
            %132 = arith.mulf %112, %131 : vector<8x50xf32>
            %133 = arith.subf %arg14, %132 : vector<8x50xf32>
            scf.yield %133 : vector<8x50xf32>
          }
          %c50_i32_43 = arith.constant 50 : i32
          %86 = arith.subf %45, %85 : vector<8x50xf32>
          %c0_44 = arith.constant 0 : index
          %c0_45 = arith.constant 0 : index
          %87 = vector.load %arg8[%c0_44, %c0_45] : memref<8x50xf32, #tpu.memory_space<vmem>>, vector<8x50xf32>
          tpu.vector_store %arg8[%c0_44, %c0_45], %86 {strides = array<i32>} : memref<8x50xf32, #tpu.memory_space<vmem>>, vector<8x50xf32>,
        } else {
        }
      } else {
      }
    }
    %c0_13 = arith.constant 0 : index
    %c0_14 = arith.constant 0 : index
    %28 = vector.load %arg8[%c0_13, %c0_14] : memref<8x50xf32, #tpu.memory_space<vmem>>, vector<8x50xf32>
    %cst = arith.constant dense<0.000000e+00> : vector<8x50xf32>
    %29 = tpu.matmul %28, %4, %cst {dimension_numbers = #tpu.dot_dimension_numbers<[1], [0], [0], [1], [0, 0, 1, 1], [], []>} : vector<8x50xf32>, vector<50x50xf32>, vector<8x50xf32> -> vector<8x50xf32>
    %30 = arith.addf %29, %17 : vector<8x50xf32>
    %31 = math.tanh %30 : vector<8x50xf32>
    %c0_15 = arith.constant 0 : index
    %c0_16 = arith.constant 0 : index
    %32 = vector.load %arg5[%c0_15, %c0_16] : memref<1x50xf32, #tpu.memory_space<vmem>>, vector<1x50xf32>
    %33 = vector.broadcast %32 : vector<1x50xf32> to vector<8x50xf32>
    %34 = arith.mulf %31, %33 : vector<8x50xf32>
    %cst_17 = arith.constant dense<0.000000e+00> : vector<8xf32>
    %35 = vector.multi_reduction <add>, %34, %cst_17 [1] : vector<8x50xf32> to vector<8xf32>
    %36 = vector.shape_cast %35 : vector<8xf32> to vector<8x1xf32>
    %c0_18 = arith.constant 0 : index
    %c0_19 = arith.constant 0 : index
    %37 = vector.load %arg6[%c0_18, %c0_19] : memref<1x1xf32, #tpu.memory_space<vmem>>, vector<1x1xf32>
    %38 = vector.broadcast %37 : vector<1x1xf32> to vector<8x1xf32>
    %39 = arith.addf %36, %38 : vector<8x1xf32>
    %c0_20 = arith.constant 0 : index
    %c0_21 = arith.constant 0 : index
    %40 = vector.load %arg7[%c0_20, %c0_21] : memref<8x1xf32, #tpu.memory_space<vmem>>, vector<8x1xf32>
    tpu.vector_store %arg7[%c0_20, %c0_21], %39 {strides = array<i32>} : memref<8x1xf32, #tpu.memory_space<vmem>>, vector<8x1xf32>,
    return
  }
}

</mosaic_0001>

<bundles_post_ra>
// kernel: tpu_custom_call.1
= control target key start
LH: loop header
LB: loop body
LE: loop exit
PB: predicated region body
PF: predicated region fallthrough
CT: control target
= control target key end

     0   :  { %s6149_s0 = inlined_call_operand.vmem [shape: f32[8,2], index: 0, kind: input, shape index: {}]   ;;  %s6150_s1 = inlined_call_operand.vmem [shape: f32[2,50], index: 1, kind: input, shape index: {}]   ;;  %s6151_s2 = inlined_call_operand.vmem [shape: f32[1,50], index: 2, kind: input, shape index: {}]   ;;  %s6152_s3 = inlined_call_operand.hbm [shape: f32[50,50], index: 3, kind: input, shape index: {}]   ;;  %s6153_s4 = inlined_call_operand.hbm [shape: f32[50,50], index: 4, kind: input, shape index: {}]   ;;  %s6154_s5 = inlined_call_operand.vmem [shape: f32[1,50], index: 5, kind: input, shape index: {}]   ;;  %s6155_s6 = inlined_call_operand.<no memory space> [shape: f32[1,1], index: 6, kind: input, shape index: {}]   ;;  %s6156_s7 = inlined_call_operand.vmem [shape: f32[8,1], index: 7, kind: output, shape index: {}]  }
   0x1   :  { %v12_v0 = vstv %s6155_s6 }
   0x2   :  { %13 = vst [vmem:[#allocation6] sm:$0x1] %v12_v0 }
   0x3   :  { %14 = vsyncpa [#allocation8], 0 }
   0x4   :  { %15 = vsyncpa [#allocation10], 0  ;;  %s4528_s26 = smov [#allocation7]   ;;  %s4456_s30 = scalar_lea.hbm %s6152_s3, 896 }
   0x5   :  { %s27_s27 = sshll.u32 %s4528_s26, 4  ;;  %p4457_p0 = scmp.ne.s32.totalorder %s6152_s3, %s4456_s30  ;;  %s28_s27 = int_to_ptr.vmem [resolvable:$true] %s27_s27 }
   0x6   :  { %p4460_p1 = scmp.lt.u32.totalorder %s4456_s30, %s6152_s3 }
   0x8   :  { %p4462_p2 = pnand %p4460_p1, %p4457_p0 }
   0xa   :  { %4465 = shalt.err (!%p4462_p2)
}
   0xb   :  { %s4466_s6 = scalar_lea.vmem %s28_s27, 896  ;;  %p4471_p4 = scmp.lt.s32.totalorder %s28_s27, %s28_s27 }
   0xc   :  { %p4467_p3 = scmp.ne.s32.totalorder %s28_s27, %s4466_s6  ;;  %p4472_p5 = scmp.lt.s32.totalorder %s4466_s6, %s4466_s6 }
   0xe   :  { %p4473_p6 = por %p4472_p5, %p4471_p4 }
  0x10   :  { %p4474_p7 = pnand %p4473_p6, %p4467_p3 }
  0x12   :  { %4477 = shalt.err (!%p4474_p7)
}
  0x13   :  { %s4529_s12 = smov 128   ;;  %s4530_s13 = smov 8  }
  0x14   :  { %33 = dma.hbm_to_vmem [thread:$0]  %s6152_s3, 896, %s28_s27, [#allocation8], %s4529_s12, %s4529_s12, %s4530_s13  }
  0x15   :  { %s4531_s16 = smov [#allocation9]   ;;  %s4478_s20 = scalar_lea.hbm %s6153_s4, 896 }
  0x16   :  { %s39_s17 = sshll.u32 %s4531_s16, 4  ;;  %p4479_p8 = scmp.ne.s32.totalorder %s6153_s4, %s4478_s20  ;;  %s40_s17 = int_to_ptr.vmem [resolvable:$true] %s39_s17 }
  0x17   :  { %p4482_p9 = scmp.lt.u32.totalorder %s4478_s20, %s6153_s4 }
  0x19   :  { %p4484_p10 = pnand %p4482_p9, %p4479_p8 }
  0x1b   :  { %4487 = shalt.err (!%p4484_p10)
}
  0x1c   :  { %s4488_s25 = scalar_lea.vmem %s40_s17, 896  ;;  %p4493_p12 = scmp.lt.s32.totalorder %s40_s17, %s40_s17 }
  0x1d   :  { %p4489_p11 = scmp.ne.s32.totalorder %s40_s17, %s4488_s25  ;;  %p4494_p13 = scmp.lt.s32.totalorder %s4488_s25, %s4488_s25 }
  0x1f   :  { %p4495_p0 = por %p4494_p13, %p4493_p12 }
  0x21   :  { %p4496_p1 = pnand %p4495_p0, %p4489_p11 }
  0x23   :  { %4499 = shalt.err (!%p4496_p1)
}
  0x24   :  { %45 = dma.hbm_to_vmem [thread:$0]  %s6153_s4, 896, %s40_s17, [#allocation10], %s4529_s12, %s4529_s12, %s4530_s13  }
  0x25   :  { %4512 = dma.done.wait [#allocation8], 896  }
  0x26   :  { %4513 = vsyncadd [#allocation8], 4294966400 }
  0x27   :  { %4514 = dma.done.wait [#allocation10], 896  }
  0x28   :  { %4515 = vsyncadd [#allocation10], 4294966400  ;;  %v78_v1 = vlaneseq  ;;  %s4532_s27 = smov 0   ;;  %v4533_v2 = vmov 0   ;;  %v6157_v11 = vmov 0.0   ;;  %v4632_v13 = vld [vmem:[#allocation7] sm:$0xff] }
  0x29   :  { %135 = sst [smem:[#allocation5]] %s4532_s27  ;;  %4446 = vset.pattern.permute.xlu0 %v4533_v2  ;;  %6220 = vst [vmem:[#allocation16_spill] sm:$0xff] %v4632_v13  ;;  %v4634_v14 = vld [vmem:[#allocation7 + $0x8] sm:$0xff]  ;;  %v4636_v15 = vld [vmem:[#allocation7 + $0x10] sm:$0xff]  ;;  %v4644_v17 = vld [vmem:[#allocation7 + $0x18] sm:$0xff]  ;;  %v4535_v34 = vmov 1  }
  0x2a   :  { %v4614_v3 = vshrl.u32 %v78_v1, 7  ;;  %v4616_v4 = vand.u32 127, %v78_v1  ;;  %6221 = vst [vmem:[#allocation17_spill] sm:$0xff] %v4636_v15  ;;  %6223 = vst [vmem:[#allocation19_spill] sm:$0xff] %v4644_v17  ;;  %v4646_v18 = vld [vmem:[#allocation7 + $0x20] sm:$0xff]  ;;  %v4648_v19 = vld [vmem:[#allocation7 + $0x28] sm:$0xff] }
  0x2b   :  { %6224 = vst [vmem:[#allocation20_spill] sm:$0xff] %v4646_v18  ;;  %v4659_v23 = vld.sshfl [vmem:[#allocation7 + $0x30] sm:$0x11 pattern:$0x75316420]  ;;  %v4661_v24 = vld [vmem:[#allocation9] sm:$0xff] }
  0x2c   :  { %6217 = vst [vmem:[#allocation13_spill] sm:$0xff] %v4614_v3  ;;  %6218 = vst [vmem:[#allocation14_spill] sm:$0xff] %v4616_v4  ;;  %v102_v5 = vadd.s32 8, %v4614_v3  ;;  %v103_v6 = vadd.s32 16, %v4614_v3  ;;  %v104_v7 = vadd.s32 24, %v4614_v3  ;;  %v105_v8 = vadd.s32 32, %v4614_v3 }
  0x2d   :  { %v106_v9 = vadd.s32 40, %v4614_v3  ;;  %v107_v10 = vadd.s32 48, %v4614_v3  ;;  %vm110_vm0 = vcmp.eq.s32.totalorder %v4614_v3, %v4616_v4  ;;  %6228 = vst [vmem:[#allocation24_spill] sm:$0xff] %v4659_v23  ;;  %6229 = vst [vmem:[#allocation25_spill] sm:$0xff] %v4661_v24  ;;  %v4663_v25 = vld [vmem:[#allocation9 + $0x8] sm:$0xff]  ;;  %v4665_v26 = vld [vmem:[#allocation9 + $0x10] sm:$0xff] }
  0x2e   :  { %vm111_vm1 = vcmp.eq.s32.totalorder %v102_v5, %v4616_v4  ;;  %vm112_vm2 = vcmp.eq.s32.totalorder %v103_v6, %v4616_v4  ;;  %vm113_vm3 = vcmp.eq.s32.totalorder %v104_v7, %v4616_v4  ;;  %v4630_v12 = vsel %vm110_vm0, 1.0, %v6157_v11  ;;  %6230 = vst [vmem:[#allocation26_spill] sm:$0xff] %v4663_v25  ;;  %6231 = vst [vmem:[#allocation27_spill] sm:$0xff] %v4665_v26  ;;  %v4667_v27 = vld [vmem:[#allocation9 + $0x18] sm:$0xff]  ;;  %v4669_v28 = vld [vmem:[#allocation9 + $0x20] sm:$0xff] }
  0x2f   :  { %6219 = vst [vmem:[#allocation15_spill] sm:$0xff] %v4630_v12  ;;  %vm114_vm4 = vcmp.eq.s32.totalorder %v105_v8, %v4616_v4  ;;  %vm115_vm5 = vcmp.eq.s32.totalorder %v106_v9, %v4616_v4  ;;  %vm116_vm6 = vcmp.eq.s32.totalorder %v107_v10, %v4616_v4  ;;  %v4642_v16 = vsel %vm111_vm1, 1.0, %v6157_v11  ;;  %6232 = vst [vmem:[#allocation28_spill] sm:$0xff] %v4667_v27  ;;  %v4677_v31 = vld [vmem:[#allocation9 + $0x28] sm:$0xff]  ;;  %v4679_v32 = vld [vmem:[#allocation9 + $0x30] sm:$0x3] }
  0x30   :  { %6222 = vst [vmem:[#allocation18_spill] sm:$0xff] %v4642_v16  ;;  %v4651_v20 = vsel %vm112_vm2, 1.0, %v6157_v11  ;;  %v4654_v21 = vsel %vm113_vm3, 1.0, %v6157_v11  ;;  %v4657_v22 = vsel %vm114_vm4, 1.0, %v6157_v11  ;;  %6233 = vst [vmem:[#allocation29_spill] sm:$0xff] %v4669_v28  ;;  %v4672_v29 = vsel %vm115_vm5, 1.0, %v6157_v11 }
  0x31   :  { %6225 = vst [vmem:[#allocation21_spill] sm:$0xff] %v4651_v20  ;;  %6226 = vst [vmem:[#allocation22_spill] sm:$0xff] %v4654_v21  ;;  %v4675_v30 = vsel %vm116_vm6, 1.0, %v6157_v11  ;;  %v56_v33 = vld [vmem:[%s6149_s0] sm:$0xff]  ;;  %v4685_v35 = vsub.s32 0, %v4614_v3  ;;  %v4688_v36 = vsub.s32 1, %v4614_v3 }
  0x32   :  { %6227 = vst [vmem:[#allocation23_spill] sm:$0xff] %v4657_v22  ;;  %6234 = vst [vmem:[#allocation30_spill] sm:$0xff] %v4672_v29  ;;  %75 = vperm.xlu0 %4446, %v56_v33   ;;  %v57_v37 = vld [vmem:[%s6150_s1] sm:$0x3]  ;;  %vm132_vm7 = vcmask 408576   ;;  %s4702_s1 = smov 0  }
  0x33   :  { %6235 = vst [vmem:[#allocation31_spill] sm:$0xff] %v4677_v31  ;;  %6236 = vst [vmem:[#allocation32_spill] sm:$0xff] %v4688_v36  ;;  %v81_v39 = vrot.slane %v57_v37, %v4685_v35  ;;  %v90_v40 = vrot.slane %v57_v37, %v4688_v36  ;;  %v4195_v44 = vld [vmem:[%s6151_s2] ss:$0 sm:$0xff] }
  0x36   :  { %4447 = vset.pattern.permute.xlu0 %v4535_v34 }
  0x37   :  { %84 = vperm.xlu0 %4447, %v56_v33  }
  0xb1   :  { %v76_v38 = vpop.permute.xlu0 %75 }
  0xb2   :  { %v82_v42 = vmul.f32 %v81_v39, %v76_v38 }
  0xb6   :  { %v85_v41 = vpop.permute.xlu0 %84 }
  0xb7   :  { %v91_v43 = vmul.f32 %v90_v40, %v85_v41 }
  0xb9   :  { %v92_v45 = vadd.f32 %v91_v43, %v82_v42 }
  0xbb   :  { %v4698_v46 = vadd.f32 %v4195_v44, %v92_v45 }
  0xbd   :  { %6237 = vst [vmem:[#allocation33_spill] sm:$0xff] %v4698_v46  ;;  %4448 = vtanh.f32 %v4698_v46 }
  0xc7   :  { %v4449_v47 = vpop.eup %4448 }
  0xc8   :  { %133 = vst.msk [vmem:[#allocation2] sm:$0xff] %vm132_vm7, %v4449_v47 }
  0xc9 LB: > { %v6238_v18 = vld [vmem:[#allocation20_spill] sm:$0xff]  ;;  %v6240_v21 = vld [vmem:[#allocation22_spill] sm:$0xff]  ;;  %v6241_v20 = vld [vmem:[#allocation21_spill] sm:$0xff]  ;;  %s142_s9 = sld [smem:[#allocation5]]  ;;  %s4518_s1 = sphi %s4702_s1, %s141_s1  }
  0xca   : > { %v6239_v27 = vld [vmem:[#allocation28_spill] sm:$0xff]  ;;  %v6243_v26 = vld [vmem:[#allocation27_spill] sm:$0xff]  ;;  %v6245_v29 = vld [vmem:[#allocation30_spill] sm:$0xff] }
  0xcb   : > { %v6242_v36 = vld [vmem:[#allocation32_spill] sm:$0xff]  ;;  %v6246_v31 = vld [vmem:[#allocation31_spill] sm:$0xff]  ;;  %v6247_v16 = vld [vmem:[#allocation18_spill] sm:$0xff] }
  0xcc   : > { %v6244_v13 = vld [vmem:[#allocation16_spill] sm:$0xff]  ;;  %v6248_v25 = vld [vmem:[#allocation26_spill] sm:$0xff]  ;;  %v6249_v12 = vld [vmem:[#allocation15_spill] sm:$0xff] }
  0xcd   : > { %v6250_v28 = vld [vmem:[#allocation29_spill] sm:$0xff]  ;;  %v6251_v22 = vld [vmem:[#allocation23_spill] sm:$0xff] }
  0xce   : > { %v6252_v24 = vld [vmem:[#allocation25_spill] sm:$0xff] }
  0xcf   : > { %v6253_v3 = vld [vmem:[#allocation13_spill] sm:$0xff]  ;;  %p4203_p2 = scmp.ne.s32.totalorder %s142_s9, 0 }
  0xd1   : > { %146 = sbr.rel (%p4203_p2) target bundleno = 1710 (0x6ae), region = 48 }
  0xd8   : > { %v4381_v48 = vpack.c.bf16 %v6248_v25, %v6252_v24  ;;  %v4536_v49 = vmov 0.0|0.0   ;;  %v4384_v50 = vpack.c.bf16 %v6239_v27, %v6243_v26  ;;  %vm4537_vm8 = vmmov 0   ;;  %v4713_v53 = vld [vmem:[#allocation2] sm:$0xff]  ;;  %s4539_s10 = smov 1  }
  0xd9   : > { %4380 = vmatprep.subr.bf16.mxu0 %v4536_v49  ;;  %v4538_v51 = vmov 0.0   ;;  %v4387_v52 = vpack.c.bf16 %v6246_v31, %v6250_v28  ;;  %vm151_vm9 = vcmask 1041408   ;;  %6254 = vst [vmem:[#allocation34_spill] sm:$0xff] %v4713_v53  ;;  %v6255_v46 = vld [vmem:[#allocation33_spill] sm:$0xff] }
  0xda   : > { %4382 = vmatpush3.bf16.msra.mxu0 %v4381_v48  ;;  %4291 = vmatprep.mubr.msk.f32.mxu0 %vm4537_vm8, %v4538_v51 }
  0xdb   : > { %4383 = vmatprep.subr.bf16.mxu0 %v4536_v49 }
  0xde   : > { %4385 = vmatpush3.bf16.msra.mxu0 %v4384_v50 }
  0xdf   : > { %4386 = vmatprep.subr.bf16.mxu0 %v4536_v49 }
  0xe2   : > { %4388 = vmatpush3.bf16.msra.mxu0 %v4387_v52 }
  0xe3   : > { %4289 = vmatprep.subr.mxu0 %v4538_v51 }
  0xe6   : > { %4290 = vmatpush3.msk.msra.mxu0 %vm151_vm9, %v4679_v32 }
  0xe7   : > { %4292 = vmatmul.mubr.msk.f32.vlgmr.msra.gmra.mrb[0].mxu0 %vm132_vm7, %v4713_v53 }
 0x1ba   : > { %v221_v54 = vpop.f32.mrb[0].mxu0 }
 0x1bb   : > { %v222_v55 = vadd.f32 %v221_v54, %v6255_v46  ;;  %v4293_v56 = vpop.f32.mrb[1].mxu0 }
 0x1bd   : > { %4450 = vtanh.f32 %v222_v55 }
 0x1c7   : > { %v4451_v57 = vpop.eup %4450 }
 0x1c8   : > { %v4720_v58 = vsub.f32 %v4713_v53, %v4451_v57  }
 0x1ca   : > { %6256 = vst [vmem:[#allocation35_spill] sm:$0xff] %v4720_v58  ;;  %v227_v59 = vmul.f32 %v4720_v58, %v4720_v58 }
 0x1cc   : > { %v228_v60 = vsel %vm132_vm7, %v227_v59, 0.0 }
 0x1cd   : > { %229 = vadd.xlane.f32.xlu0 %v228_v60 }
 0x25a   : > { %v230_v61 = vpop.xlane.xlu0 %229 }
 0x25b   : > { %v231_v62 = vrot.slane %v230_v61, 4 }
 0x25d   : > { %v232_v63 = vadd.f32 %v231_v62, %v230_v61 }
 0x25f   : > { %v233_v0 = vrot.slane %v232_v63, 2 }
 0x261   : > { %v234_v1 = vadd.f32 %v233_v0, %v232_v63 }
 0x263   : > { %v235_v2 = vrot.slane %v234_v1, 1 }
 0x265   : > { %v236_v5 = vadd.f32 %v235_v2, %v234_v1 }
 0x267   : > { %4400 = vpush %v236_v5 }
 0x298   : > { %s4401_s2 = spop %4400 }
 0x299   : > { %p238_p3 = scmp.lt.f32.partialorder %s4401_s2, 1e-08 }
 0x29b   : > { %4402 = sst [smem:[#allocation5]] (%p238_p3), %s4539_s10  ;;  %245 = sbr.rel (%p238_p3) target bundleno = 1710 (0x6ae), region = 56 }
 0x2a2   : > { %v246_v6 = vmul.f32 %v4451_v57, %v4451_v57  ;;  %v4540_v7 = vmov 0.0   ;;  %vm4541_vm10 = vmmov 0   ;;  %v4542_v9 = vmov 1966171168   ;;  %s5667_s11 = smov 0  }
 0x2a3   : > { %4294 = vmatprep.subr.mxu0 %v4540_v7  ;;  %4296 = vmatprep.mubr.msk.f32.mxu0 %vm4541_vm10, %v4540_v7  ;;  %v374_v10 = vunpack.c.l.s4 %v4542_v9  ;;  %v4774_v54 = vsub.s32 2, %v6253_v3  ;;  %v372_v55 = vcombine.high %v6249_v12, %v6249_v12  ;;  %v4791_v1 = vsub.s32 3, %v6253_v3 }
 0x2a4   : > { %v4726_v8 = vsub.f32 1.0, %v246_v6  ;;  %4398 = vmatprep.subr.mxu1 %v4540_v7  ;;  %4308 = vmatprep.mubr.msk.f32.mxu1 %vm4541_vm10, %v4540_v7  ;;  %v421_v15 = vcombine.high %v6247_v16, %v6247_v16 }
 0x2a5   : > { %v375_v33 = vunpack.c.0.s8 %v374_v10  ;;  %6257 = vst [vmem:[#allocation36_spill] sm:$0xff] %v4774_v54  ;;  %6258 = vst [vmem:[#allocation37_spill] sm:$0xff] %v4791_v1 }
 0x2a6   : > { %4295 = vmatpush3.xpose.msk.msra.mxu0 %vm132_vm7, %v4726_v8  ;;  %4399 = vmatpush3.xpose.msk.msra.mxu1 %vm132_vm7, %v4726_v8 }
 0x2a7   : > { %v4753_v34 = vsub.s32 %v375_v33, %v6253_v3 }
 0x2a9   : > { %4297 = vmatmul.mubr.msk.f32.vlgmr.msra.gmra.mrb[0].mxu0 %vm132_vm7, %v6249_v12  ;;  %4309 = vmatmul.mubr.msk.f32.vlgmr.msra.gmra.mrb[0].mxu1 %vm132_vm7, %v6251_v22  ;;  %v379_v37 = vrot.slane %v6249_v12, %v4753_v34  ;;  %v2024_v38 = vrot.slane %v6252_v24, %v4753_v34  ;;  %v386_v5 = vrot.slane %v372_v55, %v4753_v34 }
 0x2aa   : > { %4299 = vmatprep.mubr.msk.f32.mxu0 %vm4541_vm10, %v4540_v7  ;;  %4311 = vmatprep.mubr.msk.f32.mxu1 %vm4541_vm10, %v4540_v7 }
 0x2ab   : > { %v395_v39 = vrot.slane %v379_v37, %v4753_v34  ;;  %v2040_v40 = vrot.slane %v2024_v38, %v4753_v34  ;;  %v387_v49 = vcombine.high %v379_v37, %v379_v37  ;;  %v2032_v52 = vcombine.high %v2024_v38, %v2024_v38 }
 0x2ad   : > { %4300 = vmatmul.mubr.msk.f32.gmra.mrb[2].mxu0 %vm132_vm7, %v6247_v16  ;;  %4312 = vmatmul.mubr.msk.f32.gmra.mrb[2].mxu1 %vm132_vm7, %v6245_v29  ;;  %v417_v41 = vcombine.high %v395_v39, %v395_v39  ;;  %v2062_v42 = vcombine.high %v2040_v40, %v2040_v40  ;;  %v2336_v48 = vrot.slane %v2040_v40, %v4685_v35  ;;  %v4807_v40 = vsub.s32 4, %v6253_v3 }
 0x2ae   : > { %4302 = vmatprep.mubr.msk.f32.mxu0 %vm4541_vm10, %v4540_v7  ;;  %4314 = vmatprep.mubr.msk.f32.mxu1 %vm4541_vm10, %v4540_v7  ;;  %v4770_v50 = vrot.slane %v395_v39, %v4685_v35  ;;  %v409_v57 = vrot.slane %v387_v49, %v4753_v34  ;;  %v2054_v61 = vrot.slane %v2032_v52, %v4753_v34 }
 0x2af   : > { %v2344_v43 = vrot.slane %v2062_v42, %v4685_v35  ;;  %v4763_v44 = vrot.slane %v417_v41, %v4685_v35  ;;  %v2583_v51 = vmul.f32 %v2336_v48, %v4726_v8  ;;  %6260 = vst [vmem:[#allocation39_spill] sm:$0xff] %v4807_v40 }
 0x2b0   : > { %v419_v6 = vcombine.high %v409_v57, %v409_v57  ;;  %v2064_v33 = vcombine.high %v2054_v61, %v2054_v61  ;;  %v2340_v37 = vrot.slane %v2054_v61, %v4685_v35  ;;  %v4824_v55 = vrot.slane %v409_v57, %v4685_v35 }
 0x2b1   : > { %4303 = vmatmul.mubr.msk.f32.gmra.mrb[4].mxu0 %vm132_vm7, %v6241_v20  ;;  %4315 = vmatmul.mubr.msk.f32.gmra.mrb[4].mxu1 %vm132_vm7, %v4675_v30  ;;  %v2585_v45 = vmul.f32 %v2344_v43, %v4726_v8  ;;  %v2633_v56 = vsub.f32 %v4770_v50, %v2583_v51  ;;  %v388_v43 = vcombine.high %v386_v5, %v386_v5 }
 0x2b2   : > { %4305 = vmatprep.mubr.msk.f32.mxu0 %vm4541_vm10, %v4540_v7  ;;  %v4795_v7 = vsub.s32 5, %v6253_v3  ;;  %v4816_v48 = vrot.slane %v419_v6, %v4685_v35  ;;  %v2348_v52 = vrot.slane %v2064_v33, %v4685_v35  ;;  %v2017_v61 = vcombine.high %v6252_v24, %v6252_v24 }
 0x2b3   : > { %v2635_v47 = vsub.f32 %v4763_v44, %v2585_v45  ;;  %2683 = vst.msk [vmem:[#allocation4] sm:$0xff] %vm132_vm7, %v2633_v56  ;;  %v4810_v45 = vsub.s32 7, %v6253_v3  ;;  %v2584_v56 = vmul.f32 %v2340_v37, %v4726_v8  ;;  %v4834_v6 = vrot.slane %v388_v43, %v4753_v34 }
 0x2b4   : > { %6259 = vst [vmem:[#allocation38_spill] sm:$0xff] %v4795_v7  ;;  %v402_v33 = vrot.slane %v386_v5, %v4753_v34 }
 0x2b5   : > { %4306 = vmatmul.mubr.msk.f32.gmra.mrb[6].mxu0 %vm132_vm7, %v6240_v21  ;;  %2685 = vst.msk [vmem:[#allocation4 + $0x10] sm:$0xff] %vm132_vm7, %v2635_v47  ;;  %6261 = vst [vmem:[#allocation40_spill] sm:$0xff] %v4810_v45  ;;  %v4813_v47 = vsub.s32 6, %v6253_v3  ;;  %v2634_v11 = vsub.f32 %v4824_v55, %v2584_v56 }
 0x2b7   : > { %6262 = vst [vmem:[#allocation41_spill] sm:$0xff] %v4813_v47  ;;  %2684 = vst.msk [vmem:[#allocation4 + $0x8] sm:$0xff] %vm132_vm7, %v2634_v11  ;;  %v575_v11 = vrot.slane %v6251_v22, %v4753_v34 }
 0x2b9   : > { %v583_v3 = vcombine.high %v575_v11, %v575_v11 }
 0x37c   : > { %v4780_v59 = vpop.f32.mrb[0].mxu0  ;;  %v4782_v60 = vpop.f32.mrb[0].mxu1 }
 0x37d   : > { %v4298_v62 = vpop.f32.mrb[1].mxu0  ;;  %v705_v63 = vrot.slane %v4780_v59, %v4774_v54  ;;  %v691_v0 = vrot.slane %v4780_v59, %v4685_v35  ;;  %v4310_v2 = vpop.f32.mrb[1].mxu1  ;;  %v712_v38 = vrot.slane %v4780_v59, %v4791_v1  ;;  %v698_v39 = vrot.slane %v4780_v59, %v6242_v36 }
 0x37e   : > { %v726_v62 = vrot.slane %v4780_v59, %v4795_v7  ;;  %v733_v43 = vrot.slane %v4780_v59, %v4813_v47  ;;  %v915_v5 = vrot.slane %v4782_v60, %v4685_v35  ;;  %v936_v37 = vrot.slane %v4782_v60, %v4791_v1 }
 0x37f   : > { %707 = vbcast.lane.b32.xlu1 %v705_v63, 256  ;;  %693 = vbcast.lane.b32.xlu0 %v691_v0, 256  ;;  %v719_v63 = vrot.slane %v4780_v59, %v4807_v40 }
 0x380   : > { %v4797_v9 = vpop.f32.mrb[2].mxu0  ;;  %v4799_v10 = vpop.f32.mrb[2].mxu1 }
 0x381   : > { %v4301_v41 = vpop.f32.mrb[3].mxu0  ;;  %v4313_v42 = vpop.f32.mrb[3].mxu1  ;;  %v782_v12 = vrot.slane %v4797_v9, %v4795_v7 }
 0x382   : > { %v740_v41 = vrot.slane %v4780_v59, %v4810_v45 }
 0x383   : > { %714 = vbcast.lane.b32.xlu1 %v712_v38, 256  ;;  %700 = vbcast.lane.b32.xlu0 %v698_v39, 256 }
 0x384   : > { %v4818_v49 = vpop.f32.mrb[4].mxu0  ;;  %v4820_v51 = vpop.f32.mrb[4].mxu1 }
 0x385   : > { %v4304_v0 = vpop.f32.mrb[5].mxu0  ;;  %v4316_v2 = vpop.f32.mrb[5].mxu1 }
 0x386   : > { %v2586_v2 = vmul.f32 %v2348_v52, %v4726_v8  ;;  %v4879_v52 = vrot.slane %v4834_v6, %v4685_v35 }
 0x387   : > { %728 = vbcast.lane.b32.xlu1 %v726_v62, 256  ;;  %721 = vbcast.lane.b32.xlu0 %v719_v63, 256  ;;  %v2031_v62 = vrot.slane %v2017_v61, %v4753_v34  ;;  %v922_v63 = vrot.slane %v4782_v60, %v6242_v36 }
 0x388   : > { %v4853_v0 = vpop.f32.mrb[6].mxu0 }
 0x389   : > { %v4307_v39 = vpop.f32.mrb[7].mxu0  ;;  %v2033_v42 = vcombine.high %v2031_v62, %v2031_v62  ;;  %v2047_v59 = vrot.slane %v2031_v62, %v4753_v34  ;;  %v2220_v62 = vrot.slane %v6250_v28, %v4753_v34 }
 0x38a   : > { %v2636_v39 = vsub.f32 %v4816_v48, %v2586_v2  ;;  %v418_v2 = vcombine.high %v402_v33, %v402_v33 }
 0x38b   : > { %742 = vbcast.lane.b32.xlu1 %v740_v41, 256  ;;  %735 = vbcast.lane.b32.xlu0 %v733_v43, 256  ;;  %v2061_v61 = vrot.slane %v2033_v42, %v4753_v34  ;;  %v2352_v56 = vrot.slane %v2047_v59, %v4685_v35  ;;  %v2063_v38 = vcombine.high %v2047_v59, %v2047_v59 }
 0x38c   : > { %2686 = vst.msk [vmem:[#allocation4 + $0x18] sm:$0xff] %vm132_vm7, %v2636_v39  ;;  %v4887_v41 = vrot.slane %v402_v33, %v4685_v35  ;;  %v420_v43 = vcombine.high %v4834_v6, %v4834_v6  ;;  %v2228_v46 = vcombine.high %v2220_v62, %v2220_v62  ;;  %v929_v6 = vrot.slane %v4782_v60, %v4774_v54 }
 0x38d   : > { %v2356_v42 = vrot.slane %v2061_v61, %v4685_v35  ;;  %v2587_v39 = vmul.f32 %v2352_v56, %v4726_v8  ;;  %v2065_v59 = vcombine.high %v2061_v61, %v2061_v61  ;;  %v2360_v57 = vrot.slane %v2063_v38, %v4685_v35 }
 0x38e   : > { %v4904_v24 = vrot.slane %v418_v2, %v4685_v35  ;;  %v605_v61 = vrot.slane %v583_v3, %v4753_v34  ;;  %v2250_v38 = vrot.slane %v2228_v46, %v4753_v34  ;;  %v950_v3 = vrot.slane %v4782_v60, %v4795_v7 }
 0x38f   : > { %924 = vbcast.lane.b32.xlu1 %v922_v63, 256  ;;  %917 = vbcast.lane.b32.xlu0 %v915_v5, 256  ;;  %v2588_v33 = vmul.f32 %v2356_v42, %v4726_v8  ;;  %v2637_v63 = vsub.f32 %v4887_v41, %v2587_v39  ;;  %v2364_v5 = vrot.slane %v2065_v59, %v4685_v35 }
 0x390   : > { %v2589_v56 = vmul.f32 %v2360_v57, %v4726_v8  ;;  %v4912_v42 = vrot.slane %v420_v43, %v4685_v35  ;;  %v2468_v59 = vrot.slane %v2250_v38, %v4685_v35  ;;  %v591_v57 = vrot.slane %v575_v11, %v4753_v34 }
 0x391   : > { %v2638_v53 = vsub.f32 %v4879_v52, %v2588_v33  ;;  %2687 = vst.msk [vmem:[#allocation4 + $0x20] sm:$0xff] %vm132_vm7, %v2637_v63  ;;  %v2590_v39 = vmul.f32 %v2364_v5, %v4726_v8  ;;  %v943_v46 = vrot.slane %v4782_v60, %v4807_v40  ;;  %v2236_v43 = vrot.slane %v2220_v62, %v4753_v34 }
 0x392   : > { %v2639_v2 = vsub.f32 %v4904_v24, %v2589_v56  ;;  %v2616_v33 = vmul.f32 %v2468_v59, %v4726_v8  ;;  %v615_v11 = vcombine.high %v605_v61, %v605_v61  ;;  %v2260_v63 = vcombine.high %v2250_v38, %v2250_v38 }
 0x393   : > { %938 = vbcast.lane.b32.xlu1 %v936_v37, 256  ;;  %931 = vbcast.lane.b32.xlu0 %v929_v6, 256  ;;  %2688 = vst.msk [vmem:[#allocation4 + $0x28] sm:$0xff] %vm132_vm7, %v2638_v53  ;;  %v2640_v37 = vsub.f32 %v4912_v42, %v2590_v39  ;;  %v4927_v6 = vrot.slane %v605_v61, %v4685_v35 }
 0x394   : > { %2689 = vst.msk [vmem:[#allocation4 + $0x30] sm:$0xff] %vm132_vm7, %v2639_v2  ;;  %v964_v5 = vrot.slane %v4782_v60, %v4810_v45  ;;  %v957_v53 = vrot.slane %v4782_v60, %v4813_v47  ;;  %v2464_v62 = vrot.slane %v2236_v43, %v4685_v35  ;;  %v754_v56 = vrot.slane %v4797_v9, %v6242_v36 }
 0x395   : > { %2690 = vst.msk [vmem:[#allocation4 + $0x38] sm:$0xff] %vm132_vm7, %v2640_v37  ;;  %v2666_v39 = vsub.f32 %v4927_v6, %v2616_v33  ;;  %v4940_v61 = vrot.slane %v591_v57, %v4685_v35  ;;  %v2476_v38 = vrot.slane %v2260_v63, %v4685_v35  ;;  %v613_v59 = vcombine.high %v591_v57, %v591_v57 }
 0x396   : > { %v2615_v2 = vmul.f32 %v2464_v62, %v4726_v8  ;;  %v568_v60 = vcombine.high %v6251_v22, %v6251_v22  ;;  %v4950_v37 = vrot.slane %v615_v11, %v4685_v35  ;;  %v2213_v63 = vcombine.high %v6250_v28, %v6250_v28 }
 0x397   : > { %952 = vbcast.lane.b32.xlu1 %v950_v3, 256  ;;  %945 = vbcast.lane.b32.xlu0 %v943_v46, 256  ;;  %v2258_v3 = vcombine.high %v2236_v43, %v2236_v43  ;;  %v747_v46 = vrot.slane %v4797_v9, %v4685_v35  ;;  %2716 = vst.msk [vmem:[#allocation4 + $0x108] sm:$0xff] %vm132_vm7, %v2666_v39 }
 0x398   : > { %v2618_v33 = vmul.f32 %v2476_v38, %v4726_v8  ;;  %v2665_v57 = vsub.f32 %v4940_v61, %v2615_v2  ;;  %v582_v62 = vrot.slane %v568_v60, %v4753_v34  ;;  %v2227_v39 = vrot.slane %v2213_v63, %v4753_v34 }
 0x399   : > { %v2472_v43 = vrot.slane %v2258_v3, %v4685_v35  ;;  %v4962_v11 = vrot.slane %v613_v59, %v4685_v35  ;;  %v768_v63 = vrot.slane %v4797_v9, %v4791_v1 }
 0x39a   : > { %v2668_v22 = vsub.f32 %v4950_v37, %v2618_v33  ;;  %2715 = vst.msk [vmem:[#allocation4 + $0x100] sm:$0xff] %vm132_vm7, %v2665_v57  ;;  %v584_v28 = vcombine.high %v582_v62, %v582_v62  ;;  %v2243_v2 = vrot.slane %v2227_v39, %v4753_v34 }
 0x39b   : > { %966 = vbcast.lane.b32.xlu1 %v964_v5, 256  ;;  %959 = vbcast.lane.b32.xlu0 %v957_v53, 256  ;;  %v2617_v38 = vmul.f32 %v2472_v43, %v4726_v8  ;;  %v2229_v5 = vcombine.high %v2227_v39, %v2227_v39  ;;  %v598_v53 = vrot.slane %v582_v62, %v4753_v34 }
 0x39c   : > { %2718 = vst.msk [vmem:[#allocation4 + $0x118] sm:$0xff] %vm132_vm7, %v2668_v22  ;;  %v612_v60 = vrot.slane %v584_v28, %v4753_v34  ;;  %v2480_v59 = vrot.slane %v2243_v2, %v4685_v35  ;;  %v761_v22 = vrot.slane %v4797_v9, %v4774_v54  ;;  %v428_v28 = vrot.slane %v6247_v16, %v4753_v34 }
 0x39d   : > { %v2667_v3 = vsub.f32 %v4962_v11, %v2617_v38  ;;  %v2257_v33 = vrot.slane %v2229_v5, %v4753_v34 }
 0x39e   : > { %v616_v43 = vcombine.high %v612_v60, %v612_v60  ;;  %v4985_v39 = vrot.slane %v612_v60, %v4685_v35  ;;  %v436_v60 = vcombine.high %v428_v28, %v428_v28 }
 0x39f   : > { %756 = vbcast.lane.b32.xlu1 %v754_v56, 256  ;;  %749 = vbcast.lane.b32.xlu0 %v747_v46, 256  ;;  %2717 = vst.msk [vmem:[#allocation4 + $0x110] sm:$0xff] %vm132_vm7, %v2667_v3  ;;  %v2484_v57 = vrot.slane %v2257_v33, %v4685_v35  ;;  %v4979_v56 = vrot.slane %v598_v53, %v4685_v35 }
 0x3a0   : > { %v2619_v46 = vmul.f32 %v2480_v59, %v4726_v8  ;;  %v2261_v62 = vcombine.high %v2257_v33, %v2257_v33  ;;  %v614_v3 = vcombine.high %v598_v53, %v598_v53  ;;  %v775_v59 = vrot.slane %v4797_v9, %v4807_v40 }
 0x3a1   : > { %v2620_v38 = vmul.f32 %v2484_v57, %v4726_v8  ;;  %v2073_v33 = vrot.slane %v6248_v25, %v4753_v34  ;;  %v4999_v53 = vrot.slane %v616_v43, %v4685_v35  ;;  %v458_v58 = vrot.slane %v436_v60, %v4753_v34 }
 0x3a2   : > { %v2669_v5 = vsub.f32 %v4979_v56, %v2619_v46  ;;  %v2492_v4 = vrot.slane %v2261_v62, %v4685_v35  ;;  %v789_v62 = vrot.slane %v4797_v9, %v4813_v47 }
 0x3a3   : > { %770 = vbcast.lane.b32.xlu1 %v768_v63, 256  ;;  %763 = vbcast.lane.b32.xlu0 %v761_v22, 256  ;;  %v2259_v63 = vcombine.high %v2243_v2, %v2243_v2  ;;  %v2670_v22 = vsub.f32 %v4985_v39, %v2620_v38  ;;  %v796_v2 = vrot.slane %v4797_v9, %v4810_v45 }
 0x3a4   : > { %2719 = vst.msk [vmem:[#allocation4 + $0x120] sm:$0xff] %vm132_vm7, %v2669_v5  ;;  %v2622_v57 = vmul.f32 %v2492_v4, %v4726_v8  ;;  %v5009_v38 = vrot.slane %v614_v3, %v4685_v35  ;;  %v444_v4 = vrot.slane %v428_v28, %v4753_v34  ;;  %v971_v3 = vrot.slane %v4799_v10, %v4685_v35 }
 0x3a5   : > { %v2488_v46 = vrot.slane %v2259_v63, %v4685_v35  ;;  %2720 = vst.msk [vmem:[#allocation4 + $0x128] sm:$0xff] %vm132_vm7, %v2670_v22  ;;  %v978_v63 = vrot.slane %v4799_v10, %v6242_v36 }
 0x3a6   : > { %v2672_v5 = vsub.f32 %v4999_v53, %v2622_v57 }
 0x3a7   : > { %784 = vbcast.lane.b32.xlu1 %v782_v12, 256  ;;  %777 = vbcast.lane.b32.xlu0 %v775_v59, 256  ;;  %v2081_v12 = vcombine.high %v2073_v33, %v2073_v33  ;;  %v2621_v43 = vmul.f32 %v2488_v46, %v4726_v8  ;;  %v2089_v59 = vrot.slane %v2073_v33, %v4753_v34 }
 0x3a8   : > { %2722 = vst.msk [vmem:[#allocation4 + $0x138] sm:$0xff] %vm132_vm7, %v2672_v5  ;;  %v992_v33 = vrot.slane %v4799_v10, %v4791_v1  ;;  %v468_v46 = vcombine.high %v458_v58, %v458_v58 }
 0x3a9   : > { %v2103_v9 = vrot.slane %v2081_v12, %v4753_v34  ;;  %v2671_v22 = vsub.f32 %v5009_v38, %v2621_v43  ;;  %v2368_v28 = vrot.slane %v2089_v59, %v4685_v35  ;;  %v466_v12 = vcombine.high %v444_v4, %v444_v4 }
 0x3aa   : > { %v2111_v5 = vcombine.high %v2089_v59, %v2089_v59  ;;  %v5033_v43 = vrot.slane %v458_v58, %v4685_v35  ;;  %v5045_v58 = vrot.slane %v468_v46, %v4685_v35 }
 0x3ab   : > { %798 = vbcast.lane.b32.xlu1 %v796_v2, 256  ;;  %791 = vbcast.lane.b32.xlu0 %v789_v62, 256  ;;  %v2372_v57 = vrot.slane %v2103_v9, %v4685_v35  ;;  %v2113_v60 = vcombine.high %v2103_v9, %v2103_v9  ;;  %2721 = vst.msk [vmem:[#allocation4 + $0x130] sm:$0xff] %vm132_vm7, %v2671_v22 }
 0x3ac   : > { %v5029_v2 = vrot.slane %v444_v4, %v4685_v35  ;;  %v2591_v62 = vmul.f32 %v2368_v28, %v4726_v8  ;;  %6264 = vst [vmem:[#allocation43_spill] sm:$0xff] %v5033_v43  ;;  %v2376_v22 = vrot.slane %v2111_v5, %v4685_v35  ;;  %v2066_v4 = vcombine.high %v6248_v25, %v6248_v25 }
 0x3ad   : > { %v2592_v23 = vmul.f32 %v2372_v57, %v4726_v8  ;;  %v2380_v17 = vrot.slane %v2113_v60, %v4685_v35  ;;  %6265 = vst [vmem:[#allocation44_spill] sm:$0xff] %v5045_v58  ;;  %v435_v57 = vrot.slane %v421_v15, %v4753_v34 }
 0x3ae   : > { %6263 = vst [vmem:[#allocation42_spill] sm:$0xff] %v5029_v2  ;;  %v2641_v9 = vsub.f32 %v5029_v2, %v2591_v62  ;;  %v2593_v60 = vmul.f32 %v2376_v22, %v4726_v8  ;;  %v2080_v62 = vrot.slane %v2066_v4, %v4753_v34  ;;  %v1006_v22 = vrot.slane %v4799_v10, %v4795_v7 }
 0x3af   : > { %980 = vbcast.lane.b32.xlu1 %v978_v63, 256  ;;  %973 = vbcast.lane.b32.xlu0 %v971_v3, 256  ;;  %v2642_v59 = vsub.f32 %v5033_v43, %v2592_v23  ;;  %v2594_v28 = vmul.f32 %v2380_v17, %v4726_v8  ;;  %v985_v63 = vrot.slane %v4799_v10, %v4774_v54 }
 0x3b0   : > { %2691 = vst.msk [vmem:[#allocation4 + $0x40] sm:$0xff] %vm132_vm7, %v2641_v9  ;;  %v5053_v3 = vrot.slane %v466_v12, %v4685_v35  ;;  %v437_v46 = vcombine.high %v435_v57, %v435_v57  ;;  %v2082_v17 = vcombine.high %v2080_v62, %v2080_v62  ;;  %v451_v12 = vrot.slane %v435_v57, %v4753_v34 }
 0x3b1   : > { %2692 = vst.msk [vmem:[#allocation4 + $0x48] sm:$0xff] %vm132_vm7, %v2642_v59  ;;  %v2644_v23 = vsub.f32 %v5045_v58, %v2594_v28  ;;  %v2096_v9 = vrot.slane %v2080_v62, %v4753_v34  ;;  %v999_v4 = vrot.slane %v4799_v10, %v4807_v40  ;;  %v1013_v28 = vrot.slane %v4799_v10, %v4813_v47 }
 0x3b2   : > { %6266 = vst [vmem:[#allocation45_spill] sm:$0xff] %v5053_v3  ;;  %v2643_v15 = vsub.f32 %v5053_v3, %v2593_v60  ;;  %v465_v5 = vrot.slane %v437_v46, %v4753_v34  ;;  %v2110_v59 = vrot.slane %v2082_v17, %v4753_v34  ;;  %v624_v60 = vrot.slane %v6245_v29, %v4753_v34 }
 0x3b3   : > { %994 = vbcast.lane.b32.xlu1 %v992_v33, 256  ;;  %987 = vbcast.lane.b32.xlu0 %v985_v63, 256  ;;  %2694 = vst.msk [vmem:[#allocation4 + $0x58] sm:$0xff] %vm132_vm7, %v2644_v23  ;;  %v1020_v33 = vrot.slane %v4799_v10, %v4810_v45  ;;  %v2384_v57 = vrot.slane %v2096_v9, %v4685_v35 }
 0x3b4   : > { %2693 = vst.msk [vmem:[#allocation4 + $0x50] sm:$0xff] %vm132_vm7, %v2643_v15  ;;  %v469_v63 = vcombine.high %v465_v5, %v465_v5  ;;  %v810_v62 = vrot.slane %v4818_v49, %v6242_v36  ;;  %v2388_v23 = vrot.slane %v2110_v59, %v4685_v35  ;;  %v2114_v46 = vcombine.high %v2110_v59, %v2110_v59 }
 0x3b5   : > { %v803_v15 = vrot.slane %v4818_v49, %v4685_v35  ;;  %v5083_v17 = vrot.slane %v451_v12, %v4685_v35  ;;  %v2595_v10 = vmul.f32 %v2384_v57, %v4726_v8  ;;  %v467_v25 = vcombine.high %v451_v12, %v451_v12 }
 0x3b6   : > { %v5087_v16 = vrot.slane %v465_v5, %v4685_v35  ;;  %v2112_v3 = vcombine.high %v2096_v9, %v2096_v9  ;;  %v5093_v59 = vrot.slane %v469_v63, %v4685_v35  ;;  %v632_v2 = vcombine.high %v624_v60, %v624_v60 }
 0x3b7   : > { %1008 = vbcast.lane.b32.xlu1 %v1006_v22, 256  ;;  %1001 = vbcast.lane.b32.xlu0 %v999_v4, 256  ;;  %v2596_v22 = vmul.f32 %v2388_v23, %v4726_v8  ;;  %v2396_v4 = vrot.slane %v2114_v46, %v4685_v35  ;;  %v2645_v58 = vsub.f32 %v5083_v17, %v2595_v10 }
 0x3b8   : > { %v2269_v43 = vrot.slane %v6246_v31, %v4753_v34  ;;  %v2392_v57 = vrot.slane %v2112_v3, %v4685_v35  ;;  %v5102_v9 = vrot.slane %v467_v25, %v4685_v35  ;;  %v654_v10 = vrot.slane %v632_v2, %v4753_v34 }
 0x3b9   : > { %v2646_v12 = vsub.f32 %v5087_v16, %v2596_v22  ;;  %v2598_v5 = vmul.f32 %v2396_v4, %v4726_v8  ;;  %2695 = vst.msk [vmem:[#allocation4 + $0x60] sm:$0xff] %vm132_vm7, %v2645_v58 }
 0x3ba   : > { %v2277_v23 = vcombine.high %v2269_v43, %v2269_v43  ;;  %v2597_v46 = vmul.f32 %v2392_v57, %v4726_v8  ;;  %v664_v4 = vcombine.high %v654_v10, %v654_v10 }
 0x3bb   : > { %1022 = vbcast.lane.b32.xlu1 %v1020_v33, 256  ;;  %1015 = vbcast.lane.b32.xlu0 %v1013_v28, 256  ;;  %2696 = vst.msk [vmem:[#allocation4 + $0x68] sm:$0xff] %vm132_vm7, %v2646_v12  ;;  %v2648_v63 = vsub.f32 %v5093_v59, %v2598_v5  ;;  %v640_v33 = vrot.slane %v624_v60, %v4753_v34 }
 0x3bc   : > { %v2285_v28 = vrot.slane %v2269_v43, %v4753_v34  ;;  %v2299_v3 = vrot.slane %v2277_v23, %v4753_v34  ;;  %v2647_v25 = vsub.f32 %v5102_v9, %v2597_v46  ;;  %v6269_v23 = vrot.slane %v4818_v49, %v4791_v1 }
 0x3bd   : > { %2698 = vst.msk [vmem:[#allocation4 + $0x78] sm:$0xff] %vm132_vm7, %v2648_v63  ;;  %v5117_v43 = vrot.slane %v640_v33, %v4685_v35  ;;  %v662_v57 = vcombine.high %v640_v33, %v640_v33  ;;  %v6270_v63 = vrot.slane %v4818_v49, %v4774_v54  ;;  %v617_v33 = vcombine.high %v6245_v29, %v6245_v29 }
 0x3be   : > { %v2496_v58 = vrot.slane %v2285_v28, %v4685_v35  ;;  %v2500_v22 = vrot.slane %v2299_v3, %v4685_v35  ;;  %v2309_v12 = vcombine.high %v2299_v3, %v2299_v3  ;;  %2697 = vst.msk [vmem:[#allocation4 + $0x70] sm:$0xff] %vm132_vm7, %v2647_v25  ;;  %v2307_v60 = vcombine.high %v2285_v28, %v2285_v28 }
 0x3bf   : > { %812 = vbcast.lane.b32.xlu1 %v810_v62, 256  ;;  %805 = vbcast.lane.b32.xlu0 %v803_v15, 256  ;;  %6267 = vst [vmem:[#allocation46_spill] sm:$0xff] %v5117_v43  ;;  %v5121_v62 = vrot.slane %v654_v10, %v4685_v35  ;;  %v5133_v28 = vrot.slane %v664_v4, %v4685_v35 }
 0x3c0   : > { %v2623_v2 = vmul.f32 %v2496_v58, %v4726_v8  ;;  %v2624_v15 = vmul.f32 %v2500_v22, %v4726_v8  ;;  %v2508_v5 = vrot.slane %v2309_v12, %v4685_v35  ;;  %v2504_v25 = vrot.slane %v2307_v60, %v4685_v35 }
 0x3c1   : > { %6268 = vst [vmem:[#allocation47_spill] sm:$0xff] %v5121_v62  ;;  %6271 = vst [vmem:[#allocation48_spill] sm:$0xff] %v5133_v28  ;;  %v2262_v58 = vcombine.high %v6246_v31, %v6246_v31  ;;  %v5146_v4 = vrot.slane %v662_v57, %v4685_v35  ;;  %v6273_v60 = vrot.slane %v4818_v49, %v4795_v7 }
 0x3c2   : > { %v2673_v46 = vsub.f32 %v5117_v43, %v2623_v2  ;;  %v2674_v10 = vsub.f32 %v5121_v62, %v2624_v15  ;;  %v2626_v3 = vmul.f32 %v2508_v5, %v4726_v8  ;;  %v2625_v12 = vmul.f32 %v2504_v25, %v4726_v8 }
 0x3c3   : > { %826 = vbcast.lane.b32.xlu1 %v6269_v23, 256  ;;  %819 = vbcast.lane.b32.xlu0 %v6270_v63, 256  ;;  %6272 = vst [vmem:[#allocation49_spill] sm:$0xff] %v5146_v4  ;;  %v631_v2 = vrot.slane %v617_v33, %v4753_v34  ;;  %v6274_v15 = vrot.slane %v4818_v49, %v4807_v40 }
 0x3c4   : > { %2723 = vst.msk [vmem:[#allocation4 + $0x140] sm:$0xff] %vm132_vm7, %v2673_v46  ;;  %2724 = vst.msk [vmem:[#allocation4 + $0x148] sm:$0xff] %vm132_vm7, %v2674_v10  ;;  %v2676_v22 = vsub.f32 %v5133_v28, %v2626_v3  ;;  %v2276_v5 = vrot.slane %v2262_v58, %v4753_v34  ;;  %v2675_v23 = vsub.f32 %v5146_v4, %v2625_v12 }
 0x3c5   : > { %v633_v57 = vcombine.high %v631_v2, %v631_v2  ;;  %v866_v46 = vrot.slane %v4853_v0, %v6242_v36  ;;  %v647_v10 = vrot.slane %v631_v2, %v4753_v34  ;;  %v477_v25 = vrot.slane %v6241_v20, %v4753_v34 }
 0x3c6   : > { %2726 = vst.msk [vmem:[#allocation4 + $0x158] sm:$0xff] %vm132_vm7, %v2676_v22  ;;  %v2278_v63 = vcombine.high %v2276_v5, %v2276_v5  ;;  %2725 = vst.msk [vmem:[#allocation4 + $0x150] sm:$0xff] %vm132_vm7, %v2675_v23  ;;  %v2292_v3 = vrot.slane %v2276_v5, %v4753_v34  ;;  %v6275_v33 = vrot.slane %v4818_v49, %v4810_v45 }
 0x3c7   : > { %840 = vbcast.lane.b32.xlu1 %v6273_v60, 256  ;;  %833 = vbcast.lane.b32.xlu0 %v6274_v15, 256  ;;  %v6276_v58 = vrot.slane %v4818_v49, %v4813_v47  ;;  %v859_v22 = vrot.slane %v4853_v0, %v4685_v35  ;;  %v661_v12 = vrot.slane %v633_v57, %v4753_v34 }
 0x3c8   : > { %v2306_v2 = vrot.slane %v2278_v63, %v4753_v34  ;;  %v2512_v60 = vrot.slane %v2292_v3, %v4685_v35  ;;  %v5181_v31 = vrot.slane %v647_v10, %v4685_v35  ;;  %v663_v4 = vcombine.high %v647_v10, %v647_v10 }
 0x3c9   : > { %v665_v5 = vcombine.high %v661_v12, %v661_v12  ;;  %v5185_v57 = vrot.slane %v661_v12, %v4685_v35  ;;  %v2308_v28 = vcombine.high %v2292_v3, %v2292_v3  ;;  %v6277_v3 = vrot.slane %v4853_v0, %v4791_v1 }
 0x3ca   : > { %v2516_v15 = vrot.slane %v2306_v2, %v4685_v35  ;;  %v2310_v23 = vcombine.high %v2306_v2, %v2306_v2  ;;  %v2627_v49 = vmul.f32 %v2512_v60, %v4726_v8 }
 0x3cb   : > { %854 = vbcast.lane.b32.xlu1 %v6275_v33, 256  ;;  %847 = vbcast.lane.b32.xlu0 %v6276_v58, 256  ;;  %v2122_v33 = vrot.slane %v6243_v26, %v4753_v34  ;;  %v485_v58 = vcombine.high %v477_v25, %v477_v25  ;;  %v5192_v62 = vrot.slane %v665_v5, %v4685_v35 }
 0x3cc   : > { %v2628_v63 = vmul.f32 %v2516_v15, %v4726_v8  ;;  %v2524_v29 = vrot.slane %v2310_v23, %v4685_v35  ;;  %v2677_v2 = vsub.f32 %v5181_v31, %v2627_v49  ;;  %v2520_v12 = vrot.slane %v2308_v28, %v4685_v35 }
 0x3cd   : > { %v493_v15 = vrot.slane %v477_v25, %v4753_v34  ;;  %v2138_v10 = vrot.slane %v2122_v33, %v4753_v34  ;;  %v6278_v5 = vrot.slane %v4853_v0, %v4774_v54  ;;  %v507_v23 = vrot.slane %v485_v58, %v4753_v34 }
 0x3ce   : > { %v2678_v43 = vsub.f32 %v5185_v57, %v2628_v63  ;;  %v2630_v60 = vmul.f32 %v2524_v29, %v4726_v8  ;;  %2727 = vst.msk [vmem:[#allocation4 + $0x160] sm:$0xff] %vm132_vm7, %v2677_v2  ;;  %v5212_v25 = vrot.slane %v663_v4, %v4685_v35 }
 0x3cf   : > { %868 = vbcast.lane.b32.xlu1 %v866_v46, 256  ;;  %861 = vbcast.lane.b32.xlu0 %v859_v22, 256  ;;  %v2130_v46 = vcombine.high %v2122_v33, %v2122_v33  ;;  %v1052_v22 = vrot.slane %v6244_v13, %v4753_v34  ;;  %v2629_v33 = vmul.f32 %v2520_v12, %v4726_v8 }
 0x3d0   : > { %2728 = vst.msk [vmem:[#allocation4 + $0x168] sm:$0xff] %vm132_vm7, %v2678_v43  ;;  %v2680_v29 = vsub.f32 %v5192_v62, %v2630_v60  ;;  %v2400_v63 = vrot.slane %v2138_v10, %v4685_v35  ;;  %v6279_v12 = vrot.slane %v4853_v0, %v4795_v7  ;;  %v515_v7 = vcombine.high %v493_v15, %v493_v15 }
 0x3d1   : > { %v2152_v28 = vrot.slane %v2130_v46, %v4753_v34  ;;  %v1060_v49 = vcombine.high %v1052_v22, %v1052_v22  ;;  %v5219_v60 = vrot.slane %v1052_v22, %v4753_v34  ;;  %v2679_v58 = vsub.f32 %v5212_v25, %v2629_v33 }
 0x3d2   : > { %2730 = vst.msk [vmem:[#allocation4 + $0x178] sm:$0xff] %vm132_vm7, %v2680_v29  ;;  %v5223_v46 = vrot.slane %v493_v15, %v4685_v35  ;;  %v2599_v4 = vmul.f32 %v2400_v63, %v4726_v8  ;;  %v5233_v29 = vrot.slane %v507_v23, %v4685_v35 }
 0x3d3   : > { %882 = vbcast.lane.b32.xlu1 %v6277_v3, 256  ;;  %875 = vbcast.lane.b32.xlu0 %v6278_v5, 256  ;;  %v2404_v2 = vrot.slane %v2152_v28, %v4685_v35  ;;  %v517_v3 = vcombine.high %v507_v23, %v507_v23  ;;  %v2162_v43 = vcombine.high %v2152_v28, %v2152_v28 }
 0x3d4   : > { %v6280_v5 = vrot.slane %v4853_v0, %v4807_v40  ;;  %v5238_v33 = vrot.slane %v1060_v49, %v4753_v34  ;;  %2729 = vst.msk [vmem:[#allocation4 + $0x170] sm:$0xff] %vm132_vm7, %v2679_v58  ;;  %v2649_v63 = vsub.f32 %v5223_v46, %v2599_v4  ;;  %v1034_v49 = vrot.slane %v4820_v51, %v6242_v36 }
 0x3d5   : > { %v2600_v22 = vmul.f32 %v2404_v2, %v4726_v8  ;;  %v2412_v28 = vrot.slane %v2162_v43, %v4685_v35  ;;  %v470_v2 = vcombine.high %v6241_v20, %v6241_v20  ;;  %v1045_v43 = vcombine.high %v6244_v13, %v6244_v13 }
 0x3d6   : > { %2699 = vst.msk [vmem:[#allocation4 + $0x80] sm:$0xff] %vm132_vm7, %v2649_v63  ;;  %v6282_v58 = vrot.slane %v4853_v0, %v4813_v47  ;;  %v1027_v4 = vrot.slane %v4820_v51, %v4685_v35  ;;  %v5269_v63 = vrot.slane %v515_v7, %v4685_v35  ;;  %v1092_v7 = vcombine.high %v5238_v33, %v5238_v33 }
 0x3d7   : > { %896 = vbcast.lane.b32.xlu1 %v6279_v12, 256  ;;  %889 = vbcast.lane.b32.xlu0 %v6280_v5, 256  ;;  %v2160_v12 = vcombine.high %v2138_v10, %v2138_v10  ;;  %v2650_v1 = vsub.f32 %v5233_v29, %v2600_v22  ;;  %v5244_v5 = vrot.slane %v517_v3, %v4685_v35 }
 0x3d8   : > { %v2602_v23 = vmul.f32 %v2412_v28, %v4726_v8  ;;  %v2115_v10 = vcombine.high %v6243_v26, %v6243_v26  ;;  %v6281_v3 = vrot.slane %v4853_v0, %v4810_v45  ;;  %v484_v28 = vrot.slane %v470_v2, %v4753_v34  ;;  %6283 = vst [vmem:[#allocation50_spill] sm:$0xff] %v5269_v63 }
 0x3d9   : > { %v2408_v15 = vrot.slane %v2160_v12, %v4685_v35  ;;  %2700 = vst.msk [vmem:[#allocation4 + $0x88] sm:$0xff] %vm132_vm7, %v2650_v1  ;;  %v1090_v0 = vcombine.high %v5219_v60, %v5219_v60  ;;  %v5299_v13 = vrot.slane %v1092_v7, %v4685_v35  ;;  %v2171_v7 = vrot.slane %v6239_v27, %v4753_v34 }
 0x3da   : > { %v2652_v22 = vsub.f32 %v5244_v5, %v2602_v23  ;;  %v500_v51 = vrot.slane %v484_v28, %v4753_v34 }
 0x3db   : > { %910 = vbcast.lane.b32.xlu1 %v6281_v3, 256  ;;  %903 = vbcast.lane.b32.xlu0 %v6282_v58, 256  ;;  %v2601_v12 = vmul.f32 %v2408_v15, %v4726_v8  ;;  %v2129_v3 = vrot.slane %v2115_v10, %v4753_v34  ;;  %v486_v58 = vcombine.high %v484_v28, %v484_v28 }
 0x3dc   : > { %2702 = vst.msk [vmem:[#allocation4 + $0x98] sm:$0xff] %vm132_vm7, %v2652_v22  ;;  %v1059_v15 = vrot.slane %v1045_v43, %v4753_v34  ;;  %v526_v43 = vrot.slane %v6240_v21, %v4753_v34  ;;  %v516_v26 = vcombine.high %v500_v51, %v500_v51 }
 0x3dd   : > { %v2651_v1 = vsub.f32 %v5269_v63, %v2601_v12  ;;  %v2131_v23 = vcombine.high %v2129_v3, %v2129_v3  ;;  %v2145_v2 = vrot.slane %v2129_v3, %v4753_v34  ;;  %v514_v10 = vrot.slane %v486_v58, %v4753_v34 }
 0x3de   : > { %v5287_v12 = vrot.slane %v1090_v0, %v4685_v35  ;;  %v1061_v0 = vcombine.high %v1059_v15, %v1059_v15  ;;  %v534_v54 = vcombine.high %v526_v43, %v526_v43 }
 0x3df   : > { %1036 = vbcast.lane.b32.xlu1 %v1034_v49, 256  ;;  %1029 = vbcast.lane.b32.xlu0 %v1027_v4, 256  ;;  %2701 = vst.msk [vmem:[#allocation4 + $0x90] sm:$0xff] %vm132_vm7, %v2651_v1  ;;  %v2159_v22 = vrot.slane %v2131_v23, %v4753_v34  ;;  %v2416_v28 = vrot.slane %v2145_v2, %v4685_v35 }
 0x3e0   : > { %v5292_v4 = vrot.slane %v500_v51, %v4685_v35  ;;  %v518_v1 = vcombine.high %v514_v10, %v514_v10  ;;  %v2161_v47 = vcombine.high %v2145_v2, %v2145_v2  ;;  %v5302_v49 = vrot.slane %v514_v10, %v4685_v35 }
 0x3e1   : > { %v2420_v3 = vrot.slane %v2159_v22, %v4685_v35  ;;  %v2603_v58 = vmul.f32 %v2416_v28, %v4726_v8  ;;  %v2163_v23 = vcombine.high %v2159_v22, %v2159_v22  ;;  %v2187_v28 = vrot.slane %v2171_v7, %v4753_v34 }
 0x3e2   : > { %6284 = vst [vmem:[#allocation51_spill] sm:$0xff] %v5292_v4  ;;  %6285 = vst [vmem:[#allocation52_spill] sm:$0xff] %v5302_v49  ;;  %v2424_v22 = vrot.slane %v2161_v47, %v4685_v35  ;;  %v5315_v2 = vrot.slane %v518_v1, %v4685_v35  ;;  %v5325_v20 = vrot.slane %v1061_v0, %v4753_v34 }
 0x3e3   : > { %v2604_v45 = vmul.f32 %v2420_v3, %v4726_v8  ;;  %v2653_v40 = vsub.f32 %v5292_v4, %v2603_v58  ;;  %v2428_v36 = vrot.slane %v2163_v23, %v4685_v35  ;;  %v542_v3 = vrot.slane %v526_v43, %v4753_v34 }
 0x3e4   : > { %6286 = vst [vmem:[#allocation53_spill] sm:$0xff] %v5315_v2  ;;  %v5320_v58 = vrot.slane %v516_v26, %v4685_v35  ;;  %v2605_v47 = vmul.f32 %v2424_v22, %v4726_v8  ;;  %v2179_v23 = vcombine.high %v2171_v7, %v2171_v7  ;;  %v556_v43 = vrot.slane %v534_v54, %v4753_v34 }
 0x3e5   : > { %v2654_v51 = vsub.f32 %v5302_v49, %v2604_v45  ;;  %2703 = vst.msk [vmem:[#allocation4 + $0xa0] sm:$0xff] %vm132_vm7, %v2653_v40  ;;  %v2606_v10 = vmul.f32 %v2428_v36, %v4726_v8  ;;  %v5328_v40 = vrot.slane %v1059_v15, %v4753_v34  ;;  %v1248_v45 = vrot.slane %v6238_v18, %v4753_v34 }
 0x3e6   : > { %6287 = vst [vmem:[#allocation54_spill] sm:$0xff] %v5320_v58  ;;  %v2655_v26 = vsub.f32 %v5320_v58, %v2605_v47  ;;  %v2201_v1 = vrot.slane %v2179_v23, %v4753_v34  ;;  %v2432_v22 = vrot.slane %v2187_v28, %v4685_v35  ;;  %v1093_v0 = vcombine.high %v5325_v20, %v5325_v20 }
 0x3e7   : > { %2704 = vst.msk [vmem:[#allocation4 + $0xa8] sm:$0xff] %vm132_vm7, %v2654_v51  ;;  %v2656_v36 = vsub.f32 %v5315_v2, %v2606_v10  ;;  %v5342_v15 = vrot.slane %v542_v3, %v4685_v35  ;;  %v564_v7 = vcombine.high %v542_v3, %v542_v3  ;;  %v2209_v51 = vcombine.high %v2187_v28, %v2187_v28 }
 0x3e8   : > { %2705 = vst.msk [vmem:[#allocation4 + $0xb0] sm:$0xff] %vm132_vm7, %v2655_v26  ;;  %v2436_v10 = vrot.slane %v2201_v1, %v4685_v35  ;;  %v2607_v54 = vmul.f32 %v2432_v22, %v4726_v8  ;;  %v566_v47 = vcombine.high %v556_v43, %v556_v43  ;;  %v2211_v23 = vcombine.high %v2201_v1, %v2201_v1 }
 0x3e9   : > { %2706 = vst.msk [vmem:[#allocation4 + $0xb8] sm:$0xff] %vm132_vm7, %v2656_v36  ;;  %6288 = vst [vmem:[#allocation55_spill] sm:$0xff] %v5342_v15  ;;  %v1091_v58 = vcombine.high %v5328_v40, %v5328_v40  ;;  %v1256_v2 = vcombine.high %v1248_v45, %v1248_v45  ;;  %v2440_v4 = vrot.slane %v2209_v51, %v4685_v35 }
 0x3ea   : > { %v519_v36 = vcombine.high %v6240_v21, %v6240_v21  ;;  %v5353_v3 = vrot.slane %v556_v43, %v4685_v35  ;;  %v2608_v28 = vmul.f32 %v2436_v10, %v4726_v8  ;;  %v2657_v26 = vsub.f32 %v5342_v15, %v2607_v54 }
 0x3eb   : > { %v2444_v22 = vrot.slane %v2211_v23, %v4685_v35  ;;  %v5359_v1 = vrot.slane %v564_v7, %v4685_v35  ;;  %v2609_v49 = vmul.f32 %v2440_v4, %v4726_v8  ;;  %v2164_v51 = vcombine.high %v6239_v27, %v6239_v27 }
 0x3ec   : > { %v533_v63 = vrot.slane %v519_v36, %v4753_v34  ;;  %v1380_v43 = vrot.slane %v5328_v40, %v4685_v35  ;;  %v2658_v21 = vsub.f32 %v5353_v3, %v2608_v28  ;;  %2707 = vst.msk [vmem:[#allocation4 + $0xc0] sm:$0xff] %vm132_vm7, %v2657_v26  ;;  %v5370_v10 = vrot.slane %v566_v47, %v4685_v35 }
 0x3ed   : > { %v2610_v7 = vmul.f32 %v2444_v22, %v4726_v8  ;;  %v5374_v54 = vrot.slane %v1256_v2, %v4753_v34  ;;  %v2659_v4 = vsub.f32 %v5359_v1, %v2609_v49  ;;  %v2178_v36 = vrot.slane %v2164_v51, %v4753_v34 }
 0x3ee   : > { %v535_v23 = vcombine.high %v533_v63, %v533_v63  ;;  %v1384_v40 = vrot.slane %v5325_v20, %v4685_v35  ;;  %v5381_v28 = vrot.slane %v1093_v0, %v4685_v35  ;;  %v1241_v47 = vcombine.high %v6238_v18, %v6238_v18  ;;  %2708 = vst.msk [vmem:[#allocation4 + $0xc8] sm:$0xff] %vm132_vm7, %v2658_v21 }
 0x3ef   : > { %v2660_v2 = vsub.f32 %v5370_v10, %v2610_v7  ;;  %v6289_v26 = vrot.slane %v5219_v60, %v4685_v35  ;;  %v5392_v51 = vrot.slane %v1091_v58, %v4685_v35  ;;  %2709 = vst.msk [vmem:[#allocation4 + $0xd0] sm:$0xff] %vm132_vm7, %v2659_v4  ;;  %v2180_v20 = vcombine.high %v2178_v36, %v2178_v36 }
 0x3f0   : > { %v563_v0 = vrot.slane %v535_v23, %v4753_v34  ;;  %v549_v21 = vrot.slane %v533_v63, %v4753_v34  ;;  %v2194_v7 = vrot.slane %v2178_v36, %v4753_v34  ;;  %v5409_v23 = vrot.slane %v1248_v45, %v4753_v34 }
 0x3f1   : > { %v708_v27 = vpop.permute.xlu1 %707  ;;  %v694_v15 = vpop.permute.xlu0 %693  ;;  %2710 = vst.msk [vmem:[#allocation4 + $0xd8] sm:$0xff] %vm132_vm7, %v2660_v2  ;;  %v5412_v63 = vrot.slane %v1241_v47, %v4753_v34 }
 0x3f2   : > { %v1613_v49 = vmul.f32 %v5287_v12, %v708_v27  ;;  %v1611_v22 = vmul.f32 %v6289_v26, %v694_v15  ;;  %v5401_v27 = vrot.slane %v4675_v30, %v4753_v34  ;;  %v2208_v15 = vrot.slane %v2180_v20, %v4753_v34 }
 0x3f3   : > { %v2448_v36 = vrot.slane %v2194_v7, %v4685_v35  ;;  %v567_v26 = vcombine.high %v563_v0, %v563_v0  ;;  %v5423_v20 = vrot.slane %v563_v0, %v4685_v35  ;;  %v5426_v47 = vrot.slane %v549_v21, %v4685_v35 }
 0x3f4   : > { %v1913_v60 = vsub.f32 %v4763_v44, %v1613_v49  ;;  %v1911_v12 = vsub.f32 %v4770_v50, %v1611_v22  ;;  %v6290_v50 = vrot.slane %v5238_v33, %v4685_v35  ;;  %v2452_v22 = vrot.slane %v2208_v15, %v4685_v35 }
 0x3f5   : > { %v715_v4 = vpop.permute.xlu1 %714  ;;  %v701_v2 = vpop.permute.xlu0 %700  ;;  %v2212_v45 = vcombine.high %v2208_v15, %v2208_v15  ;;  %v2611_v58 = vmul.f32 %v2448_v36, %v4726_v8  ;;  %v565_v18 = vcombine.high %v549_v21, %v549_v21  ;;  %v2210_v36 = vcombine.high %v2194_v7, %v2194_v7 }
 0x3f6   : > { %1963 = vst.msk [vmem:[#allocation3 + $0x10] sm:$0xff] %vm132_vm7, %v1913_v60  ;;  %1961 = vst.msk [vmem:[#allocation3] sm:$0xff] %vm132_vm7, %v1911_v12  ;;  %v1614_v44 = vmul.f32 %v5299_v13, %v715_v4  ;;  %v1612_v49 = vmul.f32 %v6290_v50, %v701_v2  ;;  %v673_v60 = vcombine.high %v5401_v27, %v5401_v27 }
 0x3f7   : > { %v2612_v33 = vmul.f32 %v2452_v22, %v4726_v8  ;;  %v2460_v4 = vrot.slane %v2212_v45, %v4685_v35  ;;  %v2661_v0 = vsub.f32 %v5426_v47, %v2611_v58  ;;  %v5437_v50 = vrot.slane %v567_v26, %v4685_v35 }
 0x3f8   : > { %v1914_v13 = vsub.f32 %v4816_v48, %v1614_v44  ;;  %v1912_v12 = vsub.f32 %v4824_v55, %v1612_v49  ;;  %v1492_v22 = vrot.slane %v5409_v23, %v4685_v35  ;;  %v1288_v58 = vcombine.high %v5374_v54, %v5374_v54 }
 0x3f9   : > { %v729_v15 = vpop.permute.xlu1 %728  ;;  %v722_v2 = vpop.permute.xlu0 %721  ;;  %v2662_v55 = vsub.f32 %v5423_v20, %v2612_v33  ;;  %v2614_v49 = vmul.f32 %v2460_v4, %v4726_v8  ;;  %v1286_v21 = vcombine.high %v5409_v23, %v5409_v23  ;;  %2711 = vst.msk [vmem:[#allocation4 + $0xe0] sm:$0xff] %vm132_vm7, %v2661_v0  ;;  %v2456_v7 = vrot.slane %v2210_v36, %v4685_v35 }
 0x3fa   : > { %1964 = vst.msk [vmem:[#allocation3 + $0x18] sm:$0xff] %vm132_vm7, %v1914_v13  ;;  %1962 = vst.msk [vmem:[#allocation3 + $0x8] sm:$0xff] %vm132_vm7, %v1912_v12  ;;  %v1616_v48 = vmul.f32 %v1384_v40, %v729_v15  ;;  %v1615_v44 = vmul.f32 %v1380_v43, %v722_v2  ;;  %v2317_v45 = vrot.slane %v4679_v32, %v4753_v34 }
 0x3fb   : > { %2712 = vst.msk [vmem:[#allocation4 + $0xe8] sm:$0xff] %vm132_vm7, %v2662_v55  ;;  %v2664_v26 = vsub.f32 %v5437_v50, %v2614_v49  ;;  %v1257_v23 = vcombine.high %v5412_v63, %v5412_v63  ;;  %v5460_v33 = vrot.slane %v565_v18, %v4685_v35  ;;  %v2613_v4 = vmul.f32 %v2456_v7, %v4726_v8 }
 0x3fc   : > { %v1916_v40 = vsub.f32 %v4879_v52, %v1616_v48  ;;  %v1915_v43 = vsub.f32 %v4887_v41, %v1615_v44  ;;  %v680_v52 = vrot.slane %v5401_v27, %v4753_v34  ;;  %v687_v2 = vrot.slane %v673_v60, %v4753_v34 }
 0x3fd   : > { %v743_v13 = vpop.permute.xlu1 %742  ;;  %v736_v12 = vpop.permute.xlu0 %735  ;;  %2714 = vst.msk [vmem:[#allocation4 + $0xf8] sm:$0xff] %vm132_vm7, %v2664_v26  ;;  %v2318_v0 = vcombine.high %v2317_v45, %v2317_v45  ;;  %v1504_v18 = vrot.slane %v1288_v58, %v4685_v35  ;;  %v1271_v36 = vrot.slane %v5412_v63, %v4753_v34  ;;  %v2663_v27 = vsub.f32 %v5460_v33, %v2613_v4 }
 0x3fe   : > { %1966 = vst.msk [vmem:[#allocation3 + $0x28] sm:$0xff] %vm132_vm7, %v1916_v40  ;;  %1965 = vst.msk [vmem:[#allocation3 + $0x20] sm:$0xff] %vm132_vm7, %v1915_v43  ;;  %v1618_v41 = vmul.f32 %v5381_v28, %v743_v13  ;;  %v1617_v15 = vmul.f32 %v5392_v51, %v736_v12  ;;  %v2325_v48 = vrot.slane %v2317_v45, %v4753_v34 }
 0x3ff   : > { %v1500_v51 = vrot.slane %v1286_v21, %v4685_v35  ;;  %v2332_v55 = vrot.slane %v2318_v0, %v4753_v34  ;;  %v1285_v7 = vrot.slane %v1257_v23, %v4753_v34  ;;  %v1101_v58 = vrot.slane %v4634_v14, %v4753_v34  ;;  %2713 = vst.msk [vmem:[#allocation4 + $0xf0] sm:$0xff] %vm132_vm7, %v2663_v27 }
 0x400   : > { %v1918_v44 = vsub.f32 %v4912_v42, %v1618_v41  ;;  %v1917_v28 = vsub.f32 %v4904_v24, %v1617_v15  ;;  %v5485_v63 = vrot.slane %v680_v52, %v4685_v35  ;;  %v2528_v42 = vrot.slane %v2325_v48, %v4685_v35 }
 0x401   : > { %v925_v49 = vpop.permute.xlu1 %924  ;;  %v918_v60 = vpop.permute.xlu0 %917  ;;  %v6291_v24 = vrot.slane %v5374_v54, %v4685_v35  ;;  %v5494_v43 = vrot.slane %v687_v2, %v4685_v35  ;;  %v2532_v26 = vrot.slane %v2332_v55, %v4685_v35  ;;  %v1508_v45 = vrot.slane %v1271_v36, %v4685_v35 }
 0x402   : > { %1968 = vst.msk [vmem:[#allocation3 + $0x38] sm:$0xff] %vm132_vm7, %v1918_v44  ;;  %1967 = vst.msk [vmem:[#allocation3 + $0x30] sm:$0xff] %vm132_vm7, %v1917_v28  ;;  %v1643_v40 = vmul.f32 %v1492_v22, %v918_v60  ;;  %v2631_v13 = vmul.f32 %v2528_v42, %v4726_v8  ;;  %v1287_v4 = vcombine.high %v1271_v36, %v1271_v36 }
 0x403   : > { %v1644_v21 = vmul.f32 %v6291_v24, %v925_v49  ;;  %v2632_v52 = vmul.f32 %v2532_v26, %v4726_v8  ;;  %v1512_v22 = vrot.slane %v1285_v7, %v4685_v35  ;;  %v1289_v15 = vcombine.high %v1285_v7, %v1285_v7 }
 0x404   : > { %v1943_v23 = vsub.f32 %v4940_v61, %v1643_v40  ;;  %v1109_v2 = vcombine.high %v1101_v58, %v1101_v58  ;;  %v2681_v0 = vsub.f32 %v5485_v63, %v2631_v13  ;;  %v1516_v55 = vrot.slane %v1287_v4, %v4685_v35 }
 0x405   : > { %v1944_v12 = vsub.f32 %v4927_v6, %v1644_v21  ;;  %v939_v41 = vpop.permute.xlu1 %938  ;;  %v932_v54 = vpop.permute.xlu0 %931  ;;  %v1094_v6 = vcombine.high %v4634_v14, %v4634_v14  ;;  %v2682_v61 = vsub.f32 %v5494_v43, %v2632_v52 }
 0x406   : > { %1993 = vst.msk [vmem:[#allocation3 + $0x100] sm:$0xff] %vm132_vm7, %v1943_v23  ;;  %v1646_v27 = vmul.f32 %v1504_v18, %v939_v41  ;;  %v1645_v48 = vmul.f32 %v1500_v51, %v932_v54  ;;  %2731 = vst.msk [vmem:[#allocation4 + $0x180] sm:$0xff] %vm132_vm7, %v2681_v0  ;;  %v1131_v18 = vrot.slane %v1109_v2, %v4753_v34 }
 0x407   : > { %1994 = vst.msk [vmem:[#allocation3 + $0x108] sm:$0xff] %vm132_vm7, %v1944_v12  ;;  %2732 = vst.msk [vmem:[#allocation4 + $0x188] sm:$0xff] %vm132_vm7, %v2682_v61  ;;  %v1117_v51 = vrot.slane %v1101_v58, %v4753_v34 }
 0x408   : > { %v1946_v8 = vsub.f32 %v4950_v37, %v1646_v27  ;;  %v1945_v36 = vsub.f32 %v4962_v11, %v1645_v48  ;;  %v1520_v37 = vrot.slane %v1289_v15, %v4685_v35  ;;  %v1108_v11 = vrot.slane %v1094_v6, %v4753_v34  ;;  %v6293_v48 = vld [vmem:[#allocation42_spill] sm:$0xff] }
 0x409   : > { %v953_v44 = vpop.permute.xlu1 %952  ;;  %v946_v28 = vpop.permute.xlu0 %945  ;;  %v1400_v40 = vrot.slane %v1131_v18, %v4685_v35  ;;  %v1396_v58 = vrot.slane %v1117_v51, %v4685_v35  ;;  %v1141_v26 = vcombine.high %v1131_v18, %v1131_v18  ;;  %v1139_v12 = vcombine.high %v1117_v51, %v1117_v51 }
 0x40a   : > { %1996 = vst.msk [vmem:[#allocation3 + $0x118] sm:$0xff] %vm132_vm7, %v1946_v8  ;;  %1995 = vst.msk [vmem:[#allocation3 + $0x110] sm:$0xff] %vm132_vm7, %v1945_v36  ;;  %v1648_v49 = vmul.f32 %v1512_v22, %v953_v44  ;;  %v1647_v60 = vmul.f32 %v1508_v45, %v946_v28  ;;  %v1110_v23 = vcombine.high %v1108_v11, %v1108_v11 }
 0x40b   : > { %v1408_v41 = vrot.slane %v1141_v26, %v4685_v35  ;;  %v1124_v54 = vrot.slane %v1108_v11, %v4753_v34  ;;  %v1297_v22 = vrot.slane %v4648_v19, %v4753_v34  ;;  %v1404_v0 = vrot.slane %v1139_v12, %v4685_v35 }
 0x40c   : > { %v1948_v7 = vsub.f32 %v4985_v39, %v1648_v49  ;;  %v1947_v42 = vsub.f32 %v4979_v56, %v1647_v60 }
 0x40d   : > { %v967_v24 = vpop.permute.xlu1 %966  ;;  %v960_v21 = vpop.permute.xlu0 %959  ;;  %v1412_v36 = vrot.slane %v1124_v54, %v4685_v35  ;;  %v1140_v44 = vcombine.high %v1124_v54, %v1124_v54  ;;  %v1305_v28 = vcombine.high %v1297_v22, %v1297_v22 }
 0x40e   : > { %1998 = vst.msk [vmem:[#allocation3 + $0x128] sm:$0xff] %vm132_vm7, %v1948_v7  ;;  %1997 = vst.msk [vmem:[#allocation3 + $0x120] sm:$0xff] %vm132_vm7, %v1947_v42  ;;  %v1650_v45 = vmul.f32 %v1520_v37, %v967_v24  ;;  %v1649_v13 = vmul.f32 %v1516_v55, %v960_v21  ;;  %v1290_v55 = vcombine.high %v4648_v19, %v4648_v19  ;;  %v6294_v37 = vld [vmem:[#allocation44_spill] sm:$0xff]  ;;  %v6295_v7 = vld [vmem:[#allocation45_spill] sm:$0xff] }
 0x410   : > { %v1950_v4 = vsub.f32 %v4999_v53, %v1650_v45  ;;  %v1949_v39 = vsub.f32 %v5009_v38, %v1649_v13  ;;  %v1138_v53 = vrot.slane %v1110_v23, %v4753_v34  ;;  %v6292_v38 = vld [vmem:[#allocation43_spill] sm:$0xff]  ;;  %v1304_v26 = vrot.slane %v1290_v55, %v4753_v34 }
 0x411   : > { %v757_v56 = vpop.permute.xlu1 %756  ;;  %v750_v52 = vpop.permute.xlu0 %749  ;;  %v1420_v23 = vrot.slane %v1140_v44, %v4685_v35 }
 0x412   : > { %2000 = vst.msk [vmem:[#allocation3 + $0x138] sm:$0xff] %vm132_vm7, %v1950_v4  ;;  %1999 = vst.msk [vmem:[#allocation3 + $0x130] sm:$0xff] %vm132_vm7, %v1949_v39  ;;  %v1620_v15 = vmul.f32 %v1400_v40, %v757_v56  ;;  %v1619_v2 = vmul.f32 %v1396_v58, %v750_v52  ;;  %v1416_v49 = vrot.slane %v1138_v53, %v4685_v35 }
 0x413   : > { %v1142_v60 = vcombine.high %v1138_v53, %v1138_v53  ;;  %v1327_v40 = vrot.slane %v1305_v28, %v4753_v34  ;;  %v1313_v58 = vrot.slane %v1297_v22, %v4753_v34  ;;  %v1306_v22 = vcombine.high %v1304_v26, %v1304_v26 }
 0x414   : > { %v1920_v27 = vsub.f32 %v6292_v38, %v1620_v15  ;;  %v1919_v6 = vsub.f32 %v6293_v48, %v1619_v2 }
 0x415   : > { %v771_v61 = vpop.permute.xlu1 %770  ;;  %v764_v8 = vpop.permute.xlu0 %763  ;;  %v1424_v12 = vrot.slane %v1142_v60, %v4685_v35  ;;  %v1524_v54 = vrot.slane %v1313_v58, %v4685_v35  ;;  %v1335_v53 = vcombine.high %v1313_v58, %v1313_v58  ;;  %v1334_v48 = vrot.slane %v1306_v22, %v4753_v34 }
 0x416   : > { %1970 = vst.msk [vmem:[#allocation3 + $0x48] sm:$0xff] %vm132_vm7, %v1920_v27  ;;  %1969 = vst.msk [vmem:[#allocation3 + $0x40] sm:$0xff] %vm132_vm7, %v1919_v6  ;;  %v1622_v18 = vmul.f32 %v1408_v41, %v771_v61  ;;  %v1621_v51 = vmul.f32 %v1404_v0, %v764_v8  ;;  %v1528_v41 = vrot.slane %v1327_v40, %v4685_v35  ;;  %v6296_v61 = vld [vmem:[#allocation17_spill] sm:$0xff] }
 0x417   : > { %v1337_v0 = vcombine.high %v1327_v40, %v1327_v40  ;;  %v1320_v6 = vrot.slane %v1304_v26, %v4753_v34  ;;  %v1150_v8 = vrot.slane %v6296_v61, %v4753_v34  ;;  %v1338_v40 = vcombine.high %v1334_v48, %v1334_v48  ;;  %v6299_v26 = vld [vmem:[#allocation48_spill] sm:$0xff] }
 0x418   : > { %v1922_v11 = vsub.f32 %v6294_v37, %v1622_v18  ;;  %v1921_v42 = vsub.f32 %v6295_v7, %v1621_v51  ;;  %v6298_v18 = vld [vmem:[#allocation46_spill] sm:$0xff]  ;;  %v1544_v37 = vrot.slane %v1334_v48, %v4685_v35  ;;  %v1143_v58 = vcombine.high %v6296_v61, %v6296_v61 }
 0x419   : > { %v785_v24 = vpop.permute.xlu1 %784  ;;  %v778_v21 = vpop.permute.xlu0 %777  ;;  %v1536_v28 = vrot.slane %v1337_v0, %v4685_v35  ;;  %v1336_v7 = vcombine.high %v1320_v6, %v1320_v6  ;;  %v1552_v22 = vrot.slane %v1338_v40, %v4685_v35 }
 0x41a   : > { %1972 = vst.msk [vmem:[#allocation3 + $0x58] sm:$0xff] %vm132_vm7, %v1922_v11  ;;  %1971 = vst.msk [vmem:[#allocation3 + $0x50] sm:$0xff] %vm132_vm7, %v1921_v42  ;;  %v1624_v45 = vmul.f32 %v1416_v49, %v785_v24  ;;  %v1623_v13 = vmul.f32 %v1412_v36, %v778_v21  ;;  %v1540_v11 = vrot.slane %v1320_v6, %v4685_v35 }
 0x41b   : > { %v1158_v42 = vcombine.high %v1150_v8, %v1150_v8 }
 0x41c   : > { %v1924_v4 = vsub.f32 %v5087_v16, %v1624_v45  ;;  %v1923_v39 = vsub.f32 %v5083_v17, %v1623_v13  ;;  %v6300_v13 = vld [vmem:[#allocation49_spill] sm:$0xff] }
 0x41d   : > { %v799_v56 = vpop.permute.xlu1 %798  ;;  %v792_v52 = vpop.permute.xlu0 %791 }
 0x41e   : > { %1974 = vst.msk [vmem:[#allocation3 + $0x68] sm:$0xff] %vm132_vm7, %v1924_v4  ;;  %1973 = vst.msk [vmem:[#allocation3 + $0x60] sm:$0xff] %vm132_vm7, %v1923_v39  ;;  %v1626_v15 = vmul.f32 %v1424_v12, %v799_v56  ;;  %v1625_v2 = vmul.f32 %v1420_v23, %v792_v52  ;;  %v1548_v39 = vrot.slane %v1336_v7, %v4685_v35 }
 0x41f   : > { %v1180_v56 = vrot.slane %v1158_v42, %v4753_v34  ;;  %v1166_v52 = vrot.slane %v1150_v8, %v4753_v34 }
 0x420   : > { %v1926_v38 = vsub.f32 %v5093_v59, %v1626_v15  ;;  %v1925_v16 = vsub.f32 %v5102_v9, %v1625_v2  ;;  %v1532_v59 = vrot.slane %v1335_v53, %v4685_v35  ;;  %v6297_v9 = vld [vmem:[#allocation47_spill] sm:$0xff]  ;;  %v1157_v15 = vrot.slane %v1143_v58, %v4753_v34 }
 0x421   : > { %v981_v17 = vpop.permute.xlu1 %980  ;;  %v974_v27 = vpop.permute.xlu0 %973  ;;  %v1188_v8 = vcombine.high %v1166_v52, %v1166_v52 }
 0x422   : > { %1976 = vst.msk [vmem:[#allocation3 + $0x78] sm:$0xff] %vm132_vm7, %v1926_v38  ;;  %1975 = vst.msk [vmem:[#allocation3 + $0x70] sm:$0xff] %vm132_vm7, %v1925_v16  ;;  %v1652_v36 = vmul.f32 %v1528_v41, %v981_v17  ;;  %v1651_v44 = vmul.f32 %v1524_v54, %v974_v27  ;;  %v1432_v16 = vrot.slane %v1180_v56, %v4685_v35 }
 0x423   : > { %v1428_v17 = vrot.slane %v1166_v52, %v4685_v35  ;;  %v1190_v27 = vcombine.high %v1180_v56, %v1180_v56 }
 0x424   : > { %v1952_v55 = vsub.f32 %v6297_v9, %v1652_v36  ;;  %v1951_v51 = vsub.f32 %v6298_v18, %v1651_v44  ;;  %v1159_v36 = vcombine.high %v1157_v15, %v1157_v15  ;;  %v1173_v9 = vrot.slane %v1157_v15, %v4753_v34  ;;  %v6303_v15 = vld [vmem:[#allocation52_spill] sm:$0xff] }
 0x425   : > { %v995_v49 = vpop.permute.xlu1 %994  ;;  %v988_v60 = vpop.permute.xlu0 %987 }
 0x426   : > { %2002 = vst.msk [vmem:[#allocation3 + $0x148] sm:$0xff] %vm132_vm7, %v1952_v55  ;;  %2001 = vst.msk [vmem:[#allocation3 + $0x140] sm:$0xff] %vm132_vm7, %v1951_v51  ;;  %v1654_v24 = vmul.f32 %v1536_v28, %v995_v49  ;;  %v1653_v21 = vmul.f32 %v1532_v59, %v988_v60  ;;  %v1440_v59 = vrot.slane %v1190_v27, %v4685_v35  ;;  %v6301_v55 = vld [vmem:[#allocation19_spill] sm:$0xff] }
 0x427   : > { %v1199_v18 = vrot.slane %v6301_v55, %v4753_v34  ;;  %v1436_v60 = vrot.slane %v1188_v8, %v4685_v35  ;;  %v1444_v42 = vrot.slane %v1173_v9, %v4685_v35 }
 0x428   : > { %v1954_v45 = vsub.f32 %v6299_v26, %v1654_v24  ;;  %v1953_v12 = vsub.f32 %v6300_v13, %v1653_v21  ;;  %v1189_v21 = vcombine.high %v1173_v9, %v1173_v9  ;;  %v6302_v13 = vld [vmem:[#allocation50_spill] sm:$0xff] }
 0x429   : > { %v1009_v23 = vpop.permute.xlu1 %1008  ;;  %v1002_v4 = vpop.permute.xlu0 %1001  ;;  %v1207_v40 = vcombine.high %v1199_v18, %v1199_v18 }
 0x42a   : > { %2004 = vst.msk [vmem:[#allocation3 + $0x158] sm:$0xff] %vm132_vm7, %v1954_v45  ;;  %2003 = vst.msk [vmem:[#allocation3 + $0x150] sm:$0xff] %vm132_vm7, %v1953_v12  ;;  %v1656_v41 = vmul.f32 %v1544_v37, %v1009_v23  ;;  %v1655_v54 = vmul.f32 %v1540_v11, %v1002_v4  ;;  %v1452_v56 = vrot.slane %v1189_v21, %v4685_v35 }
 0x42b   : > { %v1229_v52 = vrot.slane %v1207_v40, %v4753_v34 }
 0x42c   : > { %v1956_v2 = vsub.f32 %v5185_v57, %v1656_v41  ;;  %v1955_v0 = vsub.f32 %v5181_v31, %v1655_v54 }
 0x42d   : > { %v1023_v53 = vpop.permute.xlu1 %1022  ;;  %v1016_v38 = vpop.permute.xlu0 %1015  ;;  %v1239_v27 = vcombine.high %v1229_v52, %v1229_v52 }
 0x42e   : > { %2006 = vst.msk [vmem:[#allocation3 + $0x168] sm:$0xff] %vm132_vm7, %v1956_v2  ;;  %2005 = vst.msk [vmem:[#allocation3 + $0x160] sm:$0xff] %vm132_vm7, %v1955_v0  ;;  %v1658_v48 = vmul.f32 %v1552_v22, %v1023_v53  ;;  %v1657_v6 = vmul.f32 %v1548_v39, %v1016_v38  ;;  %v1215_v22 = vrot.slane %v1199_v18, %v4753_v34  ;;  %v6304_v0 = vld [vmem:[#allocation51_spill] sm:$0xff] }
 0x430   : > { %v1958_v44 = vsub.f32 %v5192_v62, %v1658_v48  ;;  %v1957_v57 = vsub.f32 %v5212_v25, %v1657_v6  ;;  %v1187_v62 = vrot.slane %v1159_v36, %v4753_v34  ;;  %v1237_v48 = vcombine.high %v1215_v22, %v1215_v22 }
 0x431   : > { %v813_v31 = vpop.permute.xlu1 %812  ;;  %v806_v28 = vpop.permute.xlu0 %805  ;;  %v1460_v36 = vrot.slane %v1215_v22, %v4685_v35 }
 0x432   : > { %2008 = vst.msk [vmem:[#allocation3 + $0x178] sm:$0xff] %vm132_vm7, %v1958_v44  ;;  %2007 = vst.msk [vmem:[#allocation3 + $0x170] sm:$0xff] %vm132_vm7, %v1957_v57  ;;  %v1628_v51 = vmul.f32 %v1432_v16, %v813_v31  ;;  %v1627_v49 = vmul.f32 %v1428_v17, %v806_v28  ;;  %v1191_v24 = vcombine.high %v1187_v62, %v1187_v62  ;;  %v6305_v57 = vld [vmem:[#allocation53_spill] sm:$0xff]  ;;  %v6306_v28 = vld [vmem:[#allocation54_spill] sm:$0xff] }
 0x433   : > { %v1448_v45 = vrot.slane %v1187_v62, %v4685_v35  ;;  %v1464_v17 = vrot.slane %v1229_v52, %v4685_v35 }
 0x434   : > { %v1928_v25 = vsub.f32 %v5233_v29, %v1628_v51  ;;  %v1927_v37 = vsub.f32 %v5223_v46, %v1627_v49  ;;  %v1192_v29 = vcombine.high %v6301_v55, %v6301_v55  ;;  %v1456_v39 = vrot.slane %v1191_v24, %v4685_v35 }
 0x435   : > { %v827_v11 = vpop.permute.xlu1 %826  ;;  %v820_v7 = vpop.permute.xlu0 %819  ;;  %v1472_v51 = vrot.slane %v1239_v27, %v4685_v35  ;;  %v1468_v49 = vrot.slane %v1237_v48, %v4685_v35 }
 0x436   : > { %1978 = vst.msk [vmem:[#allocation3 + $0x88] sm:$0xff] %vm132_vm7, %v1928_v25  ;;  %1977 = vst.msk [vmem:[#allocation3 + $0x80] sm:$0xff] %vm132_vm7, %v1927_v37  ;;  %v1630_v58 = vmul.f32 %v1440_v59, %v827_v11  ;;  %v1629_v26 = vmul.f32 %v1436_v60, %v820_v7  ;;  %v6307_v7 = vld [vmem:[#allocation55_spill] sm:$0xff] }
 0x438   : > { %v1930_v46 = vsub.f32 %v5244_v5, %v1630_v58  ;;  %v1929_v12 = vsub.f32 %v6302_v13, %v1629_v26  ;;  %v1206_v5 = vrot.slane %v1192_v29, %v4753_v34  ;;  %v6308_v26 = vld [vmem:[#allocation24_spill] sm:$0xff] }
 0x439   : > { %v841_v23 = vpop.permute.xlu1 %840  ;;  %v834_v4 = vpop.permute.xlu0 %833 }
 0x43a   : > { %1980 = vst.msk [vmem:[#allocation3 + $0x98] sm:$0xff] %vm132_vm7, %v1930_v46  ;;  %1979 = vst.msk [vmem:[#allocation3 + $0x90] sm:$0xff] %vm132_vm7, %v1929_v12  ;;  %v1632_v41 = vmul.f32 %v1448_v45, %v841_v23  ;;  %v1631_v54 = vmul.f32 %v1444_v42, %v834_v4  ;;  %v1208_v44 = vcombine.high %v1206_v5, %v1206_v5 }
 0x43b   : > { %v1222_v37 = vrot.slane %v1206_v5, %v4753_v34  ;;  %v1346_v45 = vcombine.high %v6308_v26, %v6308_v26  ;;  %v1353_v5 = vrot.slane %v6308_v26, %v4753_v34 }
 0x43c   : > { %v1932_v2 = vsub.f32 %v6303_v15, %v1632_v41  ;;  %v1931_v53 = vsub.f32 %v6304_v0, %v1631_v54  ;;  %v1236_v25 = vrot.slane %v1208_v44, %v4753_v34 }
 0x43d   : > { %v855_v38 = vpop.permute.xlu1 %854  ;;  %v848_v16 = vpop.permute.xlu0 %847  ;;  %v1238_v58 = vcombine.high %v1222_v37, %v1222_v37  ;;  %v1476_v12 = vrot.slane %v1222_v37, %v4685_v35  ;;  %v1360_v22 = vrot.slane %v1346_v45, %v4753_v34 }
 0x43e   : > { %1982 = vst.msk [vmem:[#allocation3 + $0xa8] sm:$0xff] %vm132_vm7, %v1932_v2  ;;  %1981 = vst.msk [vmem:[#allocation3 + $0xa0] sm:$0xff] %vm132_vm7, %v1931_v53  ;;  %v1634_v6 = vmul.f32 %v1456_v39, %v855_v38  ;;  %v1633_v8 = vmul.f32 %v1452_v56, %v848_v16  ;;  %v1240_v40 = vcombine.high %v1236_v25, %v1236_v25 }
 0x43f   : > { %v1480_v13 = vrot.slane %v1236_v25, %v4685_v35  ;;  %v1484_v52 = vrot.slane %v1238_v58, %v4685_v35  ;;  %v1560_v38 = vrot.slane %v1360_v22, %v4685_v35  ;;  %v1556_v16 = vrot.slane %v1353_v5, %v4685_v35 }
 0x440   : > { %v1934_v31 = vsub.f32 %v6305_v57, %v1634_v6  ;;  %v1933_v59 = vsub.f32 %v6306_v28, %v1633_v8  ;;  %v1488_v56 = vrot.slane %v1240_v40, %v4685_v35 }
 0x441   : > { %v869_v9 = vpop.permute.xlu1 %868  ;;  %v862_v18 = vpop.permute.xlu0 %861 }
 0x442   : > { %1984 = vst.msk [vmem:[#allocation3 + $0xb8] sm:$0xff] %vm132_vm7, %v1934_v31  ;;  %1983 = vst.msk [vmem:[#allocation3 + $0xb0] sm:$0xff] %vm132_vm7, %v1933_v59  ;;  %v1636_v60 = vmul.f32 %v1464_v17, %v869_v9  ;;  %v1635_v62 = vmul.f32 %v1460_v36, %v862_v18  ;;  %v6309_v36 = vld [vmem:[#allocation35_spill] sm:$0xff] }
 0x444   : > { %v1936_v11 = vsub.f32 %v5353_v3, %v1636_v60  ;;  %v1935_v42 = vsub.f32 %v6307_v7, %v1635_v62 }
 0x445   : > { %v883_v24 = vpop.permute.xlu1 %882  ;;  %v876_v21 = vpop.permute.xlu0 %875 }
 0x446   : > { %1986 = vst.msk [vmem:[#allocation3 + $0xc8] sm:$0xff] %vm132_vm7, %v1936_v11  ;;  %1985 = vst.msk [vmem:[#allocation3 + $0xc0] sm:$0xff] %vm132_vm7, %v1935_v42  ;;  %v1638_v29 = vmul.f32 %v1472_v51, %v883_v24  ;;  %v1637_v46 = vmul.f32 %v1468_v49, %v876_v21 }
 0x448   : > { %v1938_v3 = vsub.f32 %v5370_v10, %v1638_v29  ;;  %v1937_v23 = vsub.f32 %v5359_v1, %v1637_v46 }
 0x449   : > { %v897_v4 = vpop.permute.xlu1 %896  ;;  %v890_v39 = vpop.permute.xlu0 %889 }
 0x44a   : > { %1988 = vst.msk [vmem:[#allocation3 + $0xd8] sm:$0xff] %vm132_vm7, %v1938_v3  ;;  %1987 = vst.msk [vmem:[#allocation3 + $0xd0] sm:$0xff] %vm132_vm7, %v1937_v23  ;;  %v1640_v41 = vmul.f32 %v1480_v13, %v897_v4  ;;  %v1639_v54 = vmul.f32 %v1476_v12, %v890_v39 }
 0x44c   : > { %v1940_v10 = vsub.f32 %v5423_v20, %v1640_v41  ;;  %v1939_v1 = vsub.f32 %v5426_v47, %v1639_v54 }
 0x44d   : > { %v911_v15 = vpop.permute.xlu1 %910  ;;  %v904_v2 = vpop.permute.xlu0 %903 }
 0x44e   : > { %1990 = vst.msk [vmem:[#allocation3 + $0xe8] sm:$0xff] %vm132_vm7, %v1940_v10  ;;  %1989 = vst.msk [vmem:[#allocation3 + $0xe0] sm:$0xff] %vm132_vm7, %v1939_v1  ;;  %v1642_v0 = vmul.f32 %v1488_v56, %v911_v15  ;;  %v1641_v53 = vmul.f32 %v1484_v52, %v904_v2 }
 0x450   : > { %v1942_v17 = vsub.f32 %v5437_v50, %v1642_v0  ;;  %v1941_v34 = vsub.f32 %v5460_v33, %v1641_v53 }
 0x451   : > { %v1037_v27 = vpop.permute.xlu1 %1036  ;;  %v1030_v20 = vpop.permute.xlu0 %1029 }
 0x452   : > { %1992 = vst.msk [vmem:[#allocation3 + $0xf8] sm:$0xff] %vm132_vm7, %v1942_v17  ;;  %1991 = vst.msk [vmem:[#allocation3 + $0xf0] sm:$0xff] %vm132_vm7, %v1941_v34  ;;  %v1660_v47 = vmul.f32 %v1560_v38, %v1037_v27  ;;  %v1659_v48 = vmul.f32 %v1556_v16, %v1030_v20 }
 0x454   : > { %v1960_v6 = vsub.f32 %v5494_v43, %v1660_v47  ;;  %v1959_v8 = vsub.f32 %v5485_v63, %v1659_v48 }
 0x456   : > { %2010 = vst.msk [vmem:[#allocation3 + $0x188] sm:$0xff] %vm132_vm7, %v1960_v6  ;;  %2009 = vst.msk [vmem:[#allocation3 + $0x180] sm:$0xff] %vm132_vm7, %v1959_v8 }
 0x457 LB: >> { %v4543_v50 = vmov 0.0   ;;  %vm4544_vm11 = vmmov 0   ;;  %s4215_s6 = sshll.u32 %s4526_s11, 3  ;;  %v2745_v33 = vstv %s4526_s11  ;;  %v6310_v63 = vld [vmem:[#allocation14_spill] sm:$0xff]  ;;  %v6311_v51 = vld [vmem:[#allocation15_spill] sm:$0xff]  ;;  %v6313_v60 = vld [vmem:[#allocation21_spill] sm:$0xff]  ;;  %s4526_s11 = sphi %s5667_s11, %s2738_s11   ;;  %v4522_v36 = vphi %v6309_v36, %v6325_v36  }
 0x458   : >> { %4317 = vmatprep.subr.mxu0 %v4543_v50  ;;  %4319 = vmatprep.mubr.msk.f32.mxu0 %vm4544_vm11, %v4543_v50  ;;  %vm2746_vm12 = vcmp.eq.s32.totalorder %v6310_v63, %v2745_v33  ;;  %s2741_s12 = scalar_lea.vmem [#allocation3], %s4215_s6  ;;  %s2743_s13 = scalar_lea.vmem [#allocation4], %s4215_s6  ;;  %v6312_v49 = vld [vmem:[#allocation18_spill] sm:$0xff]  ;;  %v6315_v25 = vld [vmem:[#allocation23_spill] sm:$0xff]  ;;  %v6318_v13 = vld [vmem:[#allocation36_spill] sm:$0xff] }
 0x459   : >> { %4340 = vmatprep.subr.mxu1 %v4543_v50  ;;  %4342 = vmatprep.mubr.msk.f32.mxu1 %vm4544_vm11, %v4543_v50  ;;  %v2744_v44 = vld [vmem:[%s2743_s13] sm:$0xff]  ;;  %v4216_v57 = vsel %vm2746_vm12, 1.0, %v4543_v50  ;;  %v6319_v3 = vld [vmem:[#allocation32_spill] sm:$0xff]  ;;  %v6321_v10 = vld [vmem:[#allocation39_spill] sm:$0xff]  ;;  %s2738_s11 = sadd.s32 1, %s4526_s11  }
 0x45a   : >> { %v5678_v31 = vsub.f32 %v2744_v44, %v4216_v57  ;;  %v2756_v59 = vmul.f32 %v4522_v36, %v4216_v57  ;;  %v6314_v62 = vld [vmem:[#allocation22_spill] sm:$0xff]  ;;  %v6320_v52 = vld [vmem:[#allocation37_spill] sm:$0xff]  ;;  %v6323_v16 = vld [vmem:[#allocation40_spill] sm:$0xff]  ;;  %p2735_p4 = scmp.ge.s32.totalorder %s2738_s11, 50  }
 0x45b   : >> { %v6316_v37 = vld [vmem:[#allocation30_spill] sm:$0xff]  ;;  %v6324_v20 = vld [vmem:[#allocation41_spill] sm:$0xff] }
 0x45c   : >> { %4318 = vmatpush3.xpose.msk.msra.mxu0 %vm132_vm7, %v5678_v31  ;;  %v2757_v18 = vsel %vm132_vm7, %v2756_v59, 0.0  ;;  %v6322_v15 = vld [vmem:[#allocation38_spill] sm:$0xff] }
 0x45d   : >> { %v2742_v43 = vld [vmem:[%s2741_s12] sm:$0xff] }
 0x45e   : >> { %v2749_v28 = vmul.f32 %v4216_v57, %v2742_v43 }
 0x45f   : >> { %4320 = vmatmul.mubr.msk.f32.vlgmr.msra.gmra.mrb[0].mxu0 %vm132_vm7, %v6311_v51 }
 0x460   : >> { %v2750_v9 = vsel %vm132_vm7, %v2749_v28, 0.0  ;;  %4322 = vmatprep.mubr.msk.f32.mxu0 %vm4544_vm11, %v4543_v50 }
 0x461   : >> { %2751 = vadd.xlane.f32.xlu0 %v2750_v9 }
 0x463   : >> { %4323 = vmatmul.mubr.msk.f32.gmra.mrb[2].mxu0 %vm132_vm7, %v6312_v49 }
 0x464   : >> { %4325 = vmatprep.mubr.msk.f32.mxu0 %vm4544_vm11, %v4543_v50 }
 0x465   : >> { %2758 = vadd.xlane.f32.xlu0 %v2757_v18 }
 0x467   : >> { %4326 = vmatmul.mubr.msk.f32.gmra.mrb[4].mxu0 %vm132_vm7, %v6313_v60 }
 0x468   : >> { %4328 = vmatprep.mubr.msk.f32.mxu0 %vm4544_vm11, %v4543_v50 }
 0x46b   : >> { %4329 = vmatmul.mubr.msk.f32.gmra.mrb[6].mxu0 %vm132_vm7, %v6314_v62 }
 0x46c   : >> { %4331 = vmatprep.mubr.msk.f32.mxu0 %vm4544_vm11, %v4543_v50 }
 0x46f   : >> { %4332 = vmatmul.mubr.msk.f32.gmra.mrb[8].mxu0 %vm132_vm7, %v6315_v25 }
 0x470   : >> { %4334 = vmatprep.mubr.msk.f32.mxu0 %vm4544_vm11, %v4543_v50 }
 0x473   : >> { %4335 = vmatmul.mubr.msk.f32.gmra.mrb[10].mxu0 %vm132_vm7, %v6316_v37 }
 0x474   : >> { %4337 = vmatprep.mubr.msk.f32.mxu0 %vm4544_vm11, %v4543_v50 }
 0x477   : >> { %4338 = vmatmul.mubr.msk.f32.gmra.mrb[12].mxu0 %vm132_vm7, %v4675_v30 }
 0x4ee   : >> { %v2752_v11 = vpop.xlane.xlu0 %2751 }
 0x4ef   : >> { %4452 = vrcp.f32 %v2752_v11 }
 0x4f2   : >> { %v2759_v7 = vpop.xlane.xlu0 %2758 }
 0x4f9   : >> { %v4453_v42 = vpop.eup %4452 }
 0x4fa   : >> { %v5704_v24 = vmul.f32 %v4453_v42, %v2742_v43  ;;  %v2760_v21 = vmul.f32 %v4453_v42, %v2759_v7 }
 0x4fc   : >> { %v4068_v40 = vmul.f32 %v5678_v31, %v2760_v21  ;;  %4341 = vmatpush3.xpose.msk.msra.mxu1 %vm132_vm7, %v5704_v24 }
 0x4fe   : >> { %v5709_v36 = vsub.f32 %v4522_v36, %v4068_v40  }
 0x4ff   : >> { %4343 = vmatmul.mubr.msk.f32.vlgmr.msra.gmra.mrb[0].mxu1 %vm132_vm7, %v6311_v51 }
 0x500   : >> { %v6317_v58 = vmov %v5709_v36  ;;  %4345 = vmatprep.mubr.msk.f32.mxu1 %vm4544_vm11, %v4543_v50 }
 0x503   : >> { %4346 = vmatmul.mubr.msk.f32.gmra.mrb[2].mxu1 %vm132_vm7, %v6312_v49 }
 0x504   : >> { %4348 = vmatprep.mubr.msk.f32.mxu1 %vm4544_vm11, %v4543_v50 }
 0x507   : >> { %4349 = vmatmul.mubr.msk.f32.gmra.mrb[4].mxu1 %vm132_vm7, %v6313_v60 }
 0x508   : >> { %4351 = vmatprep.mubr.msk.f32.mxu1 %vm4544_vm11, %v4543_v50 }
 0x50b   : >> { %4352 = vmatmul.mubr.msk.f32.gmra.mrb[6].mxu1 %vm132_vm7, %v6314_v62 }
 0x50c   : >> { %4354 = vmatprep.mubr.msk.f32.mxu1 %vm4544_vm11, %v4543_v50 }
 0x50f   : >> { %4355 = vmatmul.mubr.msk.f32.gmra.mrb[8].mxu1 %vm132_vm7, %v6315_v25 }
 0x510   : >> { %4357 = vmatprep.mubr.msk.f32.mxu1 %vm4544_vm11, %v4543_v50 }
 0x513   : >> { %4358 = vmatmul.mubr.msk.f32.gmra.mrb[10].mxu1 %vm132_vm7, %v6316_v37 }
 0x514   : >> { %4360 = vmatprep.mubr.msk.f32.mxu1 %vm4544_vm11, %v4543_v50 }
 0x517   : >> { %4361 = vmatmul.mubr.msk.f32.gmra.mrb[12].mxu1 %vm132_vm7, %v4675_v30 }
 0x532   : >> { %v2831_v45 = vpop.f32.mrb[0].mxu0 }
 0x533   : >> { %v3021_v29 = vrot.slane %v2831_v45, %v4685_v35  ;;  %v4321_v46 = vpop.f32.mrb[1].mxu0  ;;  %v3035_v12 = vrot.slane %v2831_v45, %v6318_v13  ;;  %v3028_v23 = vrot.slane %v2831_v45, %v6319_v3  ;;  %v3042_v41 = vrot.slane %v2831_v45, %v6320_v52 }
 0x534   : >> { %v3049_v1 = vrot.slane %v2831_v45, %v6321_v10  ;;  %v3056_v38 = vrot.slane %v2831_v45, %v6322_v15  ;;  %v3063_v47 = vrot.slane %v2831_v45, %v6324_v20  ;;  %v3070_v36 = vrot.slane %v2831_v45, %v6323_v16 }
 0x535   : >> { %3023 = vbcast.lane.b32.xlu1 %v3021_v29, 256  ;;  %3037 = vbcast.lane.b32.xlu0 %v3035_v12, 256 }
 0x536   : >> { %v2836_v4 = vpop.f32.mrb[2].mxu0 }
 0x537   : >> { %v3084_v39 = vrot.slane %v2836_v4, %v6319_v3  ;;  %v4324_v56 = vpop.f32.mrb[3].mxu0  ;;  %v3098_v54 = vrot.slane %v2836_v4, %v6320_v52  ;;  %v3112_v2 = vrot.slane %v2836_v4, %v6322_v15  ;;  %v3126_v17 = vrot.slane %v2836_v4, %v6323_v16 }
 0x538   : >> { %v3077_v43 = vrot.slane %v2836_v4, %v4685_v35  ;;  %v3091_v57 = vrot.slane %v2836_v4, %v6318_v13  ;;  %v3105_v59 = vrot.slane %v2836_v4, %v6321_v10  ;;  %v3119_v18 = vrot.slane %v2836_v4, %v6324_v20 }
 0x539   : >> { %3030 = vbcast.lane.b32.xlu1 %v3028_v23, 256  ;;  %3086 = vbcast.lane.b32.xlu0 %v3084_v39, 256 }
 0x53a   : >> { %v2841_v22 = vpop.f32.mrb[4].mxu0 }
 0x53b   : >> { %v4327_v5 = vpop.f32.mrb[5].mxu0  ;;  %v3140_v48 = vrot.slane %v2841_v22, %v6319_v3  ;;  %v3154_v50 = vrot.slane %v2841_v22, %v6320_v52  ;;  %v3168_v44 = vrot.slane %v2841_v22, %v6322_v15  ;;  %v3182_v28 = vrot.slane %v2841_v22, %v6323_v16 }
 0x53c   : >> { %v3133_v49 = vrot.slane %v2841_v22, %v4685_v35  ;;  %v3147_v62 = vrot.slane %v2841_v22, %v6318_v13  ;;  %v3161_v37 = vrot.slane %v2841_v22, %v6321_v10  ;;  %v3175_v7 = vrot.slane %v2841_v22, %v6324_v20 }
 0x53d   : >> { %3044 = vbcast.lane.b32.xlu1 %v3042_v41, 256  ;;  %3100 = vbcast.lane.b32.xlu0 %v3098_v54, 256 }
 0x53e   : >> { %v5739_v0 = vpop.f32.mrb[6].mxu0 }
 0x53f   : >> { %v4330_v53 = vpop.f32.mrb[7].mxu0  ;;  %v3196_v9 = vrot.slane %v5739_v0, %v6319_v3  ;;  %v3210_v51 = vrot.slane %v5739_v0, %v6320_v52  ;;  %v3224_v60 = vrot.slane %v5739_v0, %v6322_v15  ;;  %v3238_v25 = vrot.slane %v5739_v0, %v6323_v16 }
 0x540   : >> { %v3189_v21 = vrot.slane %v5739_v0, %v4685_v35  ;;  %v3203_v45 = vrot.slane %v5739_v0, %v6318_v13  ;;  %v3217_v46 = vrot.slane %v5739_v0, %v6321_v10  ;;  %v3231_v23 = vrot.slane %v5739_v0, %v6324_v20 }
 0x541   : >> { %3051 = vbcast.lane.b32.xlu1 %v3049_v1, 256  ;;  %3114 = vbcast.lane.b32.xlu0 %v3112_v2, 256 }
 0x542   : >> { %v5743_v34 = vpop.f32.mrb[8].mxu0 }
 0x543   : >> { %v4333_v27 = vpop.f32.mrb[9].mxu0  ;;  %v3252_v11 = vrot.slane %v5743_v34, %v6319_v3  ;;  %v3266_v42 = vrot.slane %v5743_v34, %v6320_v52  ;;  %v3280_v40 = vrot.slane %v5743_v34, %v6322_v15  ;;  %v3294_v29 = vrot.slane %v5743_v34, %v6323_v16 }
 0x544   : >> { %v3245_v39 = vrot.slane %v5743_v34, %v4685_v35  ;;  %v3259_v41 = vrot.slane %v5743_v34, %v6318_v13  ;;  %v3273_v22 = vrot.slane %v5743_v34, %v6321_v10  ;;  %v3287_v1 = vrot.slane %v5743_v34, %v6324_v20  ;;  %v2968_v34 = vld [vmem:[#allocation3] sm:$0xff] }
 0x545   : >> { %3058 = vbcast.lane.b32.xlu1 %v3056_v38, 256  ;;  %3128 = vbcast.lane.b32.xlu0 %v3126_v17, 256 }
 0x546   : >> { %v5747_v6 = vpop.f32.mrb[10].mxu0 }
 0x547   : >> { %v4336_v8 = vpop.f32.mrb[11].mxu0  ;;  %v3308_v12 = vrot.slane %v5747_v6, %v6319_v3  ;;  %v3322_v4 = vrot.slane %v5747_v6, %v6320_v52  ;;  %v3336_v56 = vrot.slane %v5747_v6, %v6322_v15  ;;  %v3350_v54 = vrot.slane %v5747_v6, %v6323_v16 }
 0x548   : >> { %v3301_v2 = vrot.slane %v5747_v6, %v4685_v35  ;;  %v3315_v0 = vrot.slane %v5747_v6, %v6318_v13  ;;  %v3329_v53 = vrot.slane %v5747_v6, %v6321_v10  ;;  %v3343_v38 = vrot.slane %v5747_v6, %v6324_v20 }
 0x549   : >> { %3065 = vbcast.lane.b32.xlu1 %v3063_v47, 256  ;;  %3142 = vbcast.lane.b32.xlu0 %v3140_v48, 256  ;;  %v2970_v47 = vld [vmem:[#allocation3 + $0x10] sm:$0xff] }
 0x54a   : >> { %v5751_v33 = vpop.f32.mrb[12].mxu0 }
 0x54b   : >> { %v4339_v63 = vpop.f32.mrb[13].mxu0  ;;  %v3364_v5 = vrot.slane %v5751_v33, %v6319_v3  ;;  %v3357_v17 = vrot.slane %v5751_v33, %v4685_v35 }
 0x54d   : >> { %3072 = vbcast.lane.b32.xlu1 %v3070_v36, 256  ;;  %3156 = vbcast.lane.b32.xlu0 %v3154_v50, 256 }
 0x551   : >> { %3079 = vbcast.lane.b32.xlu1 %v3077_v43, 256  ;;  %3170 = vbcast.lane.b32.xlu0 %v3168_v44, 256  ;;  %v2969_v43 = vld [vmem:[#allocation3 + $0x8] sm:$0xff] }
 0x555   : >> { %3093 = vbcast.lane.b32.xlu1 %v3091_v57, 256  ;;  %3184 = vbcast.lane.b32.xlu0 %v3182_v28, 256  ;;  %v2977_v57 = vld [vmem:[#allocation3 + $0x48] sm:$0xff] }
 0x559   : >> { %3107 = vbcast.lane.b32.xlu1 %v3105_v59, 256  ;;  %3198 = vbcast.lane.b32.xlu0 %v3196_v9, 256 }
 0x55d   : >> { %3121 = vbcast.lane.b32.xlu1 %v3119_v18, 256  ;;  %3212 = vbcast.lane.b32.xlu0 %v3210_v51, 256  ;;  %v2971_v18 = vld [vmem:[#allocation3 + $0x18] sm:$0xff] }
 0x561   : >> { %3135 = vbcast.lane.b32.xlu1 %v3133_v49, 256  ;;  %3226 = vbcast.lane.b32.xlu0 %v3224_v60, 256  ;;  %v2979_v49 = vld [vmem:[#allocation3 + $0x58] sm:$0xff] }
 0x565   : >> { %3149 = vbcast.lane.b32.xlu1 %v3147_v62, 256  ;;  %3240 = vbcast.lane.b32.xlu0 %v3238_v25, 256 }
 0x569   : >> { %3163 = vbcast.lane.b32.xlu1 %v3161_v37, 256  ;;  %3254 = vbcast.lane.b32.xlu0 %v3252_v11, 256 }
 0x56d   : >> { %3177 = vbcast.lane.b32.xlu1 %v3175_v7, 256  ;;  %3268 = vbcast.lane.b32.xlu0 %v3266_v42, 256  ;;  %v2972_v7 = vld [vmem:[#allocation3 + $0x20] sm:$0xff] }
 0x571   : >> { %3191 = vbcast.lane.b32.xlu1 %v3189_v21, 256  ;;  %3282 = vbcast.lane.b32.xlu0 %v3280_v40, 256  ;;  %v2981_v21 = vld [vmem:[#allocation3 + $0x68] sm:$0xff] }
 0x575   : >> { %3205 = vbcast.lane.b32.xlu1 %v3203_v45, 256  ;;  %3296 = vbcast.lane.b32.xlu0 %v3294_v29, 256 }
 0x579   : >> { %3219 = vbcast.lane.b32.xlu1 %v3217_v46, 256  ;;  %3310 = vbcast.lane.b32.xlu0 %v3308_v12, 256 }
 0x57d   : >> { %3233 = vbcast.lane.b32.xlu1 %v3231_v23, 256  ;;  %3324 = vbcast.lane.b32.xlu0 %v3322_v4, 256  ;;  %v2973_v23 = vld [vmem:[#allocation3 + $0x28] sm:$0xff] }
 0x581   : >> { %3247 = vbcast.lane.b32.xlu1 %v3245_v39, 256  ;;  %3338 = vbcast.lane.b32.xlu0 %v3336_v56, 256  ;;  %v2983_v39 = vld [vmem:[#allocation3 + $0x78] sm:$0xff] }
 0x585   : >> { %3261 = vbcast.lane.b32.xlu1 %v3259_v41, 256  ;;  %3352 = vbcast.lane.b32.xlu0 %v3350_v54, 256 }
 0x589   : >> { %3275 = vbcast.lane.b32.xlu1 %v3273_v22, 256  ;;  %3366 = vbcast.lane.b32.xlu0 %v3364_v5, 256 }
 0x58d   : >> { %3289 = vbcast.lane.b32.xlu1 %v3287_v1, 256  ;;  %v2974_v1 = vld [vmem:[#allocation3 + $0x30] sm:$0xff] }
 0x591   : >> { %3303 = vbcast.lane.b32.xlu1 %v3301_v2, 256 }
 0x595   : >> { %3317 = vbcast.lane.b32.xlu1 %v3315_v0, 256  ;;  %v2985_v0 = vld [vmem:[#allocation3 + $0x88] sm:$0xff] }
 0x599   : >> { %3331 = vbcast.lane.b32.xlu1 %v3329_v53, 256 }
 0x59d   : >> { %3345 = vbcast.lane.b32.xlu1 %v3343_v38, 256 }
 0x5a1   : >> { %3359 = vbcast.lane.b32.xlu1 %v3357_v17, 256 }
 0x5a7   : >> { %v3024_v27 = vpop.permute.xlu1 %3023  ;;  %v3038_v48 = vpop.permute.xlu0 %3037 }
 0x5a8   : >> { %v3368_v8 = vmul.f32 %v3024_v27, %v5704_v24  ;;  %v3370_v36 = vmul.f32 %v3038_v48, %v5704_v24 }
 0x5aa   : >> { %v3418_v50 = vsub.f32 %v2968_v34, %v3368_v8  ;;  %v3420_v63 = vsub.f32 %v2970_v47, %v3370_v36  ;;  %v2975_v47 = vld [vmem:[#allocation3 + $0x38] sm:$0xff] }
 0x5ab   : >> { %v3031_v44 = vpop.permute.xlu1 %3030  ;;  %v3087_v28 = vpop.permute.xlu0 %3086  ;;  %v2987_v8 = vld [vmem:[#allocation3 + $0x98] sm:$0xff] }
 0x5ac   : >> { %3468 = vst.msk [vmem:[#allocation3] sm:$0xff] %vm132_vm7, %v3418_v50  ;;  %3470 = vst.msk [vmem:[#allocation3 + $0x10] sm:$0xff] %vm132_vm7, %v3420_v63  ;;  %v3369_v6 = vmul.f32 %v3031_v44, %v5704_v24  ;;  %v3377_v33 = vmul.f32 %v3087_v28, %v5704_v24 }
 0x5ae   : >> { %v3419_v59 = vsub.f32 %v2969_v43, %v3369_v6  ;;  %v3427_v9 = vsub.f32 %v2977_v57, %v3377_v33  ;;  %v2976_v57 = vld [vmem:[#allocation3 + $0x40] sm:$0xff]  ;;  %v2989_v6 = vld [vmem:[#allocation3 + $0xa8] sm:$0xff] }
 0x5af   : >> { %v3045_v51 = vpop.permute.xlu1 %3044  ;;  %v3101_v60 = vpop.permute.xlu0 %3100 }
 0x5b0   : >> { %3469 = vst.msk [vmem:[#allocation3 + $0x8] sm:$0xff] %vm132_vm7, %v3419_v59  ;;  %3477 = vst.msk [vmem:[#allocation3 + $0x48] sm:$0xff] %vm132_vm7, %v3427_v9  ;;  %v3371_v62 = vmul.f32 %v3045_v51, %v5704_v24  ;;  %v3379_v25 = vmul.f32 %v3101_v60, %v5704_v24 }
 0x5b2   : >> { %v3421_v37 = vsub.f32 %v2971_v18, %v3371_v62  ;;  %v3429_v11 = vsub.f32 %v2979_v49, %v3379_v25  ;;  %v2978_v49 = vld [vmem:[#allocation3 + $0x50] sm:$0xff]  ;;  %v2991_v62 = vld [vmem:[#allocation3 + $0xb8] sm:$0xff] }
 0x5b3   : >> { %v3052_v42 = vpop.permute.xlu1 %3051  ;;  %v3115_v40 = vpop.permute.xlu0 %3114 }
 0x5b4   : >> { %3471 = vst.msk [vmem:[#allocation3 + $0x18] sm:$0xff] %vm132_vm7, %v3421_v37  ;;  %3479 = vst.msk [vmem:[#allocation3 + $0x58] sm:$0xff] %vm132_vm7, %v3429_v11  ;;  %v3372_v45 = vmul.f32 %v3052_v42, %v5704_v24  ;;  %v3381_v29 = vmul.f32 %v3115_v40, %v5704_v24 }
 0x5b6   : >> { %v3422_v46 = vsub.f32 %v2972_v7, %v3372_v45  ;;  %v3431_v12 = vsub.f32 %v2981_v21, %v3381_v29  ;;  %v2980_v21 = vld [vmem:[#allocation3 + $0x60] sm:$0xff]  ;;  %v2993_v45 = vld [vmem:[#allocation3 + $0xc8] sm:$0xff] }
 0x5b7   : >> { %v3059_v4 = vpop.permute.xlu1 %3058  ;;  %v3129_v56 = vpop.permute.xlu0 %3128 }
 0x5b8   : >> { %3472 = vst.msk [vmem:[#allocation3 + $0x20] sm:$0xff] %vm132_vm7, %v3422_v46  ;;  %3481 = vst.msk [vmem:[#allocation3 + $0x68] sm:$0xff] %vm132_vm7, %v3431_v12  ;;  %v3373_v41 = vmul.f32 %v3059_v4, %v5704_v24  ;;  %v3383_v54 = vmul.f32 %v3129_v56, %v5704_v24  ;;  %v2982_v56 = vld [vmem:[#allocation3 + $0x70] sm:$0xff] }
 0x5ba   : >> { %v3423_v22 = vsub.f32 %v2973_v23, %v3373_v41  ;;  %v3433_v5 = vsub.f32 %v2983_v39, %v3383_v54 }
 0x5bb   : >> { %v3066_v2 = vpop.permute.xlu1 %3065  ;;  %v3143_v53 = vpop.permute.xlu0 %3142 }
 0x5bc   : >> { %3473 = vst.msk [vmem:[#allocation3 + $0x28] sm:$0xff] %vm132_vm7, %v3423_v22  ;;  %3483 = vst.msk [vmem:[#allocation3 + $0x78] sm:$0xff] %vm132_vm7, %v3433_v5  ;;  %v3374_v38 = vmul.f32 %v3066_v2, %v5704_v24  ;;  %v3385_v17 = vmul.f32 %v3143_v53, %v5704_v24  ;;  %v2995_v2 = vld [vmem:[#allocation3 + $0xd8] sm:$0xff] }
 0x5be   : >> { %v3424_v34 = vsub.f32 %v2974_v1, %v3374_v38  ;;  %v3435_v27 = vsub.f32 %v2985_v0, %v3385_v17 }
 0x5bf   : >> { %v3073_v48 = vpop.permute.xlu1 %3072  ;;  %v3157_v36 = vpop.permute.xlu0 %3156 }
 0x5c0   : >> { %3474 = vst.msk [vmem:[#allocation3 + $0x30] sm:$0xff] %vm132_vm7, %v3424_v34  ;;  %3485 = vst.msk [vmem:[#allocation3 + $0x88] sm:$0xff] %vm132_vm7, %v3435_v27  ;;  %v3375_v50 = vmul.f32 %v3073_v48, %v5704_v24  ;;  %v3387_v63 = vmul.f32 %v3157_v36, %v5704_v24  ;;  %v2984_v27 = vld [vmem:[#allocation3 + $0x80] sm:$0xff] }
 0x5c2   : >> { %v3425_v43 = vsub.f32 %v2975_v47, %v3375_v50  ;;  %v3437_v44 = vsub.f32 %v2987_v8, %v3387_v63  ;;  %v2997_v63 = vld [vmem:[#allocation3 + $0xe8] sm:$0xff] }
 0x5c3   : >> { %v3080_v28 = vpop.permute.xlu1 %3079  ;;  %v3171_v33 = vpop.permute.xlu0 %3170 }
 0x5c4   : >> { %3475 = vst.msk [vmem:[#allocation3 + $0x38] sm:$0xff] %vm132_vm7, %v3425_v43  ;;  %3487 = vst.msk [vmem:[#allocation3 + $0x98] sm:$0xff] %vm132_vm7, %v3437_v44  ;;  %v3376_v59 = vmul.f32 %v3080_v28, %v5704_v24  ;;  %v3389_v9 = vmul.f32 %v3171_v33, %v5704_v24  ;;  %v2986_v33 = vld [vmem:[#allocation3 + $0x90] sm:$0xff] }
 0x5c6   : >> { %v3426_v18 = vsub.f32 %v2976_v57, %v3376_v59  ;;  %v3439_v51 = vsub.f32 %v2989_v6, %v3389_v9 }
 0x5c7   : >> { %v3094_v60 = vpop.permute.xlu1 %3093  ;;  %v3185_v25 = vpop.permute.xlu0 %3184 }
 0x5c8   : >> { %3476 = vst.msk [vmem:[#allocation3 + $0x40] sm:$0xff] %vm132_vm7, %v3426_v18  ;;  %3489 = vst.msk [vmem:[#allocation3 + $0xa8] sm:$0xff] %vm132_vm7, %v3439_v51  ;;  %v3378_v37 = vmul.f32 %v3094_v60, %v5704_v24  ;;  %v3391_v11 = vmul.f32 %v3185_v25, %v5704_v24  ;;  %v2999_v60 = vld [vmem:[#allocation3 + $0xf8] sm:$0xff] }
 0x5ca   : >> { %v3428_v7 = vsub.f32 %v2978_v49, %v3378_v37  ;;  %v3441_v42 = vsub.f32 %v2991_v62, %v3391_v11 }
 0x5cb   : >> { %v3108_v40 = vpop.permute.xlu1 %3107  ;;  %v3199_v29 = vpop.permute.xlu0 %3198 }
 0x5cc   : >> { %3478 = vst.msk [vmem:[#allocation3 + $0x50] sm:$0xff] %vm132_vm7, %v3428_v7  ;;  %3491 = vst.msk [vmem:[#allocation3 + $0xb8] sm:$0xff] %vm132_vm7, %v3441_v42  ;;  %v3380_v46 = vmul.f32 %v3108_v40, %v5704_v24  ;;  %v3393_v12 = vmul.f32 %v3199_v29, %v5704_v24  ;;  %v2988_v42 = vld [vmem:[#allocation3 + $0xa0] sm:$0xff] }
 0x5ce   : >> { %v3430_v23 = vsub.f32 %v2980_v21, %v3380_v46  ;;  %v3443_v4 = vsub.f32 %v2993_v45, %v3393_v12  ;;  %v3001_v12 = vld [vmem:[#allocation3 + $0x108] sm:$0xff] }
 0x5cf   : >> { %v3122_v41 = vpop.permute.xlu1 %3121  ;;  %v3213_v0 = vpop.permute.xlu0 %3212 }
 0x5d0   : >> { %3480 = vst.msk [vmem:[#allocation3 + $0x60] sm:$0xff] %vm132_vm7, %v3430_v23  ;;  %3493 = vst.msk [vmem:[#allocation3 + $0xc8] sm:$0xff] %vm132_vm7, %v3443_v4  ;;  %v3382_v1 = vmul.f32 %v3122_v41, %v5704_v24  ;;  %v3395_v53 = vmul.f32 %v3213_v0, %v5704_v24 }
 0x5d2   : >> { %v2934_v39 = vpop.f32.mrb[0].mxu1  ;;  %v3432_v38 = vsub.f32 %v2982_v56, %v3382_v1  ;;  %v3445_v34 = vsub.f32 %v2995_v2, %v3395_v53  ;;  %v3003_v53 = vld [vmem:[#allocation3 + $0x118] sm:$0xff] }
 0x5d3   : >> { %v4344_v54 = vpop.f32.mrb[1].mxu1  ;;  %v3571_v22 = vrot.slane %v2934_v39, %v4685_v35  ;;  %v3578_v5 = vrot.slane %v2934_v39, %v6319_v3  ;;  %v3136_v47 = vpop.permute.xlu1 %3135  ;;  %v3585_v48 = vrot.slane %v2934_v39, %v6318_v13  ;;  %v3592_v8 = vrot.slane %v2934_v39, %v6320_v52 }
 0x5d4   : >> { %3482 = vst.msk [vmem:[#allocation3 + $0x70] sm:$0xff] %vm132_vm7, %v3432_v38  ;;  %v3384_v50 = vmul.f32 %v3136_v47, %v5704_v24  ;;  %v3227_v43 = vpop.permute.xlu0 %3226  ;;  %3495 = vst.msk [vmem:[#allocation3 + $0xd8] sm:$0xff] %vm132_vm7, %v3445_v34  ;;  %v3599_v9 = vrot.slane %v2934_v39, %v6321_v10  ;;  %v3606_v18 = vrot.slane %v2934_v39, %v6322_v15 }
 0x5d5   : >> { %3573 = vbcast.lane.b32.xlu1 %v3571_v22, 256  ;;  %3580 = vbcast.lane.b32.xlu0 %v3578_v5, 256  ;;  %v3397_v44 = vmul.f32 %v3227_v43, %v5704_v24  ;;  %v3613_v40 = vrot.slane %v2934_v39, %v6324_v20  ;;  %v3620_v45 = vrot.slane %v2934_v39, %v6323_v16  ;;  %v2990_v5 = vld [vmem:[#allocation3 + $0xb0] sm:$0xff] }
 0x5d6   : >> { %v5859_v17 = vpop.f32.mrb[2].mxu1  ;;  %v3434_v57 = vsub.f32 %v2984_v27, %v3384_v50 }
 0x5d7   : >> { %v4347_v36 = vpop.f32.mrb[3].mxu1  ;;  %v3447_v6 = vsub.f32 %v2997_v63, %v3397_v44  ;;  %v3150_v59 = vpop.permute.xlu1 %3149  ;;  %v3627_v56 = vrot.slane %v5859_v17, %v4685_v35  ;;  %v3634_v41 = vrot.slane %v5859_v17, %v6319_v3  ;;  %v3641_v50 = vrot.slane %v5859_v17, %v6318_v13 }
 0x5d8   : >> { %3484 = vst.msk [vmem:[#allocation3 + $0x80] sm:$0xff] %vm132_vm7, %v3434_v57  ;;  %v3386_v49 = vmul.f32 %v3150_v59, %v5704_v24  ;;  %v3241_v62 = vpop.permute.xlu0 %3240  ;;  %v3648_v63 = vrot.slane %v5859_v17, %v6320_v52  ;;  %v3005_v57 = vld [vmem:[#allocation3 + $0x128] sm:$0xff] }
 0x5d9   : >> { %3587 = vbcast.lane.b32.xlu1 %v3585_v48, 256  ;;  %3594 = vbcast.lane.b32.xlu0 %v3592_v8, 256  ;;  %3497 = vst.msk [vmem:[#allocation3 + $0xe8] sm:$0xff] %vm132_vm7, %v3447_v6  ;;  %v3399_v25 = vmul.f32 %v3241_v62, %v5704_v24  ;;  %v2992_v8 = vld [vmem:[#allocation3 + $0xc0] sm:$0xff]  ;;  %v3662_v62 = vrot.slane %v5859_v17, %v6322_v15 }
 0x5da   : >> { %v5867_v28 = vpop.f32.mrb[4].mxu1  ;;  %v3436_v37 = vsub.f32 %v2986_v33, %v3386_v49 }
 0x5db   : >> { %v4350_v51 = vpop.f32.mrb[5].mxu1  ;;  %v3449_v7 = vsub.f32 %v2999_v60, %v3399_v25  ;;  %v3164_v21 = vpop.permute.xlu1 %3163  ;;  %v3655_v60 = vrot.slane %v5859_v17, %v6321_v10 }
 0x5dc   : >> { %3486 = vst.msk [vmem:[#allocation3 + $0x90] sm:$0xff] %vm132_vm7, %v3436_v37  ;;  %v3388_v46 = vmul.f32 %v3164_v21, %v5704_v24  ;;  %v3255_v23 = vpop.permute.xlu0 %3254  ;;  %v2994_v51 = vld [vmem:[#allocation3 + $0xd0] sm:$0xff] }
 0x5dd   : >> { %3601 = vbcast.lane.b32.xlu1 %v3599_v9, 256  ;;  %3608 = vbcast.lane.b32.xlu0 %v3606_v18, 256  ;;  %3499 = vst.msk [vmem:[#allocation3 + $0xf8] sm:$0xff] %vm132_vm7, %v3449_v7  ;;  %v3401_v4 = vmul.f32 %v3255_v23, %v5704_v24  ;;  %v3007_v7 = vld [vmem:[#allocation3 + $0x138] sm:$0xff]  ;;  %v3676_v23 = vrot.slane %v5859_v17, %v6323_v16 }
 0x5de   : >> { %v5875_v11 = vpop.f32.mrb[6].mxu1  ;;  %v3438_v39 = vsub.f32 %v2988_v42, %v3388_v46 }
 0x5df   : >> { %v4353_v29 = vpop.f32.mrb[7].mxu1  ;;  %v3451_v22 = vsub.f32 %v3001_v12, %v3401_v4  ;;  %v3178_v1 = vpop.permute.xlu1 %3177  ;;  %v3669_v12 = vrot.slane %v5859_v17, %v6324_v20 }
 0x5e0   : >> { %3488 = vst.msk [vmem:[#allocation3 + $0xa0] sm:$0xff] %vm132_vm7, %v3438_v39  ;;  %v3390_v0 = vmul.f32 %v3178_v1, %v5704_v24  ;;  %v3269_v38 = vpop.permute.xlu0 %3268  ;;  %v2996_v29 = vld [vmem:[#allocation3 + $0xe0] sm:$0xff] }
 0x5e1   : >> { %3615 = vbcast.lane.b32.xlu1 %v3613_v40, 256  ;;  %3622 = vbcast.lane.b32.xlu0 %v3620_v45, 256  ;;  %3501 = vst.msk [vmem:[#allocation3 + $0x108] sm:$0xff] %vm132_vm7, %v3451_v22  ;;  %v3403_v34 = vmul.f32 %v3269_v38, %v5704_v24  ;;  %v3683_v22 = vrot.slane %v5867_v28, %v4685_v35  ;;  %v3011_v38 = vld [vmem:[#allocation3 + $0x158] sm:$0xff] }
 0x5e2   : >> { %v5887_v54 = vpop.f32.mrb[8].mxu1  ;;  %v3440_v27 = vsub.f32 %v2990_v5, %v3390_v0  ;;  %v3690_v5 = vrot.slane %v5867_v28, %v6319_v3 }
 0x5e3   : >> { %v4356_v2 = vpop.f32.mrb[9].mxu1  ;;  %v3453_v48 = vsub.f32 %v3003_v53, %v3403_v34  ;;  %v3192_v36 = vpop.permute.xlu1 %3191 }
 0x5e4   : >> { %3490 = vst.msk [vmem:[#allocation3 + $0xb0] sm:$0xff] %vm132_vm7, %v3440_v27  ;;  %v3392_v44 = vmul.f32 %v3192_v36, %v5704_v24  ;;  %v3283_v6 = vpop.permute.xlu0 %3282  ;;  %v2998_v2 = vld [vmem:[#allocation3 + $0xf0] sm:$0xff]  ;;  %v3000_v36 = vld [vmem:[#allocation3 + $0x100] sm:$0xff] }
 0x5e5   : >> { %3629 = vbcast.lane.b32.xlu1 %v3627_v56, 256  ;;  %3636 = vbcast.lane.b32.xlu0 %v3634_v41, 256  ;;  %3503 = vst.msk [vmem:[#allocation3 + $0x118] sm:$0xff] %vm132_vm7, %v3453_v48  ;;  %v3405_v33 = vmul.f32 %v3283_v6, %v5704_v24  ;;  %v3009_v56 = vld [vmem:[#allocation3 + $0x148] sm:$0xff] }
 0x5e6   : >> { %v5893_v47 = vpop.f32.mrb[10].mxu1  ;;  %v3442_v59 = vsub.f32 %v2992_v8, %v3392_v44 }
 0x5e7   : >> { %v4359_v43 = vpop.f32.mrb[11].mxu1  ;;  %v3455_v18 = vsub.f32 %v3005_v57, %v3405_v33  ;;  %v3206_v49 = vpop.permute.xlu1 %3205  ;;  %v3013_v57 = vld [vmem:[#allocation3 + $0x168] sm:$0xff] }
 0x5e8   : >> { %3492 = vst.msk [vmem:[#allocation3 + $0xc0] sm:$0xff] %vm132_vm7, %v3442_v59  ;;  %v3394_v37 = vmul.f32 %v3206_v49, %v5704_v24  ;;  %v3297_v42 = vpop.permute.xlu0 %3296  ;;  %v3704_v43 = vrot.slane %v5867_v28, %v6320_v52 }
 0x5e9   : >> { %3643 = vbcast.lane.b32.xlu1 %v3641_v50, 256  ;;  %3650 = vbcast.lane.b32.xlu0 %v3648_v63, 256  ;;  %3505 = vst.msk [vmem:[#allocation3 + $0x128] sm:$0xff] %vm132_vm7, %v3455_v18  ;;  %v3407_v21 = vmul.f32 %v3297_v42, %v5704_v24  ;;  %v3697_v63 = vrot.slane %v5867_v28, %v6318_v13 }
 0x5ea   : >> { %v5903_v9 = vpop.f32.mrb[12].mxu1  ;;  %v3444_v40 = vsub.f32 %v2994_v51, %v3394_v37  ;;  %v3002_v51 = vld [vmem:[#allocation3 + $0x110] sm:$0xff]  ;;  %v3015_v37 = vld [vmem:[#allocation3 + $0x178] sm:$0xff] }
 0x5eb   : >> { %v4362_v25 = vpop.f32.mrb[13].mxu1  ;;  %v3457_v45 = vsub.f32 %v3007_v7, %v3407_v21  ;;  %v3220_v46 = vpop.permute.xlu1 %3219 }
 0x5ec   : >> { %3494 = vst.msk [vmem:[#allocation3 + $0xd0] sm:$0xff] %vm132_vm7, %v3444_v40  ;;  %v3396_v4 = vmul.f32 %v3220_v46, %v5704_v24  ;;  %v3311_v41 = vpop.permute.xlu0 %3310  ;;  %v3725_v46 = vrot.slane %v5867_v28, %v6324_v20 }
 0x5ed   : >> { %3657 = vbcast.lane.b32.xlu1 %v3655_v60, 256  ;;  %3664 = vbcast.lane.b32.xlu0 %v3662_v62, 256  ;;  %3507 = vst.msk [vmem:[#allocation3 + $0x138] sm:$0xff] %vm132_vm7, %v3457_v45  ;;  %v3409_v39 = vmul.f32 %v3311_v41, %v5704_v24  ;;  %v3711_v60 = vrot.slane %v5867_v28, %v6321_v10  ;;  %v3004_v45 = vld [vmem:[#allocation3 + $0x120] sm:$0xff] }
 0x5ee   : >> { %v3446_v1 = vsub.f32 %v2996_v29, %v3396_v4  ;;  %v3718_v62 = vrot.slane %v5867_v28, %v6322_v15  ;;  %v3017_v4 = vld [vmem:[#allocation3 + $0x188] sm:$0xff] }
 0x5ef   : >> { %v3459_v17 = vsub.f32 %v3009_v56, %v3409_v39  ;;  %v3234_v0 = vpop.permute.xlu1 %3233  ;;  %v3739_v39 = vrot.slane %v5875_v11, %v4685_v35 }
 0x5f0   : >> { %3496 = vst.msk [vmem:[#allocation3 + $0xe0] sm:$0xff] %vm132_vm7, %v3446_v1  ;;  %v3398_v53 = vmul.f32 %v3234_v0, %v5704_v24  ;;  %v3325_v34 = vpop.permute.xlu0 %3324  ;;  %v3006_v1 = vld [vmem:[#allocation3 + $0x130] sm:$0xff] }
 0x5f1   : >> { %3671 = vbcast.lane.b32.xlu1 %v3669_v12, 256  ;;  %3678 = vbcast.lane.b32.xlu0 %v3676_v23, 256  ;;  %3509 = vst.msk [vmem:[#allocation3 + $0x148] sm:$0xff] %vm132_vm7, %v3459_v17  ;;  %v3411_v27 = vmul.f32 %v3325_v34, %v5704_v24  ;;  %v3732_v12 = vrot.slane %v5867_v28, %v6323_v16 }
 0x5f2   : >> { %v3448_v48 = vsub.f32 %v2998_v2, %v3398_v53  ;;  %v3008_v53 = vld [vmem:[#allocation3 + $0x140] sm:$0xff]  ;;  %v3753_v34 = vrot.slane %v5875_v11, %v6318_v13 }
 0x5f3   : >> { %v3461_v8 = vsub.f32 %v3011_v38, %v3411_v27  ;;  %v3248_v50 = vpop.permute.xlu1 %3247  ;;  %v3760_v27 = vrot.slane %v5875_v11, %v6320_v52 }
 0x5f4   : >> { %3498 = vst.msk [vmem:[#allocation3 + $0xf0] sm:$0xff] %vm132_vm7, %v3448_v48  ;;  %v3400_v44 = vmul.f32 %v3248_v50, %v5704_v24  ;;  %v3339_v6 = vpop.permute.xlu0 %3338 }
 0x5f5   : >> { %3685 = vbcast.lane.b32.xlu1 %v3683_v22, 256  ;;  %3692 = vbcast.lane.b32.xlu0 %v3690_v5, 256  ;;  %3511 = vst.msk [vmem:[#allocation3 + $0x158] sm:$0xff] %vm132_vm7, %v3461_v8  ;;  %v3413_v33 = vmul.f32 %v3339_v6, %v5704_v24  ;;  %v3746_v22 = vrot.slane %v5875_v11, %v6319_v3  ;;  %v3012_v6 = vld [vmem:[#allocation3 + $0x160] sm:$0xff] }
 0x5f6   : >> { %v3450_v59 = vsub.f32 %v3000_v36, %v3400_v44  ;;  %v3010_v36 = vld [vmem:[#allocation3 + $0x150] sm:$0xff] }
 0x5f7   : >> { %v3463_v18 = vsub.f32 %v3013_v57, %v3413_v33  ;;  %v3262_v49 = vpop.permute.xlu1 %3261 }
 0x5f8   : >> { %3500 = vst.msk [vmem:[#allocation3 + $0x100] sm:$0xff] %vm132_vm7, %v3450_v59  ;;  %v3402_v25 = vmul.f32 %v3262_v49, %v5704_v24  ;;  %v3353_v7 = vpop.permute.xlu0 %3352  ;;  %v3781_v59 = vrot.slane %v5875_v11, %v6324_v20  ;;  %v3795_v49 = vrot.slane %v5887_v54, %v4685_v35 }
 0x5f9   : >> { %3699 = vbcast.lane.b32.xlu1 %v3697_v63, 256  ;;  %3706 = vbcast.lane.b32.xlu0 %v3704_v43, 256  ;;  %3513 = vst.msk [vmem:[#allocation3 + $0x168] sm:$0xff] %vm132_vm7, %v3463_v18  ;;  %v3415_v42 = vmul.f32 %v3353_v7, %v5704_v24  ;;  %v3767_v63 = vrot.slane %v5875_v11, %v6321_v10 }
 0x5fa   : >> { %v3452_v21 = vsub.f32 %v3002_v51, %v3402_v25  ;;  %v3774_v43 = vrot.slane %v5875_v11, %v6322_v15  ;;  %v3788_v18 = vrot.slane %v5875_v11, %v6323_v16  ;;  %v3014_v25 = vld [vmem:[#allocation3 + $0x170] sm:$0xff] }
 0x5fb   : >> { %v3465_v40 = vsub.f32 %v3015_v37, %v3415_v42  ;;  %v3276_v29 = vpop.permute.xlu1 %3275  ;;  %v3016_v42 = vld [vmem:[#allocation3 + $0x180] sm:$0xff] }
 0x5fc   : >> { %3502 = vst.msk [vmem:[#allocation3 + $0x110] sm:$0xff] %vm132_vm7, %v3452_v21  ;;  %v3404_v23 = vmul.f32 %v3276_v29, %v5704_v24  ;;  %v3367_v56 = vpop.permute.xlu0 %3366 }
 0x5fd   : >> { %3713 = vbcast.lane.b32.xlu1 %v3711_v60, 256  ;;  %3720 = vbcast.lane.b32.xlu0 %v3718_v62, 256  ;;  %3515 = vst.msk [vmem:[#allocation3 + $0x178] sm:$0xff] %vm132_vm7, %v3465_v40  ;;  %v3417_v41 = vmul.f32 %v3367_v56, %v5704_v24  ;;  %v3802_v60 = vrot.slane %v5887_v54, %v6319_v3 }
 0x5fe   : >> { %v3454_v5 = vsub.f32 %v3004_v45, %v3404_v23  ;;  %v3809_v40 = vrot.slane %v5887_v54, %v6318_v13  ;;  %v3816_v45 = vrot.slane %v5887_v54, %v6320_v52  ;;  %v3830_v23 = vrot.slane %v5887_v54, %v6322_v15 }
 0x5ff   : >> { %v3467_v28 = vsub.f32 %v3017_v4, %v3417_v41  ;;  %v3290_v17 = vpop.permute.xlu1 %3289  ;;  %v3837_v4 = vrot.slane %v5887_v54, %v6324_v20  ;;  %v3844_v56 = vrot.slane %v5887_v54, %v6323_v16  ;;  %v3858_v41 = vrot.slane %v5893_v47, %v6319_v3 }
 0x600   : >> { %3504 = vst.msk [vmem:[#allocation3 + $0x120] sm:$0xff] %vm132_vm7, %v3454_v5  ;;  %v3406_v2 = vmul.f32 %v3290_v17, %v5704_v24  ;;  %v3886_v5 = vrot.slane %v5893_v47, %v6322_v15  ;;  %v3907_v17 = vrot.slane %v5903_v9, %v4685_v35 }
 0x601   : >> { %3727 = vbcast.lane.b32.xlu1 %v3725_v46, 256  ;;  %3734 = vbcast.lane.b32.xlu0 %v3732_v12, 256  ;;  %3517 = vst.msk [vmem:[#allocation3 + $0x188] sm:$0xff] %vm132_vm7, %v3467_v28  ;;  %v3823_v12 = vrot.slane %v5887_v54, %v6321_v10  ;;  %v3879_v54 = vrot.slane %v5893_v47, %v6321_v10 }
 0x602   : >> { %v3456_v0 = vsub.f32 %v3006_v1, %v3406_v2  ;;  %v3893_v28 = vrot.slane %v5893_v47, %v6324_v20  ;;  %v3900_v1 = vrot.slane %v5893_v47, %v6323_v16  ;;  %v3914_v2 = vrot.slane %v5903_v9, %v6319_v3 }
 0x603   : >> { %v3304_v38 = vpop.permute.xlu1 %3303 }
 0x604   : >> { %3506 = vst.msk [vmem:[#allocation3 + $0x130] sm:$0xff] %vm132_vm7, %v3456_v0  ;;  %v3408_v48 = vmul.f32 %v3304_v38, %v5704_v24  ;;  %v3518_v0 = vld [vmem:[#allocation4] sm:$0xff]  ;;  %v3519_v38 = vld [vmem:[#allocation4 + $0x8] sm:$0xff] }
 0x605   : >> { %3741 = vbcast.lane.b32.xlu1 %v3739_v39, 256  ;;  %3748 = vbcast.lane.b32.xlu0 %v3746_v22, 256  ;;  %v3865_v39 = vrot.slane %v5893_v47, %v6318_v13  ;;  %v3872_v22 = vrot.slane %v5893_v47, %v6320_v52 }
 0x606   : >> { %v3458_v8 = vsub.f32 %v3008_v53, %v3408_v48 }
 0x607   : >> { %v3318_v50 = vpop.permute.xlu1 %3317 }
 0x608   : >> { %3508 = vst.msk [vmem:[#allocation3 + $0x140] sm:$0xff] %vm132_vm7, %v3458_v8  ;;  %v3410_v44 = vmul.f32 %v3318_v50, %v5704_v24 }
 0x609   : >> { %3755 = vbcast.lane.b32.xlu1 %v3753_v34, 256  ;;  %3762 = vbcast.lane.b32.xlu0 %v3760_v27, 256 }
 0x60a   : >> { %v3460_v57 = vsub.f32 %v3010_v36, %v3410_v44  ;;  %v3520_v36 = vld [vmem:[#allocation4 + $0x10] sm:$0xff] }
 0x60b   : >> { %v3332_v33 = vpop.permute.xlu1 %3331 }
 0x60c   : >> { %3510 = vst.msk [vmem:[#allocation3 + $0x150] sm:$0xff] %vm132_vm7, %v3460_v57  ;;  %v3412_v51 = vmul.f32 %v3332_v33, %v5704_v24 }
 0x60d   : >> { %3769 = vbcast.lane.b32.xlu1 %v3767_v63, 256  ;;  %3776 = vbcast.lane.b32.xlu0 %v3774_v43, 256  ;;  %v3521_v63 = vld [vmem:[#allocation4 + $0x18] sm:$0xff] }
 0x60e   : >> { %v3462_v62 = vsub.f32 %v3012_v6, %v3412_v51  ;;  %v3522_v6 = vld [vmem:[#allocation4 + $0x20] sm:$0xff] }
 0x60f   : >> { %v3346_v37 = vpop.permute.xlu1 %3345 }
 0x610   : >> { %3512 = vst.msk [vmem:[#allocation3 + $0x160] sm:$0xff] %vm132_vm7, %v3462_v62  ;;  %v3414_v7 = vmul.f32 %v3346_v37, %v5704_v24 }
 0x611   : >> { %3783 = vbcast.lane.b32.xlu1 %v3781_v59, 256  ;;  %3790 = vbcast.lane.b32.xlu0 %v3788_v18, 256  ;;  %v3523_v59 = vld [vmem:[#allocation4 + $0x28] sm:$0xff] }
 0x612   : >> { %v3464_v11 = vsub.f32 %v3014_v25, %v3414_v7  ;;  %v3524_v25 = vld [vmem:[#allocation4 + $0x30] sm:$0xff]  ;;  %v3525_v7 = vld [vmem:[#allocation4 + $0x38] sm:$0xff] }
 0x613   : >> { %v3360_v21 = vpop.permute.xlu1 %3359 }
 0x614   : >> { %3514 = vst.msk [vmem:[#allocation3 + $0x170] sm:$0xff] %vm132_vm7, %v3464_v11  ;;  %v3416_v29 = vmul.f32 %v3360_v21, %v5704_v24  ;;  %v3851_v24 = vrot.slane %v5893_v47, %v4685_v35 }
 0x615   : >> { %3797 = vbcast.lane.b32.xlu1 %v3795_v49, 256  ;;  %3804 = vbcast.lane.b32.xlu0 %v3802_v60, 256 }
 0x616   : >> { %v3466_v46 = vsub.f32 %v3016_v42, %v3416_v29  ;;  %v3526_v29 = vld [vmem:[#allocation4 + $0x40] sm:$0xff] }
 0x618   : >> { %3516 = vst.msk [vmem:[#allocation3 + $0x180] sm:$0xff] %vm132_vm7, %v3466_v46 }
 0x619   : >> { %3811 = vbcast.lane.b32.xlu1 %v3809_v40, 256  ;;  %3818 = vbcast.lane.b32.xlu0 %v3816_v45, 256 }
 0x61d   : >> { %3825 = vbcast.lane.b32.xlu1 %v3823_v12, 256  ;;  %3832 = vbcast.lane.b32.xlu0 %v3830_v23, 256  ;;  %v3527_v12 = vld [vmem:[#allocation4 + $0x48] sm:$0xff] }
 0x621   : >> { %3839 = vbcast.lane.b32.xlu1 %v3837_v4, 256  ;;  %3846 = vbcast.lane.b32.xlu0 %v3844_v56, 256 }
 0x625   : >> { %3853 = vbcast.lane.b32.xlu1 %v3851_v24, 256  ;;  %3860 = vbcast.lane.b32.xlu0 %v3858_v41, 256 }
 0x629   : >> { %3867 = vbcast.lane.b32.xlu1 %v3865_v39, 256  ;;  %3874 = vbcast.lane.b32.xlu0 %v3872_v22, 256  ;;  %v3528_v39 = vld [vmem:[#allocation4 + $0x50] sm:$0xff] }
 0x62d   : >> { %3881 = vbcast.lane.b32.xlu1 %v3879_v54, 256  ;;  %3888 = vbcast.lane.b32.xlu0 %v3886_v5, 256  ;;  %v3529_v54 = vld [vmem:[#allocation4 + $0x58] sm:$0xff] }
 0x631   : >> { %3895 = vbcast.lane.b32.xlu1 %v3893_v28, 256  ;;  %3902 = vbcast.lane.b32.xlu0 %v3900_v1, 256 }
 0x635   : >> { %3909 = vbcast.lane.b32.xlu1 %v3907_v17, 256  ;;  %3916 = vbcast.lane.b32.xlu0 %v3914_v2, 256 }
 0x647   : >> { %v3574_v53 = vpop.permute.xlu1 %3573  ;;  %v3581_v34 = vpop.permute.xlu0 %3580 }
 0x648   : >> { %v3918_v27 = vmul.f32 %v3574_v53, %v5678_v31  ;;  %v3919_v48 = vmul.f32 %v3581_v34, %v5678_v31 }
 0x64a   : >> { %v3968_v8 = vsub.f32 %v3518_v0, %v3918_v27  ;;  %v3969_v47 = vsub.f32 %v3519_v38, %v3919_v48  ;;  %v3530_v0 = vld [vmem:[#allocation4 + $0x60] sm:$0xff]  ;;  %v3531_v38 = vld [vmem:[#allocation4 + $0x68] sm:$0xff] }
 0x64b   : >> { %v3588_v50 = vpop.permute.xlu1 %3587  ;;  %v3595_v43 = vpop.permute.xlu0 %3594 }
 0x64c   : >> { %4018 = vst.msk [vmem:[#allocation4] sm:$0xff] %vm132_vm7, %v3968_v8  ;;  %4019 = vst.msk [vmem:[#allocation4 + $0x8] sm:$0xff] %vm132_vm7, %v3969_v47  ;;  %v3920_v3 = vmul.f32 %v3588_v50, %v5678_v31  ;;  %v3921_v9 = vmul.f32 %v3595_v43, %v5678_v31 }
 0x64e   : >> { %v3970_v44 = vsub.f32 %v3520_v36, %v3920_v3  ;;  %v3971_v57 = vsub.f32 %v3521_v63, %v3921_v9  ;;  %v3532_v36 = vld [vmem:[#allocation4 + $0x70] sm:$0xff]  ;;  %v3533_v63 = vld [vmem:[#allocation4 + $0x78] sm:$0xff] }
 0x64f   : >> { %v3602_v33 = vpop.permute.xlu1 %3601  ;;  %v3609_v18 = vpop.permute.xlu0 %3608 }
 0x650   : >> { %4020 = vst.msk [vmem:[#allocation4 + $0x10] sm:$0xff] %vm132_vm7, %v3970_v44  ;;  %4021 = vst.msk [vmem:[#allocation4 + $0x18] sm:$0xff] %vm132_vm7, %v3971_v57  ;;  %v3922_v51 = vmul.f32 %v3602_v33, %v5678_v31  ;;  %v3923_v49 = vmul.f32 %v3609_v18, %v5678_v31 }
 0x652   : >> { %v3972_v60 = vsub.f32 %v3522_v6, %v3922_v51  ;;  %v3973_v62 = vsub.f32 %v3523_v59, %v3923_v49  ;;  %v3534_v6 = vld [vmem:[#allocation4 + $0x80] sm:$0xff]  ;;  %v3535_v59 = vld [vmem:[#allocation4 + $0x88] sm:$0xff] }
 0x653   : >> { %v3616_v37 = vpop.permute.xlu1 %3615  ;;  %v3623_v11 = vpop.permute.xlu0 %3622 }
 0x654   : >> { %4022 = vst.msk [vmem:[#allocation4 + $0x20] sm:$0xff] %vm132_vm7, %v3972_v60  ;;  %4023 = vst.msk [vmem:[#allocation4 + $0x28] sm:$0xff] %vm132_vm7, %v3973_v62  ;;  %v3924_v42 = vmul.f32 %v3616_v37, %v5678_v31  ;;  %v3925_v21 = vmul.f32 %v3623_v11, %v5678_v31 }
 0x656   : >> { %v3974_v40 = vsub.f32 %v3524_v25, %v3924_v42  ;;  %v3975_v45 = vsub.f32 %v3525_v7, %v3925_v21  ;;  %v3536_v25 = vld [vmem:[#allocation4 + $0x90] sm:$0xff]  ;;  %v3537_v7 = vld [vmem:[#allocation4 + $0x98] sm:$0xff] }
 0x657   : >> { %v3630_v46 = vpop.permute.xlu1 %3629  ;;  %v3637_v23 = vpop.permute.xlu0 %3636 }
 0x658   : >> { %4024 = vst.msk [vmem:[#allocation4 + $0x30] sm:$0xff] %vm132_vm7, %v3974_v40  ;;  %4025 = vst.msk [vmem:[#allocation4 + $0x38] sm:$0xff] %vm132_vm7, %v3975_v45  ;;  %v3926_v4 = vmul.f32 %v3630_v46, %v5678_v31  ;;  %v3927_v56 = vmul.f32 %v3637_v23, %v5678_v31 }
 0x65a   : >> { %v3976_v24 = vsub.f32 %v3526_v29, %v3926_v4  ;;  %v3977_v41 = vsub.f32 %v3527_v12, %v3927_v56  ;;  %v3538_v29 = vld [vmem:[#allocation4 + $0xa0] sm:$0xff]  ;;  %v3539_v12 = vld [vmem:[#allocation4 + $0xa8] sm:$0xff] }
 0x65b   : >> { %v3644_v22 = vpop.permute.xlu1 %3643  ;;  %v3651_v5 = vpop.permute.xlu0 %3650 }
 0x65c   : >> { %4026 = vst.msk [vmem:[#allocation4 + $0x40] sm:$0xff] %vm132_vm7, %v3976_v24  ;;  %4027 = vst.msk [vmem:[#allocation4 + $0x48] sm:$0xff] %vm132_vm7, %v3977_v41  ;;  %v3928_v28 = vmul.f32 %v3644_v22, %v5678_v31  ;;  %v3929_v1 = vmul.f32 %v3651_v5, %v5678_v31 }
 0x65e   : >> { %v3978_v17 = vsub.f32 %v3528_v39, %v3928_v28  ;;  %v3979_v2 = vsub.f32 %v3529_v54, %v3929_v1  ;;  %v3540_v39 = vld [vmem:[#allocation4 + $0xb0] sm:$0xff]  ;;  %v3541_v54 = vld [vmem:[#allocation4 + $0xb8] sm:$0xff] }
 0x65f   : >> { %v3658_v53 = vpop.permute.xlu1 %3657  ;;  %v3665_v34 = vpop.permute.xlu0 %3664 }
 0x660   : >> { %4028 = vst.msk [vmem:[#allocation4 + $0x50] sm:$0xff] %vm132_vm7, %v3978_v17  ;;  %4029 = vst.msk [vmem:[#allocation4 + $0x58] sm:$0xff] %vm132_vm7, %v3979_v2  ;;  %v3930_v27 = vmul.f32 %v3658_v53, %v5678_v31  ;;  %v3931_v48 = vmul.f32 %v3665_v34, %v5678_v31 }
 0x662   : >> { %v3980_v8 = vsub.f32 %v3530_v0, %v3930_v27  ;;  %v3981_v47 = vsub.f32 %v3531_v38, %v3931_v48  ;;  %v3542_v0 = vld [vmem:[#allocation4 + $0xc0] sm:$0xff]  ;;  %v3543_v38 = vld [vmem:[#allocation4 + $0xc8] sm:$0xff] }
 0x663   : >> { %v3672_v50 = vpop.permute.xlu1 %3671  ;;  %v3679_v43 = vpop.permute.xlu0 %3678 }
 0x664   : >> { %4030 = vst.msk [vmem:[#allocation4 + $0x60] sm:$0xff] %vm132_vm7, %v3980_v8  ;;  %4031 = vst.msk [vmem:[#allocation4 + $0x68] sm:$0xff] %vm132_vm7, %v3981_v47  ;;  %v3932_v3 = vmul.f32 %v3672_v50, %v5678_v31  ;;  %v3933_v9 = vmul.f32 %v3679_v43, %v5678_v31 }
 0x666   : >> { %v3982_v44 = vsub.f32 %v3532_v36, %v3932_v3  ;;  %v3983_v57 = vsub.f32 %v3533_v63, %v3933_v9  ;;  %v3544_v36 = vld [vmem:[#allocation4 + $0xd0] sm:$0xff]  ;;  %v3545_v63 = vld [vmem:[#allocation4 + $0xd8] sm:$0xff] }
 0x667   : >> { %v3686_v33 = vpop.permute.xlu1 %3685  ;;  %v3693_v18 = vpop.permute.xlu0 %3692 }
 0x668   : >> { %4032 = vst.msk [vmem:[#allocation4 + $0x70] sm:$0xff] %vm132_vm7, %v3982_v44  ;;  %4033 = vst.msk [vmem:[#allocation4 + $0x78] sm:$0xff] %vm132_vm7, %v3983_v57  ;;  %v3934_v51 = vmul.f32 %v3686_v33, %v5678_v31  ;;  %v3935_v49 = vmul.f32 %v3693_v18, %v5678_v31 }
 0x66a   : >> { %v3984_v60 = vsub.f32 %v3534_v6, %v3934_v51  ;;  %v3985_v62 = vsub.f32 %v3535_v59, %v3935_v49  ;;  %v3546_v6 = vld [vmem:[#allocation4 + $0xe0] sm:$0xff]  ;;  %v3547_v59 = vld [vmem:[#allocation4 + $0xe8] sm:$0xff] }
 0x66b   : >> { %v3700_v37 = vpop.permute.xlu1 %3699  ;;  %v3707_v11 = vpop.permute.xlu0 %3706 }
 0x66c   : >> { %4034 = vst.msk [vmem:[#allocation4 + $0x80] sm:$0xff] %vm132_vm7, %v3984_v60  ;;  %4035 = vst.msk [vmem:[#allocation4 + $0x88] sm:$0xff] %vm132_vm7, %v3985_v62  ;;  %v3936_v42 = vmul.f32 %v3700_v37, %v5678_v31  ;;  %v3937_v21 = vmul.f32 %v3707_v11, %v5678_v31 }
 0x66e   : >> { %v3986_v40 = vsub.f32 %v3536_v25, %v3936_v42  ;;  %v3987_v45 = vsub.f32 %v3537_v7, %v3937_v21  ;;  %v3548_v25 = vld [vmem:[#allocation4 + $0xf0] sm:$0xff]  ;;  %v3549_v7 = vld [vmem:[#allocation4 + $0xf8] sm:$0xff] }
 0x66f   : >> { %v3714_v46 = vpop.permute.xlu1 %3713  ;;  %v3721_v23 = vpop.permute.xlu0 %3720 }
 0x670   : >> { %4036 = vst.msk [vmem:[#allocation4 + $0x90] sm:$0xff] %vm132_vm7, %v3986_v40  ;;  %4037 = vst.msk [vmem:[#allocation4 + $0x98] sm:$0xff] %vm132_vm7, %v3987_v45  ;;  %v3938_v4 = vmul.f32 %v3714_v46, %v5678_v31  ;;  %v3939_v56 = vmul.f32 %v3721_v23, %v5678_v31 }
 0x672   : >> { %v3988_v24 = vsub.f32 %v3538_v29, %v3938_v4  ;;  %v3989_v41 = vsub.f32 %v3539_v12, %v3939_v56  ;;  %v3550_v29 = vld [vmem:[#allocation4 + $0x100] sm:$0xff]  ;;  %v3551_v12 = vld [vmem:[#allocation4 + $0x108] sm:$0xff] }
 0x673   : >> { %v3728_v22 = vpop.permute.xlu1 %3727  ;;  %v3735_v5 = vpop.permute.xlu0 %3734 }
 0x674   : >> { %4038 = vst.msk [vmem:[#allocation4 + $0xa0] sm:$0xff] %vm132_vm7, %v3988_v24  ;;  %4039 = vst.msk [vmem:[#allocation4 + $0xa8] sm:$0xff] %vm132_vm7, %v3989_v41  ;;  %v3940_v28 = vmul.f32 %v3728_v22, %v5678_v31  ;;  %v3941_v1 = vmul.f32 %v3735_v5, %v5678_v31 }
 0x676   : >> { %v3990_v17 = vsub.f32 %v3540_v39, %v3940_v28  ;;  %v3991_v2 = vsub.f32 %v3541_v54, %v3941_v1  ;;  %v3552_v39 = vld [vmem:[#allocation4 + $0x110] sm:$0xff]  ;;  %v3553_v54 = vld [vmem:[#allocation4 + $0x118] sm:$0xff] }
 0x677   : >> { %v3742_v53 = vpop.permute.xlu1 %3741  ;;  %v3749_v34 = vpop.permute.xlu0 %3748 }
 0x678   : >> { %4040 = vst.msk [vmem:[#allocation4 + $0xb0] sm:$0xff] %vm132_vm7, %v3990_v17  ;;  %4041 = vst.msk [vmem:[#allocation4 + $0xb8] sm:$0xff] %vm132_vm7, %v3991_v2  ;;  %v3942_v27 = vmul.f32 %v3742_v53, %v5678_v31  ;;  %v3943_v48 = vmul.f32 %v3749_v34, %v5678_v31 }
 0x67a   : >> { %v3992_v8 = vsub.f32 %v3542_v0, %v3942_v27  ;;  %v3993_v47 = vsub.f32 %v3543_v38, %v3943_v48  ;;  %v3554_v0 = vld [vmem:[#allocation4 + $0x120] sm:$0xff]  ;;  %v3555_v38 = vld [vmem:[#allocation4 + $0x128] sm:$0xff] }
 0x67b   : >> { %v3756_v50 = vpop.permute.xlu1 %3755  ;;  %v3763_v43 = vpop.permute.xlu0 %3762 }
 0x67c   : >> { %4042 = vst.msk [vmem:[#allocation4 + $0xc0] sm:$0xff] %vm132_vm7, %v3992_v8  ;;  %4043 = vst.msk [vmem:[#allocation4 + $0xc8] sm:$0xff] %vm132_vm7, %v3993_v47  ;;  %v3944_v3 = vmul.f32 %v3756_v50, %v5678_v31  ;;  %v3945_v9 = vmul.f32 %v3763_v43, %v5678_v31 }
 0x67e   : >> { %v3994_v44 = vsub.f32 %v3544_v36, %v3944_v3  ;;  %v3995_v57 = vsub.f32 %v3545_v63, %v3945_v9  ;;  %v3556_v36 = vld [vmem:[#allocation4 + $0x130] sm:$0xff]  ;;  %v3557_v63 = vld [vmem:[#allocation4 + $0x138] sm:$0xff] }
 0x67f   : >> { %v3770_v33 = vpop.permute.xlu1 %3769  ;;  %v3777_v18 = vpop.permute.xlu0 %3776 }
 0x680   : >> { %4044 = vst.msk [vmem:[#allocation4 + $0xd0] sm:$0xff] %vm132_vm7, %v3994_v44  ;;  %4045 = vst.msk [vmem:[#allocation4 + $0xd8] sm:$0xff] %vm132_vm7, %v3995_v57  ;;  %v3946_v51 = vmul.f32 %v3770_v33, %v5678_v31  ;;  %v3947_v49 = vmul.f32 %v3777_v18, %v5678_v31 }
 0x682   : >> { %v3996_v60 = vsub.f32 %v3546_v6, %v3946_v51  ;;  %v3997_v62 = vsub.f32 %v3547_v59, %v3947_v49  ;;  %v3558_v6 = vld [vmem:[#allocation4 + $0x140] sm:$0xff]  ;;  %v3559_v59 = vld [vmem:[#allocation4 + $0x148] sm:$0xff] }
 0x683   : >> { %v3784_v37 = vpop.permute.xlu1 %3783  ;;  %v3791_v11 = vpop.permute.xlu0 %3790 }
 0x684   : >> { %4046 = vst.msk [vmem:[#allocation4 + $0xe0] sm:$0xff] %vm132_vm7, %v3996_v60  ;;  %4047 = vst.msk [vmem:[#allocation4 + $0xe8] sm:$0xff] %vm132_vm7, %v3997_v62  ;;  %v3948_v42 = vmul.f32 %v3784_v37, %v5678_v31  ;;  %v3949_v21 = vmul.f32 %v3791_v11, %v5678_v31 }
 0x686   : >> { %v3998_v40 = vsub.f32 %v3548_v25, %v3948_v42  ;;  %v3999_v45 = vsub.f32 %v3549_v7, %v3949_v21  ;;  %v3560_v25 = vld [vmem:[#allocation4 + $0x150] sm:$0xff]  ;;  %v3561_v7 = vld [vmem:[#allocation4 + $0x158] sm:$0xff] }
 0x687   : >> { %v3798_v46 = vpop.permute.xlu1 %3797  ;;  %v3805_v23 = vpop.permute.xlu0 %3804 }
 0x688   : >> { %4048 = vst.msk [vmem:[#allocation4 + $0xf0] sm:$0xff] %vm132_vm7, %v3998_v40  ;;  %4049 = vst.msk [vmem:[#allocation4 + $0xf8] sm:$0xff] %vm132_vm7, %v3999_v45  ;;  %v3950_v4 = vmul.f32 %v3798_v46, %v5678_v31  ;;  %v3951_v56 = vmul.f32 %v3805_v23, %v5678_v31 }
 0x68a   : >> { %v4000_v24 = vsub.f32 %v3550_v29, %v3950_v4  ;;  %v4001_v41 = vsub.f32 %v3551_v12, %v3951_v56  ;;  %v3562_v29 = vld [vmem:[#allocation4 + $0x160] sm:$0xff]  ;;  %v3563_v12 = vld [vmem:[#allocation4 + $0x168] sm:$0xff] }
 0x68b   : >> { %v3812_v22 = vpop.permute.xlu1 %3811  ;;  %v3819_v5 = vpop.permute.xlu0 %3818 }
 0x68c   : >> { %4050 = vst.msk [vmem:[#allocation4 + $0x100] sm:$0xff] %vm132_vm7, %v4000_v24  ;;  %4051 = vst.msk [vmem:[#allocation4 + $0x108] sm:$0xff] %vm132_vm7, %v4001_v41  ;;  %v3952_v28 = vmul.f32 %v3812_v22, %v5678_v31  ;;  %v3953_v1 = vmul.f32 %v3819_v5, %v5678_v31 }
 0x68e   : >> { %v4002_v17 = vsub.f32 %v3552_v39, %v3952_v28  ;;  %v4003_v2 = vsub.f32 %v3553_v54, %v3953_v1  ;;  %v3564_v39 = vld [vmem:[#allocation4 + $0x170] sm:$0xff]  ;;  %v3565_v54 = vld [vmem:[#allocation4 + $0x178] sm:$0xff] }
 0x68f   : >> { %v3826_v53 = vpop.permute.xlu1 %3825  ;;  %v3833_v34 = vpop.permute.xlu0 %3832 }
 0x690   : >> { %4052 = vst.msk [vmem:[#allocation4 + $0x110] sm:$0xff] %vm132_vm7, %v4002_v17  ;;  %4053 = vst.msk [vmem:[#allocation4 + $0x118] sm:$0xff] %vm132_vm7, %v4003_v2  ;;  %v3954_v27 = vmul.f32 %v3826_v53, %v5678_v31  ;;  %v3955_v48 = vmul.f32 %v3833_v34, %v5678_v31 }
 0x692   : >> { %v4004_v8 = vsub.f32 %v3554_v0, %v3954_v27  ;;  %v4005_v47 = vsub.f32 %v3555_v38, %v3955_v48  ;;  %v3566_v0 = vld [vmem:[#allocation4 + $0x180] sm:$0xff]  ;;  %v3567_v38 = vld [vmem:[#allocation4 + $0x188] sm:$0xff] }
 0x693   : >> { %v3840_v50 = vpop.permute.xlu1 %3839  ;;  %v3847_v43 = vpop.permute.xlu0 %3846 }
 0x694   : >> { %4054 = vst.msk [vmem:[#allocation4 + $0x120] sm:$0xff] %vm132_vm7, %v4004_v8  ;;  %4055 = vst.msk [vmem:[#allocation4 + $0x128] sm:$0xff] %vm132_vm7, %v4005_v47  ;;  %v3956_v3 = vmul.f32 %v3840_v50, %v5678_v31  ;;  %v3957_v9 = vmul.f32 %v3847_v43, %v5678_v31 }
 0x696   : >> { %v4006_v44 = vsub.f32 %v3556_v36, %v3956_v3  ;;  %v4007_v57 = vsub.f32 %v3557_v63, %v3957_v9  ;;  %v6325_v36 = vmov %v6317_v58 }
 0x697   : >> { %v3854_v33 = vpop.permute.xlu1 %3853  ;;  %v3861_v18 = vpop.permute.xlu0 %3860  ;;  %v6326_v36 = vld [vmem:[#allocation34_spill] sm:$0xff] (%p2735_p4) }
 0x698   : >> { %4056 = vst.msk [vmem:[#allocation4 + $0x130] sm:$0xff] %vm132_vm7, %v4006_v44  ;;  %4057 = vst.msk [vmem:[#allocation4 + $0x138] sm:$0xff] %vm132_vm7, %v4007_v57  ;;  %v3958_v51 = vmul.f32 %v3854_v33, %v5678_v31  ;;  %v3959_v49 = vmul.f32 %v3861_v18, %v5678_v31  ;;  %v4070_v50 = vsub.f32 (%p2735_p4), %v6326_v36, %v6317_v58 }
 0x69a   : >> { %v4008_v60 = vsub.f32 %v3558_v6, %v3958_v51  ;;  %v4009_v62 = vsub.f32 %v3559_v59, %v3959_v49  ;;  %4071 = vst.msk [vmem:[#allocation2] sm:$0xff] (%p2735_p4), %vm132_vm7, %v4070_v50 }
 0x69b   : >> { %v3868_v37 = vpop.permute.xlu1 %3867  ;;  %v3875_v11 = vpop.permute.xlu0 %3874 }
 0x69c   : >> { %4058 = vst.msk [vmem:[#allocation4 + $0x140] sm:$0xff] %vm132_vm7, %v4008_v60  ;;  %4059 = vst.msk [vmem:[#allocation4 + $0x148] sm:$0xff] %vm132_vm7, %v4009_v62  ;;  %v3960_v42 = vmul.f32 %v3868_v37, %v5678_v31  ;;  %v3961_v21 = vmul.f32 %v3875_v11, %v5678_v31 }
 0x69e   : >> { %v4010_v40 = vsub.f32 %v3560_v25, %v3960_v42  ;;  %v4011_v45 = vsub.f32 %v3561_v7, %v3961_v21 }
 0x69f   : >> { %v3882_v46 = vpop.permute.xlu1 %3881  ;;  %v3889_v23 = vpop.permute.xlu0 %3888 }
 0x6a0   : >> { %4060 = vst.msk [vmem:[#allocation4 + $0x150] sm:$0xff] %vm132_vm7, %v4010_v40  ;;  %4061 = vst.msk [vmem:[#allocation4 + $0x158] sm:$0xff] %vm132_vm7, %v4011_v45  ;;  %v3962_v4 = vmul.f32 %v3882_v46, %v5678_v31  ;;  %v3963_v56 = vmul.f32 %v3889_v23, %v5678_v31 }
 0x6a2   : >> { %v4012_v24 = vsub.f32 %v3562_v29, %v3962_v4  ;;  %v4013_v41 = vsub.f32 %v3563_v12, %v3963_v56 }
 0x6a3   : >> { %v3896_v22 = vpop.permute.xlu1 %3895  ;;  %v3903_v5 = vpop.permute.xlu0 %3902 }
 0x6a4   : >> { %4062 = vst.msk [vmem:[#allocation4 + $0x160] sm:$0xff] %vm132_vm7, %v4012_v24  ;;  %4063 = vst.msk [vmem:[#allocation4 + $0x168] sm:$0xff] %vm132_vm7, %v4013_v41  ;;  %v3964_v28 = vmul.f32 %v3896_v22, %v5678_v31  ;;  %v3965_v1 = vmul.f32 %v3903_v5, %v5678_v31 }
 0x6a6   : >> { %v4014_v17 = vsub.f32 %v3564_v39, %v3964_v28  ;;  %v4015_v2 = vsub.f32 %v3565_v54, %v3965_v1 }
 0x6a7   : >> { %v3910_v53 = vpop.permute.xlu1 %3909  ;;  %v3917_v34 = vpop.permute.xlu0 %3916  ;;  %2737 = sbr.rel (!%p2735_p4) target bundleno = 1111 (0x457), region = 85 }
 0x6a8   : >> { %4064 = vst.msk [vmem:[#allocation4 + $0x170] sm:$0xff] %vm132_vm7, %v4014_v17  ;;  %4065 = vst.msk [vmem:[#allocation4 + $0x178] sm:$0xff] %vm132_vm7, %v4015_v2  ;;  %v3966_v27 = vmul.f32 %v3910_v53, %v5678_v31  ;;  %v3967_v48 = vmul.f32 %v3917_v34, %v5678_v31 }
 0x6aa   : >> { %v4016_v8 = vsub.f32 %v3566_v0, %v3966_v27  ;;  %v4017_v47 = vsub.f32 %v3567_v38, %v3967_v48 }
 0x6ac   : >> { %4066 = vst.msk [vmem:[#allocation4 + $0x180] sm:$0xff] %vm132_vm7, %v4016_v8  ;;  %4067 = vst.msk [vmem:[#allocation4 + $0x188] sm:$0xff] %vm132_vm7, %v4017_v47 }
 0x6ae PF: > { %s141_s1 = sadd.s32 1, %s4518_s1  }
 0x6af   : > { %p138_p5 = scmp.ge.s32.totalorder %s141_s1, 40  }
 0x6b0   :  { %v6327_v31 = vld [vmem:[#allocation25_spill] sm:$0xff] (%p138_p5)  ;;  %v6328_v63 = vld [vmem:[#allocation26_spill] sm:$0xff] (%p138_p5)  ;;  %v4545_v3 = vmov (%p138_p5), 0.0|0.0   ;;  %v6329_v9 = vld [vmem:[#allocation27_spill] sm:$0xff] (%p138_p5)  ;;  %vm4546_vm13 = vmmov (%p138_p5), 0   ;;  %v6331_v58 = vmov (%p138_p5), 0.0  }
 0x6b1   :  { %140 = sbr.rel (!%p138_p5) target bundleno = 201 (0xc9), region = 96  ;;  %v4390_v43 = vpack.c.bf16 (%p138_p5), %v6328_v63, %v6327_v31  ;;  %4389 = vmatprep.subr.bf16.mxu0 (%p138_p5), %v4545_v3  ;;  %v6330_v13 = vld [vmem:[#allocation28_spill] sm:$0xff] (%p138_p5)  ;;  %4377 = vmatprep.mubr.msk.f32.mxu0 (%p138_p5), %vm4546_vm13, %v6331_v58  ;;  %v6332_v10 = vld [vmem:[#allocation29_spill] sm:$0xff] (%p138_p5)  ;;  %v6333_v15 = vld [vmem:[#allocation31_spill] sm:$0xff] (%p138_p5)  ;;  %vm4076_vm14 = vcmask (%p138_p5), 1041408   ;;  %vm4170_vm15 = vcmask (%p138_p5), 7168  }
 0x6b2   :  { %v4393_v52 = vpack.c.bf16 (%p138_p5), %v6330_v13, %v6329_v9  ;;  %v4396_v16 = vpack.c.bf16 (%p138_p5), %v6333_v15, %v6332_v10  ;;  %v4072_v14 = vld [vmem:[#allocation2] sm:$0xff] (%p138_p5)  ;;  %v4236_v57 = vld [vmem:[#allocation6] ss:$0 sm:$0xff] (%p138_p5) }
 0x6b3   :  { %4391 = vmatpush3.bf16.msra.mxu0 (%p138_p5), %v4390_v43  ;;  %v6334_v30 = vld [vmem:[#allocation33_spill] sm:$0xff] (%p138_p5) }
 0x6b4   :  { %4392 = vmatprep.subr.bf16.mxu0 (%p138_p5), %v4545_v3  ;;  %v4235_v55 = vld [vmem:[%s6154_s5] ss:$0 sm:$0xff] (%p138_p5) }
 0x6b7   :  { %4394 = vmatpush3.bf16.msra.mxu0 (%p138_p5), %v4393_v52 }
 0x6b8   :  { %4395 = vmatprep.subr.bf16.mxu0 %v4545_v3 }
 0x6bb   :  { %4397 = vmatpush3.bf16.msra.mxu0 %v4396_v16 }
 0x6bc   :  { %4375 = vmatprep.subr.mxu0 %v6331_v58 }
 0x6bf   :  { %4376 = vmatpush3.msk.msra.mxu0 %vm4076_vm14, %v4679_v32 }
 0x6c0   :  { %4378 = vmatmul.mubr.msk.f32.vlgmr.msra.gmra.mrb[0].mxu0 %vm132_vm7, %v4072_v14 }
 0x793   :  { %v4146_v19 = vpop.f32.mrb[0].mxu0 }
 0x794   :  { %v4147_v35 = vadd.f32 %v4146_v19, %v6334_v30  ;;  %v4379_v61 = vpop.f32.mrb[1].mxu0 }
 0x796   :  { %4454 = vtanh.f32 %v4147_v35 }
 0x7a0   :  { %v4455_v26 = vpop.eup %4454 }
 0x7a1   :  { %v4158_v20 = vmul.f32 %v4455_v26, %v4235_v55 }
 0x7a3   :  { %v4159_v44 = vsel %vm132_vm7, %v4158_v20, 0.0 }
 0x7a4   :  { %4160 = vadd.xlane.f32.xlu0 %v4159_v44 }
 0x831   :  { %v4161_v6 = vpop.xlane.xlu0 %4160 }
 0x832   :  { %v4169_v32 = vadd.f32 %v4236_v57, %v4161_v6 }
 0x834   :  { %4171 = vst.msk [vmem:[%s6156_s7] sm:$0xff] %vm4170_vm15, %v4169_v32 }
 0x835   :  { %4176 = vsyncpa [#allocation8], 1 }
 0x836   :  { %4177 = vsyncpa [#allocation10], 1 }

</bundles_post_ra>
